<compile_context>
chip_gen: v7x
topology: tpu7x:2x2x1
jax: 0.10.0
libtpu: 0.0.40
codegen_flags: <defaults>
</compile_context>

<pallas_src>
import jax
import jax.numpy as jnp
from jax.experimental import pallas as pl
from jax.experimental.pallas import tpu as pltpu


ACTS = {
    "relu": lambda v: jnp.maximum(v, 0.0),
    "sigmoid": jax.nn.sigmoid,
    "tanh": jnp.tanh,
}


# ---------------------------------------------------------------------------
# Fused kernel (one image per grid step, everything stays on-chip)
# ---------------------------------------------------------------------------
def _make_convnet_kernel(n_conv, n_dense, act):
    def conv3x3(v, w_taps, b_row):
        # v: (H, W, Cin) value, w_taps: (9, Cin, Cout) value (tap t = kh*3+kw),
        # b_row: (1, Cout) value.  Returns (H-2, W-2, Cout) ("valid", stride 1).
        H, W, Cin = v.shape
        Cout = w_taps.shape[-1]
        Ho, Wo = H - 2, W - 2
        acc = None
        for kh in range(3):
            for kw in range(3):
                tap = v[kh:kh + Ho, kw:kw + Wo, :]            # (Ho, Wo, Cin)
                w_t = w_taps[kh * 3 + kw]                     # (Cin, Cout)
                if Cin == 1:
                    # One VPU broadcast multiply beats a K=1 MXU pass.
                    term = tap * w_t                          # (Ho,Wo,1)*(1,Cout)
                else:
                    # Row-batched MXU matmul over the Ho output rows.
                    term = jnp.einsum(
                        "hwk,hkc->hwc", tap,
                        jnp.broadcast_to(w_t, (Ho, Cin, Cout)),
                        preferred_element_type=jnp.float32)
                acc = term if acc is None else acc + term
        return acc + b_row                                    # bias added once

    def maxpool2x2(v):
        # MaxPool2d(kernel=2, stride=2), vectorized: no 2x2 tiles, no sub-tile stores.
        H, W, C = v.shape
        Hp, Wp = H // 2, W // 2
        v = v[:2 * Hp, :2 * Wp, :]
        v = v.reshape(Hp, 2, 2 * Wp, C)        # regroups leading dims only (free)
        v = jnp.maximum(v[:, 0], v[:, 1])      # pool along H -> (Hp, 2*Wp, C)
        cols = [jnp.maximum(v[:, 2 * j:2 * j + 1, :], v[:, 2 * j + 1:2 * j + 2, :])
                for j in range(Wp)]            # full-height column maxes
        return jnp.concatenate(cols, axis=1)   # (Hp, Wp, C)

    def kernel(*refs):
        x_ref, o_ref = refs[0], refs[-1]
        prm = refs[1:-1]
        conv_refs = [(prm[2 * i], prm[2 * i + 1]) for i in range(n_conv)]
        dense_refs = [(prm[2 * n_conv + 2 * i], prm[2 * n_conv + 2 * i + 1])
                      for i in range(n_dense)]

        h = x_ref[0].astype(jnp.float32)                      # (H, W, Cin) NHWC

        # Sequential(conv0, MaxPool2d(2), act, [conv_i, act] ...)
        w_r, b_r = conv_refs[0]
        h = conv3x3(h, w_r[...], b_r[...])
        h = act(maxpool2x2(h))
        for w_r, b_r in conv_refs[1:]:
            h = act(conv3x3(h, w_r[...], b_r[...]))

        # Flatten + first Linear.  The first dense weight was row-permuted at trace
        # time from PyTorch NCHW-flatten order (c*P + p) to NHWC order (p*C + c), so
        # no activation transpose / lane-changing reshape is needed in the kernel.
        Hf, Wf, Cf = h.shape
        w_r, b_r = dense_refs[0]
        w_fc = w_r[...]                                       # (Hf*Wf*Cf, D0), loaded once
        feat = b_r[...].astype(jnp.float32)                   # (1, D0)
        for ih in range(Hf):
            for iw in range(Wf):
                p = ih * Wf + iw
                feat = feat + jnp.dot(h[ih, iw:iw + 1, :],
                                      w_fc[p * Cf:(p + 1) * Cf, :],
                                      preferred_element_type=jnp.float32)
        if n_dense > 1:
            feat = act(feat)
        # Remaining Linear layers (activation after each except the last).
        for i in range(1, n_dense):
            w_r, b_r = dense_refs[i]
            feat = jnp.dot(feat, w_r[...],
                           preferred_element_type=jnp.float32) + b_r[...]
            if i != n_dense - 1:
                feat = act(feat)

        o_ref[0] = feat.astype(o_ref.dtype)

    return kernel


def _make_dense_kernel(n_dense, act):
    # Dense-only variant of the module (len(channels) <= 1): whole batch in one step.
    def kernel(*refs):
        x_ref, o_ref = refs[0], refs[-1]
        prm = refs[1:-1]
        feat = x_ref[...].astype(jnp.float32)
        for i in range(n_dense):
            w_r, b_r = prm[2 * i], prm[2 * i + 1]
            feat = jnp.dot(feat, w_r[...],
                           preferred_element_type=jnp.float32) + b_r[...]
            if i != n_dense - 1:
                feat = act(feat)
        o_ref[...] = feat.astype(o_ref.dtype)

    return kernel


# ---------------------------------------------------------------------------
# Wrapper
# ---------------------------------------------------------------------------
def convnet_forward(x_nchw, params, activation="relu"):
    act = ACTS[activation]
    N, C0, H, W = x_nchw.shape
    convs, dense = params["convs"], params["dense"]
    n_conv, n_dense = len(convs), len(dense)
    D_out = dense[-1][0].shape[1]

    if n_conv == 0:
        feat = x_nchw.reshape(N, -1).astype(jnp.float32)
        args = [feat]
        in_specs = [pl.BlockSpec(feat.shape, lambda n: (0, 0))]
        for w, b in dense:
            w = w.astype(jnp.float32)
            b2 = b.reshape(1, -1).astype(jnp.float32)
            args += [w, b2]
            in_specs += [pl.BlockSpec(w.shape, lambda n: (0, 0)),
                         pl.BlockSpec(b2.shape, lambda n: (0, 0))]
        return pl.pallas_call(
            _make_dense_kernel(n_dense, act),
            out_shape=jax.ShapeDtypeStruct((N, D_out), jnp.float32),
            grid=(1,),
            in_specs=in_specs,
            out_specs=pl.BlockSpec((N, D_out), lambda n: (0, 0)),
        )(*args)

    # ---- conv path: single fused kernel, grid over the batch -----------------
    x_nhwc = jnp.transpose(x_nchw, (0, 2, 3, 1)).astype(jnp.float32)   # NHWC

    args = [x_nhwc]
    in_specs = [pl.BlockSpec((1, H, W, C0), lambda n: (n, 0, 0, 0))]

    size = H
    for i, (w, b) in enumerate(convs):
        cin, cout = w.shape[2], w.shape[3]
        w9 = w.reshape(9, cin, cout).astype(jnp.float32)   # tap index t = kh*3 + kw
        b2 = b.reshape(1, cout).astype(jnp.float32)
        args += [w9, b2]
        in_specs += [pl.BlockSpec(w9.shape, lambda n: (0, 0, 0)),
                     pl.BlockSpec(b2.shape, lambda n: (0, 0))]
        size -= 2                     # 3x3 valid conv
        if i == 0:
            size //= 2                # MaxPool2d(2) after the first conv

    Cf = convs[-1][0].shape[3]
    P = size * size

    for i, (w, b) in enumerate(dense):
        w = w.astype(jnp.float32)
        if i == 0:
            # Permute rows from PyTorch NCHW-flatten order (c*P + p) to the kernel's
            # NHWC order (p*Cf + c).  Done once at trace time on a tiny array; it
            # replaces the activation transpose + reshape of the previous version.
            D = w.shape[1]
            w = w.reshape(Cf, P, D).transpose(1, 0, 2).reshape(P * Cf, D)
        b2 = b.reshape(1, -1).astype(jnp.float32)
        args += [w, b2]
        in_specs += [pl.BlockSpec(w.shape, lambda n: (0, 0)),
                     pl.BlockSpec(b2.shape, lambda n: (0, 0))]

    out = pl.pallas_call(
        _make_convnet_kernel(n_conv, n_dense, act),
        out_shape=jax.ShapeDtypeStruct((N, 1, D_out), jnp.float32),
        grid=(N,),
        in_specs=in_specs,
        out_specs=pl.BlockSpec((1, 1, D_out), lambda n: (n, 0, 0)),
        compiler_params=pltpu.CompilerParams(dimension_semantics=("parallel",)),
    )(*args)
    return out.reshape(N, D_out)


# ---------------------------------------------------------------------------
# Params + plain-XLA reference (same PyTorch semantics) for a self-check
# ---------------------------------------------------------------------------
def init_convnet_params(key, input_size=16, channels=(1, 8, 8, 8), denses=(10,)):
    params = {"convs": [], "dense": []}
    size = input_size
    for idx, (cin, cout) in enumerate(zip(channels[:-1], channels[1:])):
        key, kw, kb = jax.random.split(key, 3)
        w = jax.random.normal(kw, (3, 3, cin, cout), jnp.float32) * 0.1   # HWIO
        b = jax.random.normal(kb, (1, cout), jnp.float32) * 0.1
        params["convs"].append((w, b))
        size -= 2
        if idx == 0:
            size //= 2
    feature_count = channels[-1] * size * size if len(channels) > 1 else input_size * input_size
    in_f = feature_count
    for out_f in denses:
        key, kw, kb = jax.random.split(key, 3)
        w = jax.random.normal(kw, (in_f, out_f), jnp.float32) * 0.1       # (in, out)
        b = jax.random.normal(kb, (1, out_f), jnp.float32) * 0.1
        params["dense"].append((w, b))
        in_f = out_f
    return params


def convnet_reference(x_nchw, params, activation="relu"):
    act = ACTS[activation]
    convs, dense = params["convs"], params["dense"]
    N = x_nchw.shape[0]
    if convs:
        x = jnp.transpose(x_nchw, (0, 2, 3, 1)).astype(jnp.float32)       # NHWC
        for i, (w, b) in enumerate(convs):
            x = jax.lax.conv_general_dilated(
                x, w.astype(jnp.float32), window_strides=(1, 1), padding="VALID",
                dimension_numbers=("NHWC", "HWIO", "NHWC"),
                precision=jax.lax.Precision.HIGHEST)
            x = x + b.reshape(1, 1, 1, -1)
            if i == 0:
                x = jax.lax.reduce_window(x, -jnp.inf, jax.lax.max,
                                          (1, 2, 2, 1), (1, 2, 2, 1), "VALID")
            x = act(x)
        feat = jnp.transpose(x, (0, 3, 1, 2)).reshape(N, -1)               # NCHW flatten
    else:
        feat = x_nchw.reshape(N, -1).astype(jnp.float32)
    for i, (w, b) in enumerate(dense):
        feat = jnp.dot(feat, w, precision=jax.lax.Precision.HIGHEST) + b.reshape(1, -1)
        if i != len(dense) - 1:
            feat = act(feat)
    return feat


if __name__ == "__main__":
    key = jax.random.PRNGKey(0)
    k_x, k_p = jax.random.split(key)

    batch, input_size = 2, 16
    channels = (1, 8, 8, 8)
    denses = (10,)

    x = jax.random.normal(k_x, (batch, channels[0], input_size, input_size), jnp.float32)
    params = init_convnet_params(k_p, input_size=input_size, channels=channels, denses=denses)

    fwd = jax.jit(lambda xx, pp: convnet_forward(xx, pp, activation="relu"))
    out = jax.block_until_ready(fwd(x, params))
    assert out.shape == (batch, denses[-1]), out.shape
    assert bool(jnp.all(jnp.isfinite(out)))

    ref = jax.block_until_ready(convnet_reference(x, params, activation="relu"))
    assert jnp.allclose(out, ref, atol=5e-3, rtol=5e-3), float(jnp.max(jnp.abs(out - ref)))

    print("KERNEL_OK")
</pallas_src>

<mosaic_0001>
module attributes {stable_mosaic.version = 11 : i64} {
  func.func @kernel(%arg0: i32, %arg1: memref<1x16x16x1xf32, #tpu.memory_space<vmem>>, %arg2: memref<9x1x8xf32, #tpu.memory_space<vmem>>, %arg3: memref<1x8xf32, #tpu.memory_space<vmem>>, %arg4: memref<9x8x8xf32, #tpu.memory_space<vmem>>, %arg5: memref<1x8xf32, #tpu.memory_space<vmem>>, %arg6: memref<9x8x8xf32, #tpu.memory_space<vmem>>, %arg7: memref<1x8xf32, #tpu.memory_space<vmem>>, %arg8: memref<72x10xf32, #tpu.memory_space<vmem>>, %arg9: memref<1x10xf32, #tpu.memory_space<vmem>>, %arg10: memref<1x1x10xf32, #tpu.memory_space<vmem>>) attributes {dimension_semantics = [#tpu.dimension_semantics<parallel>], iteration_bounds = array<i64: 2>, scalar_prefetch = 0 : i64, scratch_operands = 0 : i64, tpu.core_type = #tpu.core_type<tc>, window_params = [{transform_indices = @transform_0, window_bounds = array<i64: 1, 16, 16, 1>}, {pipeline_mode = #tpu.pipeline_mode<synchronous>, transform_indices = @transform_1, window_bounds = array<i64: 9, 1, 8>}, {pipeline_mode = #tpu.pipeline_mode<synchronous>, transform_indices = @transform_2, window_bounds = array<i64: 1, 8>}, {pipeline_mode = #tpu.pipeline_mode<synchronous>, transform_indices = @transform_3, window_bounds = array<i64: 9, 8, 8>}, {pipeline_mode = #tpu.pipeline_mode<synchronous>, transform_indices = @transform_4, window_bounds = array<i64: 1, 8>}, {pipeline_mode = #tpu.pipeline_mode<synchronous>, transform_indices = @transform_5, window_bounds = array<i64: 9, 8, 8>}, {pipeline_mode = #tpu.pipeline_mode<synchronous>, transform_indices = @transform_6, window_bounds = array<i64: 1, 8>}, {pipeline_mode = #tpu.pipeline_mode<synchronous>, transform_indices = @transform_7, window_bounds = array<i64: 72, 10>}, {pipeline_mode = #tpu.pipeline_mode<synchronous>, transform_indices = @transform_8, window_bounds = array<i64: 1, 10>}, {transform_indices = @transform_9, window_bounds = array<i64: 1, 1, 10>}]} {
    %c0 = arith.constant 0 : index
    %c0_0 = arith.constant 0 : index
    %c0_1 = arith.constant 0 : index
    %c0_2 = arith.constant 0 : index
    %0 = vector.load %arg1[%c0, %c0_0, %c0_1, %c0_2] : memref<1x16x16x1xf32, #tpu.memory_space<vmem>>, vector<1x16x16x1xf32>
    %1 = vector.shape_cast %0 : vector<1x16x16x1xf32> to vector<16x16x1xf32>
    %c0_3 = arith.constant 0 : index
    %c0_4 = arith.constant 0 : index
    %c0_5 = arith.constant 0 : index
    %2 = vector.load %arg2[%c0_3, %c0_4, %c0_5] : memref<9x1x8xf32, #tpu.memory_space<vmem>>, vector<9x1x8xf32>
    %c0_6 = arith.constant 0 : index
    %c0_7 = arith.constant 0 : index
    %3 = vector.load %arg3[%c0_6, %c0_7] : memref<1x8xf32, #tpu.memory_space<vmem>>, vector<1x8xf32>
    %4 = vector.extract_strided_slice %1 {offsets = [0, 0, 0], sizes = [14, 14, 1], strides = [1, 1, 1]} : vector<16x16x1xf32> to vector<14x14x1xf32>
    %5 = vector.extract_strided_slice %2 {offsets = [0, 0, 0], sizes = [1, 1, 8], strides = [1, 1, 1]} : vector<9x1x8xf32> to vector<1x1x8xf32>
    %6 = vector.shape_cast %5 : vector<1x1x8xf32> to vector<1x8xf32>
    %7 = vector.shape_cast %6 : vector<1x8xf32> to vector<1x1x8xf32>
    %8 = vector.broadcast %4 : vector<14x14x1xf32> to vector<14x14x8xf32>
    %9 = vector.broadcast %7 : vector<1x1x8xf32> to vector<14x14x8xf32>
    %10 = arith.mulf %8, %9 : vector<14x14x8xf32>
    %11 = vector.extract_strided_slice %1 {offsets = [0, 1, 0], sizes = [14, 14, 1], strides = [1, 1, 1]} : vector<16x16x1xf32> to vector<14x14x1xf32>
    %12 = vector.extract_strided_slice %2 {offsets = [1, 0, 0], sizes = [1, 1, 8], strides = [1, 1, 1]} : vector<9x1x8xf32> to vector<1x1x8xf32>
    %13 = vector.shape_cast %12 : vector<1x1x8xf32> to vector<1x8xf32>
    %14 = vector.shape_cast %13 : vector<1x8xf32> to vector<1x1x8xf32>
    %15 = vector.broadcast %11 : vector<14x14x1xf32> to vector<14x14x8xf32>
    %16 = vector.broadcast %14 : vector<1x1x8xf32> to vector<14x14x8xf32>
    %17 = arith.mulf %15, %16 : vector<14x14x8xf32>
    %18 = arith.addf %10, %17 : vector<14x14x8xf32>
    %19 = vector.extract_strided_slice %1 {offsets = [0, 2, 0], sizes = [14, 14, 1], strides = [1, 1, 1]} : vector<16x16x1xf32> to vector<14x14x1xf32>
    %20 = vector.extract_strided_slice %2 {offsets = [2, 0, 0], sizes = [1, 1, 8], strides = [1, 1, 1]} : vector<9x1x8xf32> to vector<1x1x8xf32>
    %21 = vector.shape_cast %20 : vector<1x1x8xf32> to vector<1x8xf32>
    %22 = vector.shape_cast %21 : vector<1x8xf32> to vector<1x1x8xf32>
    %23 = vector.broadcast %19 : vector<14x14x1xf32> to vector<14x14x8xf32>
    %24 = vector.broadcast %22 : vector<1x1x8xf32> to vector<14x14x8xf32>
    %25 = arith.mulf %23, %24 : vector<14x14x8xf32>
    %26 = arith.addf %18, %25 : vector<14x14x8xf32>
    %27 = vector.extract_strided_slice %1 {offsets = [1, 0, 0], sizes = [14, 14, 1], strides = [1, 1, 1]} : vector<16x16x1xf32> to vector<14x14x1xf32>
    %28 = vector.extract_strided_slice %2 {offsets = [3, 0, 0], sizes = [1, 1, 8], strides = [1, 1, 1]} : vector<9x1x8xf32> to vector<1x1x8xf32>
    %29 = vector.shape_cast %28 : vector<1x1x8xf32> to vector<1x8xf32>
    %30 = vector.shape_cast %29 : vector<1x8xf32> to vector<1x1x8xf32>
    %31 = vector.broadcast %27 : vector<14x14x1xf32> to vector<14x14x8xf32>
    %32 = vector.broadcast %30 : vector<1x1x8xf32> to vector<14x14x8xf32>
    %33 = arith.mulf %31, %32 : vector<14x14x8xf32>
    %34 = arith.addf %26, %33 : vector<14x14x8xf32>
    %35 = vector.extract_strided_slice %1 {offsets = [1, 1, 0], sizes = [14, 14, 1], strides = [1, 1, 1]} : vector<16x16x1xf32> to vector<14x14x1xf32>
    %36 = vector.extract_strided_slice %2 {offsets = [4, 0, 0], sizes = [1, 1, 8], strides = [1, 1, 1]} : vector<9x1x8xf32> to vector<1x1x8xf32>
    %37 = vector.shape_cast %36 : vector<1x1x8xf32> to vector<1x8xf32>
    %38 = vector.shape_cast %37 : vector<1x8xf32> to vector<1x1x8xf32>
    %39 = vector.broadcast %35 : vector<14x14x1xf32> to vector<14x14x8xf32>
    %40 = vector.broadcast %38 : vector<1x1x8xf32> to vector<14x14x8xf32>
    %41 = arith.mulf %39, %40 : vector<14x14x8xf32>
    %42 = arith.addf %34, %41 : vector<14x14x8xf32>
    %43 = vector.extract_strided_slice %1 {offsets = [1, 2, 0], sizes = [14, 14, 1], strides = [1, 1, 1]} : vector<16x16x1xf32> to vector<14x14x1xf32>
    %44 = vector.extract_strided_slice %2 {offsets = [5, 0, 0], sizes = [1, 1, 8], strides = [1, 1, 1]} : vector<9x1x8xf32> to vector<1x1x8xf32>
    %45 = vector.shape_cast %44 : vector<1x1x8xf32> to vector<1x8xf32>
    %46 = vector.shape_cast %45 : vector<1x8xf32> to vector<1x1x8xf32>
    %47 = vector.broadcast %43 : vector<14x14x1xf32> to vector<14x14x8xf32>
    %48 = vector.broadcast %46 : vector<1x1x8xf32> to vector<14x14x8xf32>
    %49 = arith.mulf %47, %48 : vector<14x14x8xf32>
    %50 = arith.addf %42, %49 : vector<14x14x8xf32>
    %51 = vector.extract_strided_slice %1 {offsets = [2, 0, 0], sizes = [14, 14, 1], strides = [1, 1, 1]} : vector<16x16x1xf32> to vector<14x14x1xf32>
    %52 = vector.extract_strided_slice %2 {offsets = [6, 0, 0], sizes = [1, 1, 8], strides = [1, 1, 1]} : vector<9x1x8xf32> to vector<1x1x8xf32>
    %53 = vector.shape_cast %52 : vector<1x1x8xf32> to vector<1x8xf32>
    %54 = vector.shape_cast %53 : vector<1x8xf32> to vector<1x1x8xf32>
    %55 = vector.broadcast %51 : vector<14x14x1xf32> to vector<14x14x8xf32>
    %56 = vector.broadcast %54 : vector<1x1x8xf32> to vector<14x14x8xf32>
    %57 = arith.mulf %55, %56 : vector<14x14x8xf32>
    %58 = arith.addf %50, %57 : vector<14x14x8xf32>
    %59 = vector.extract_strided_slice %1 {offsets = [2, 1, 0], sizes = [14, 14, 1], strides = [1, 1, 1]} : vector<16x16x1xf32> to vector<14x14x1xf32>
    %60 = vector.extract_strided_slice %2 {offsets = [7, 0, 0], sizes = [1, 1, 8], strides = [1, 1, 1]} : vector<9x1x8xf32> to vector<1x1x8xf32>
    %61 = vector.shape_cast %60 : vector<1x1x8xf32> to vector<1x8xf32>
    %62 = vector.shape_cast %61 : vector<1x8xf32> to vector<1x1x8xf32>
    %63 = vector.broadcast %59 : vector<14x14x1xf32> to vector<14x14x8xf32>
    %64 = vector.broadcast %62 : vector<1x1x8xf32> to vector<14x14x8xf32>
    %65 = arith.mulf %63, %64 : vector<14x14x8xf32>
    %66 = arith.addf %58, %65 : vector<14x14x8xf32>
    %67 = vector.extract_strided_slice %1 {offsets = [2, 2, 0], sizes = [14, 14, 1], strides = [1, 1, 1]} : vector<16x16x1xf32> to vector<14x14x1xf32>
    %68 = vector.extract_strided_slice %2 {offsets = [8, 0, 0], sizes = [1, 1, 8], strides = [1, 1, 1]} : vector<9x1x8xf32> to vector<1x1x8xf32>
    %69 = vector.shape_cast %68 : vector<1x1x8xf32> to vector<1x8xf32>
    %70 = vector.shape_cast %69 : vector<1x8xf32> to vector<1x1x8xf32>
    %71 = vector.broadcast %67 : vector<14x14x1xf32> to vector<14x14x8xf32>
    %72 = vector.broadcast %70 : vector<1x1x8xf32> to vector<14x14x8xf32>
    %73 = arith.mulf %71, %72 : vector<14x14x8xf32>
    %74 = arith.addf %66, %73 : vector<14x14x8xf32>
    %75 = vector.shape_cast %3 : vector<1x8xf32> to vector<1x1x8xf32>
    %76 = vector.broadcast %75 : vector<1x1x8xf32> to vector<14x14x8xf32>
    %77 = arith.addf %74, %76 : vector<14x14x8xf32>
    %78 = vector.shape_cast %77 : vector<14x14x8xf32> to vector<7x2x14x8xf32>
    %79 = vector.extract_strided_slice %78 {offsets = [0, 0, 0, 0], sizes = [7, 1, 14, 8], strides = [1, 1, 1, 1]} : vector<7x2x14x8xf32> to vector<7x1x14x8xf32>
    %80 = vector.shape_cast %79 : vector<7x1x14x8xf32> to vector<7x14x8xf32>
    %81 = vector.extract_strided_slice %78 {offsets = [0, 1, 0, 0], sizes = [7, 1, 14, 8], strides = [1, 1, 1, 1]} : vector<7x2x14x8xf32> to vector<7x1x14x8xf32>
    %82 = vector.shape_cast %81 : vector<7x1x14x8xf32> to vector<7x14x8xf32>
    %83 = arith.maximumf %80, %82 : vector<7x14x8xf32>
    %84 = vector.extract_strided_slice %83 {offsets = [0, 0, 0], sizes = [7, 1, 8], strides = [1, 1, 1]} : vector<7x14x8xf32> to vector<7x1x8xf32>
    %85 = vector.extract_strided_slice %83 {offsets = [0, 1, 0], sizes = [7, 1, 8], strides = [1, 1, 1]} : vector<7x14x8xf32> to vector<7x1x8xf32>
    %86 = arith.maximumf %84, %85 : vector<7x1x8xf32>
    %87 = vector.extract_strided_slice %83 {offsets = [0, 2, 0], sizes = [7, 1, 8], strides = [1, 1, 1]} : vector<7x14x8xf32> to vector<7x1x8xf32>
    %88 = vector.extract_strided_slice %83 {offsets = [0, 3, 0], sizes = [7, 1, 8], strides = [1, 1, 1]} : vector<7x14x8xf32> to vector<7x1x8xf32>
    %89 = arith.maximumf %87, %88 : vector<7x1x8xf32>
    %90 = vector.extract_strided_slice %83 {offsets = [0, 4, 0], sizes = [7, 1, 8], strides = [1, 1, 1]} : vector<7x14x8xf32> to vector<7x1x8xf32>
    %91 = vector.extract_strided_slice %83 {offsets = [0, 5, 0], sizes = [7, 1, 8], strides = [1, 1, 1]} : vector<7x14x8xf32> to vector<7x1x8xf32>
    %92 = arith.maximumf %90, %91 : vector<7x1x8xf32>
    %93 = vector.extract_strided_slice %83 {offsets = [0, 6, 0], sizes = [7, 1, 8], strides = [1, 1, 1]} : vector<7x14x8xf32> to vector<7x1x8xf32>
    %94 = vector.extract_strided_slice %83 {offsets = [0, 7, 0], sizes = [7, 1, 8], strides = [1, 1, 1]} : vector<7x14x8xf32> to vector<7x1x8xf32>
    %95 = arith.maximumf %93, %94 : vector<7x1x8xf32>
    %96 = vector.extract_strided_slice %83 {offsets = [0, 8, 0], sizes = [7, 1, 8], strides = [1, 1, 1]} : vector<7x14x8xf32> to vector<7x1x8xf32>
    %97 = vector.extract_strided_slice %83 {offsets = [0, 9, 0], sizes = [7, 1, 8], strides = [1, 1, 1]} : vector<7x14x8xf32> to vector<7x1x8xf32>
    %98 = arith.maximumf %96, %97 : vector<7x1x8xf32>
    %99 = vector.extract_strided_slice %83 {offsets = [0, 10, 0], sizes = [7, 1, 8], strides = [1, 1, 1]} : vector<7x14x8xf32> to vector<7x1x8xf32>
    %100 = vector.extract_strided_slice %83 {offsets = [0, 11, 0], sizes = [7, 1, 8], strides = [1, 1, 1]} : vector<7x14x8xf32> to vector<7x1x8xf32>
    %101 = arith.maximumf %99, %100 : vector<7x1x8xf32>
    %102 = vector.extract_strided_slice %83 {offsets = [0, 12, 0], sizes = [7, 1, 8], strides = [1, 1, 1]} : vector<7x14x8xf32> to vector<7x1x8xf32>
    %103 = vector.extract_strided_slice %83 {offsets = [0, 13, 0], sizes = [7, 1, 8], strides = [1, 1, 1]} : vector<7x14x8xf32> to vector<7x1x8xf32>
    %104 = arith.maximumf %102, %103 : vector<7x1x8xf32>
    %105 = tpu.concatenate %86, %89, %92, %95, %98, %101, %104 in 1 : vector<7x1x8xf32>, vector<7x1x8xf32>, vector<7x1x8xf32>, vector<7x1x8xf32>, vector<7x1x8xf32>, vector<7x1x8xf32>, vector<7x1x8xf32> -> vector<7x7x8xf32>
    %cst = arith.constant 0.000000e+00 : f32
    %106 = vector.broadcast %cst : f32 to vector<7x7x8xf32>
    %107 = arith.maximumf %105, %106 : vector<7x7x8xf32>
    %c0_8 = arith.constant 0 : index
    %c0_9 = arith.constant 0 : index
    %c0_10 = arith.constant 0 : index
    %108 = vector.load %arg4[%c0_8, %c0_9, %c0_10] : memref<9x8x8xf32, #tpu.memory_space<vmem>>, vector<9x8x8xf32>
    %c0_11 = arith.constant 0 : index
    %c0_12 = arith.constant 0 : index
    %109 = vector.load %arg5[%c0_11, %c0_12] : memref<1x8xf32, #tpu.memory_space<vmem>>, vector<1x8xf32>
    %110 = vector.extract_strided_slice %107 {offsets = [0, 0, 0], sizes = [5, 5, 8], strides = [1, 1, 1]} : vector<7x7x8xf32> to vector<5x5x8xf32>
    %111 = vector.extract_strided_slice %108 {offsets = [0, 0, 0], sizes = [1, 8, 8], strides = [1, 1, 1]} : vector<9x8x8xf32> to vector<1x8x8xf32>
    %112 = vector.shape_cast %111 : vector<1x8x8xf32> to vector<8x8xf32>
    %113 = vector.shape_cast %112 : vector<8x8xf32> to vector<1x8x8xf32>
    %114 = vector.broadcast %113 : vector<1x8x8xf32> to vector<5x8x8xf32>
    "tpu.trace_start"() <{level = 10 : i32, message = "hwk,hkc->hwc"}> : () -> ()
    %cst_13 = arith.constant dense<0.000000e+00> : vector<5x5x8xf32>
    %115 = tpu.matmul %110, %114, %cst_13 {dimension_numbers = #tpu.dot_dimension_numbers<[2], [1], [1], [2], [0, 0, 0, 1, 1, 2], [0], [0]>} : vector<5x5x8xf32>, vector<5x8x8xf32>, vector<5x5x8xf32> -> vector<5x5x8xf32>
    "tpu.trace_stop"() : () -> ()
    %116 = vector.extract_strided_slice %107 {offsets = [0, 1, 0], sizes = [5, 5, 8], strides = [1, 1, 1]} : vector<7x7x8xf32> to vector<5x5x8xf32>
    %117 = vector.extract_strided_slice %108 {offsets = [1, 0, 0], sizes = [1, 8, 8], strides = [1, 1, 1]} : vector<9x8x8xf32> to vector<1x8x8xf32>
    %118 = vector.shape_cast %117 : vector<1x8x8xf32> to vector<8x8xf32>
    %119 = vector.shape_cast %118 : vector<8x8xf32> to vector<1x8x8xf32>
    %120 = vector.broadcast %119 : vector<1x8x8xf32> to vector<5x8x8xf32>
    "tpu.trace_start"() <{level = 10 : i32, message = "hwk,hkc->hwc"}> : () -> ()
    %cst_14 = arith.constant dense<0.000000e+00> : vector<5x5x8xf32>
    %121 = tpu.matmul %116, %120, %cst_14 {dimension_numbers = #tpu.dot_dimension_numbers<[2], [1], [1], [2], [0, 0, 0, 1, 1, 2], [0], [0]>} : vector<5x5x8xf32>, vector<5x8x8xf32>, vector<5x5x8xf32> -> vector<5x5x8xf32>
    "tpu.trace_stop"() : () -> ()
    %122 = arith.addf %115, %121 : vector<5x5x8xf32>
    %123 = vector.extract_strided_slice %107 {offsets = [0, 2, 0], sizes = [5, 5, 8], strides = [1, 1, 1]} : vector<7x7x8xf32> to vector<5x5x8xf32>
    %124 = vector.extract_strided_slice %108 {offsets = [2, 0, 0], sizes = [1, 8, 8], strides = [1, 1, 1]} : vector<9x8x8xf32> to vector<1x8x8xf32>
    %125 = vector.shape_cast %124 : vector<1x8x8xf32> to vector<8x8xf32>
    %126 = vector.shape_cast %125 : vector<8x8xf32> to vector<1x8x8xf32>
    %127 = vector.broadcast %126 : vector<1x8x8xf32> to vector<5x8x8xf32>
    "tpu.trace_start"() <{level = 10 : i32, message = "hwk,hkc->hwc"}> : () -> ()
    %cst_15 = arith.constant dense<0.000000e+00> : vector<5x5x8xf32>
    %128 = tpu.matmul %123, %127, %cst_15 {dimension_numbers = #tpu.dot_dimension_numbers<[2], [1], [1], [2], [0, 0, 0, 1, 1, 2], [0], [0]>} : vector<5x5x8xf32>, vector<5x8x8xf32>, vector<5x5x8xf32> -> vector<5x5x8xf32>
    "tpu.trace_stop"() : () -> ()
    %129 = arith.addf %122, %128 : vector<5x5x8xf32>
    %130 = vector.extract_strided_slice %107 {offsets = [1, 0, 0], sizes = [5, 5, 8], strides = [1, 1, 1]} : vector<7x7x8xf32> to vector<5x5x8xf32>
    %131 = vector.extract_strided_slice %108 {offsets = [3, 0, 0], sizes = [1, 8, 8], strides = [1, 1, 1]} : vector<9x8x8xf32> to vector<1x8x8xf32>
    %132 = vector.shape_cast %131 : vector<1x8x8xf32> to vector<8x8xf32>
    %133 = vector.shape_cast %132 : vector<8x8xf32> to vector<1x8x8xf32>
    %134 = vector.broadcast %133 : vector<1x8x8xf32> to vector<5x8x8xf32>
    "tpu.trace_start"() <{level = 10 : i32, message = "hwk,hkc->hwc"}> : () -> ()
    %cst_16 = arith.constant dense<0.000000e+00> : vector<5x5x8xf32>
    %135 = tpu.matmul %130, %134, %cst_16 {dimension_numbers = #tpu.dot_dimension_numbers<[2], [1], [1], [2], [0, 0, 0, 1, 1, 2], [0], [0]>} : vector<5x5x8xf32>, vector<5x8x8xf32>, vector<5x5x8xf32> -> vector<5x5x8xf32>
    "tpu.trace_stop"() : () -> ()
    %136 = arith.addf %129, %135 : vector<5x5x8xf32>
    %137 = vector.extract_strided_slice %107 {offsets = [1, 1, 0], sizes = [5, 5, 8], strides = [1, 1, 1]} : vector<7x7x8xf32> to vector<5x5x8xf32>
    %138 = vector.extract_strided_slice %108 {offsets = [4, 0, 0], sizes = [1, 8, 8], strides = [1, 1, 1]} : vector<9x8x8xf32> to vector<1x8x8xf32>
    %139 = vector.shape_cast %138 : vector<1x8x8xf32> to vector<8x8xf32>
    %140 = vector.shape_cast %139 : vector<8x8xf32> to vector<1x8x8xf32>
    %141 = vector.broadcast %140 : vector<1x8x8xf32> to vector<5x8x8xf32>
    "tpu.trace_start"() <{level = 10 : i32, message = "hwk,hkc->hwc"}> : () -> ()
    %cst_17 = arith.constant dense<0.000000e+00> : vector<5x5x8xf32>
    %142 = tpu.matmul %137, %141, %cst_17 {dimension_numbers = #tpu.dot_dimension_numbers<[2], [1], [1], [2], [0, 0, 0, 1, 1, 2], [0], [0]>} : vector<5x5x8xf32>, vector<5x8x8xf32>, vector<5x5x8xf32> -> vector<5x5x8xf32>
    "tpu.trace_stop"() : () -> ()
    %143 = arith.addf %136, %142 : vector<5x5x8xf32>
    %144 = vector.extract_strided_slice %107 {offsets = [1, 2, 0], sizes = [5, 5, 8], strides = [1, 1, 1]} : vector<7x7x8xf32> to vector<5x5x8xf32>
    %145 = vector.extract_strided_slice %108 {offsets = [5, 0, 0], sizes = [1, 8, 8], strides = [1, 1, 1]} : vector<9x8x8xf32> to vector<1x8x8xf32>
    %146 = vector.shape_cast %145 : vector<1x8x8xf32> to vector<8x8xf32>
    %147 = vector.shape_cast %146 : vector<8x8xf32> to vector<1x8x8xf32>
    %148 = vector.broadcast %147 : vector<1x8x8xf32> to vector<5x8x8xf32>
    "tpu.trace_start"() <{level = 10 : i32, message = "hwk,hkc->hwc"}> : () -> ()
    %cst_18 = arith.constant dense<0.000000e+00> : vector<5x5x8xf32>
    %149 = tpu.matmul %144, %148, %cst_18 {dimension_numbers = #tpu.dot_dimension_numbers<[2], [1], [1], [2], [0, 0, 0, 1, 1, 2], [0], [0]>} : vector<5x5x8xf32>, vector<5x8x8xf32>, vector<5x5x8xf32> -> vector<5x5x8xf32>
    "tpu.trace_stop"() : () -> ()
    %150 = arith.addf %143, %149 : vector<5x5x8xf32>
    %151 = vector.extract_strided_slice %107 {offsets = [2, 0, 0], sizes = [5, 5, 8], strides = [1, 1, 1]} : vector<7x7x8xf32> to vector<5x5x8xf32>
    %152 = vector.extract_strided_slice %108 {offsets = [6, 0, 0], sizes = [1, 8, 8], strides = [1, 1, 1]} : vector<9x8x8xf32> to vector<1x8x8xf32>
    %153 = vector.shape_cast %152 : vector<1x8x8xf32> to vector<8x8xf32>
    %154 = vector.shape_cast %153 : vector<8x8xf32> to vector<1x8x8xf32>
    %155 = vector.broadcast %154 : vector<1x8x8xf32> to vector<5x8x8xf32>
    "tpu.trace_start"() <{level = 10 : i32, message = "hwk,hkc->hwc"}> : () -> ()
    %cst_19 = arith.constant dense<0.000000e+00> : vector<5x5x8xf32>
    %156 = tpu.matmul %151, %155, %cst_19 {dimension_numbers = #tpu.dot_dimension_numbers<[2], [1], [1], [2], [0, 0, 0, 1, 1, 2], [0], [0]>} : vector<5x5x8xf32>, vector<5x8x8xf32>, vector<5x5x8xf32> -> vector<5x5x8xf32>
    "tpu.trace_stop"() : () -> ()
    %157 = arith.addf %150, %156 : vector<5x5x8xf32>
    %158 = vector.extract_strided_slice %107 {offsets = [2, 1, 0], sizes = [5, 5, 8], strides = [1, 1, 1]} : vector<7x7x8xf32> to vector<5x5x8xf32>
    %159 = vector.extract_strided_slice %108 {offsets = [7, 0, 0], sizes = [1, 8, 8], strides = [1, 1, 1]} : vector<9x8x8xf32> to vector<1x8x8xf32>
    %160 = vector.shape_cast %159 : vector<1x8x8xf32> to vector<8x8xf32>
    %161 = vector.shape_cast %160 : vector<8x8xf32> to vector<1x8x8xf32>
    %162 = vector.broadcast %161 : vector<1x8x8xf32> to vector<5x8x8xf32>
    "tpu.trace_start"() <{level = 10 : i32, message = "hwk,hkc->hwc"}> : () -> ()
    %cst_20 = arith.constant dense<0.000000e+00> : vector<5x5x8xf32>
    %163 = tpu.matmul %158, %162, %cst_20 {dimension_numbers = #tpu.dot_dimension_numbers<[2], [1], [1], [2], [0, 0, 0, 1, 1, 2], [0], [0]>} : vector<5x5x8xf32>, vector<5x8x8xf32>, vector<5x5x8xf32> -> vector<5x5x8xf32>
    "tpu.trace_stop"() : () -> ()
    %164 = arith.addf %157, %163 : vector<5x5x8xf32>
    %165 = vector.extract_strided_slice %107 {offsets = [2, 2, 0], sizes = [5, 5, 8], strides = [1, 1, 1]} : vector<7x7x8xf32> to vector<5x5x8xf32>
    %166 = vector.extract_strided_slice %108 {offsets = [8, 0, 0], sizes = [1, 8, 8], strides = [1, 1, 1]} : vector<9x8x8xf32> to vector<1x8x8xf32>
    %167 = vector.shape_cast %166 : vector<1x8x8xf32> to vector<8x8xf32>
    %168 = vector.shape_cast %167 : vector<8x8xf32> to vector<1x8x8xf32>
    %169 = vector.broadcast %168 : vector<1x8x8xf32> to vector<5x8x8xf32>
    "tpu.trace_start"() <{level = 10 : i32, message = "hwk,hkc->hwc"}> : () -> ()
    %cst_21 = arith.constant dense<0.000000e+00> : vector<5x5x8xf32>
    %170 = tpu.matmul %165, %169, %cst_21 {dimension_numbers = #tpu.dot_dimension_numbers<[2], [1], [1], [2], [0, 0, 0, 1, 1, 2], [0], [0]>} : vector<5x5x8xf32>, vector<5x8x8xf32>, vector<5x5x8xf32> -> vector<5x5x8xf32>
    "tpu.trace_stop"() : () -> ()
    %171 = arith.addf %164, %170 : vector<5x5x8xf32>
    %172 = vector.shape_cast %109 : vector<1x8xf32> to vector<1x1x8xf32>
    %173 = vector.broadcast %172 : vector<1x1x8xf32> to vector<5x5x8xf32>
    %174 = arith.addf %171, %173 : vector<5x5x8xf32>
    %cst_22 = arith.constant 0.000000e+00 : f32
    %175 = vector.broadcast %cst_22 : f32 to vector<5x5x8xf32>
    %176 = arith.maximumf %174, %175 : vector<5x5x8xf32>
    %c0_23 = arith.constant 0 : index
    %c0_24 = arith.constant 0 : index
    %c0_25 = arith.constant 0 : index
    %177 = vector.load %arg6[%c0_23, %c0_24, %c0_25] : memref<9x8x8xf32, #tpu.memory_space<vmem>>, vector<9x8x8xf32>
    %c0_26 = arith.constant 0 : index
    %c0_27 = arith.constant 0 : index
    %178 = vector.load %arg7[%c0_26, %c0_27] : memref<1x8xf32, #tpu.memory_space<vmem>>, vector<1x8xf32>
    %179 = vector.extract_strided_slice %176 {offsets = [0, 0, 0], sizes = [3, 3, 8], strides = [1, 1, 1]} : vector<5x5x8xf32> to vector<3x3x8xf32>
    %180 = vector.extract_strided_slice %177 {offsets = [0, 0, 0], sizes = [1, 8, 8], strides = [1, 1, 1]} : vector<9x8x8xf32> to vector<1x8x8xf32>
    %181 = vector.shape_cast %180 : vector<1x8x8xf32> to vector<8x8xf32>
    %182 = vector.shape_cast %181 : vector<8x8xf32> to vector<1x8x8xf32>
    %183 = vector.broadcast %182 : vector<1x8x8xf32> to vector<3x8x8xf32>
    "tpu.trace_start"() <{level = 10 : i32, message = "hwk,hkc->hwc"}> : () -> ()
    %cst_28 = arith.constant dense<0.000000e+00> : vector<3x3x8xf32>
    %184 = tpu.matmul %179, %183, %cst_28 {dimension_numbers = #tpu.dot_dimension_numbers<[2], [1], [1], [2], [0, 0, 0, 1, 1, 2], [0], [0]>} : vector<3x3x8xf32>, vector<3x8x8xf32>, vector<3x3x8xf32> -> vector<3x3x8xf32>
    "tpu.trace_stop"() : () -> ()
    %185 = vector.extract_strided_slice %176 {offsets = [0, 1, 0], sizes = [3, 3, 8], strides = [1, 1, 1]} : vector<5x5x8xf32> to vector<3x3x8xf32>
    %186 = vector.extract_strided_slice %177 {offsets = [1, 0, 0], sizes = [1, 8, 8], strides = [1, 1, 1]} : vector<9x8x8xf32> to vector<1x8x8xf32>
    %187 = vector.shape_cast %186 : vector<1x8x8xf32> to vector<8x8xf32>
    %188 = vector.shape_cast %187 : vector<8x8xf32> to vector<1x8x8xf32>
    %189 = vector.broadcast %188 : vector<1x8x8xf32> to vector<3x8x8xf32>
    "tpu.trace_start"() <{level = 10 : i32, message = "hwk,hkc->hwc"}> : () -> ()
    %cst_29 = arith.constant dense<0.000000e+00> : vector<3x3x8xf32>
    %190 = tpu.matmul %185, %189, %cst_29 {dimension_numbers = #tpu.dot_dimension_numbers<[2], [1], [1], [2], [0, 0, 0, 1, 1, 2], [0], [0]>} : vector<3x3x8xf32>, vector<3x8x8xf32>, vector<3x3x8xf32> -> vector<3x3x8xf32>
    "tpu.trace_stop"() : () -> ()
    %191 = arith.addf %184, %190 : vector<3x3x8xf32>
    %192 = vector.extract_strided_slice %176 {offsets = [0, 2, 0], sizes = [3, 3, 8], strides = [1, 1, 1]} : vector<5x5x8xf32> to vector<3x3x8xf32>
    %193 = vector.extract_strided_slice %177 {offsets = [2, 0, 0], sizes = [1, 8, 8], strides = [1, 1, 1]} : vector<9x8x8xf32> to vector<1x8x8xf32>
    %194 = vector.shape_cast %193 : vector<1x8x8xf32> to vector<8x8xf32>
    %195 = vector.shape_cast %194 : vector<8x8xf32> to vector<1x8x8xf32>
    %196 = vector.broadcast %195 : vector<1x8x8xf32> to vector<3x8x8xf32>
    "tpu.trace_start"() <{level = 10 : i32, message = "hwk,hkc->hwc"}> : () -> ()
    %cst_30 = arith.constant dense<0.000000e+00> : vector<3x3x8xf32>
    %197 = tpu.matmul %192, %196, %cst_30 {dimension_numbers = #tpu.dot_dimension_numbers<[2], [1], [1], [2], [0, 0, 0, 1, 1, 2], [0], [0]>} : vector<3x3x8xf32>, vector<3x8x8xf32>, vector<3x3x8xf32> -> vector<3x3x8xf32>
    "tpu.trace_stop"() : () -> ()
    %198 = arith.addf %191, %197 : vector<3x3x8xf32>
    %199 = vector.extract_strided_slice %176 {offsets = [1, 0, 0], sizes = [3, 3, 8], strides = [1, 1, 1]} : vector<5x5x8xf32> to vector<3x3x8xf32>
    %200 = vector.extract_strided_slice %177 {offsets = [3, 0, 0], sizes = [1, 8, 8], strides = [1, 1, 1]} : vector<9x8x8xf32> to vector<1x8x8xf32>
    %201 = vector.shape_cast %200 : vector<1x8x8xf32> to vector<8x8xf32>
    %202 = vector.shape_cast %201 : vector<8x8xf32> to vector<1x8x8xf32>
    %203 = vector.broadcast %202 : vector<1x8x8xf32> to vector<3x8x8xf32>
    "tpu.trace_start"() <{level = 10 : i32, message = "hwk,hkc->hwc"}> : () -> ()
    %cst_31 = arith.constant dense<0.000000e+00> : vector<3x3x8xf32>
    %204 = tpu.matmul %199, %203, %cst_31 {dimension_numbers = #tpu.dot_dimension_numbers<[2], [1], [1], [2], [0, 0, 0, 1, 1, 2], [0], [0]>} : vector<3x3x8xf32>, vector<3x8x8xf32>, vector<3x3x8xf32> -> vector<3x3x8xf32>
    "tpu.trace_stop"() : () -> ()
    %205 = arith.addf %198, %204 : vector<3x3x8xf32>
    %206 = vector.extract_strided_slice %176 {offsets = [1, 1, 0], sizes = [3, 3, 8], strides = [1, 1, 1]} : vector<5x5x8xf32> to vector<3x3x8xf32>
    %207 = vector.extract_strided_slice %177 {offsets = [4, 0, 0], sizes = [1, 8, 8], strides = [1, 1, 1]} : vector<9x8x8xf32> to vector<1x8x8xf32>
    %208 = vector.shape_cast %207 : vector<1x8x8xf32> to vector<8x8xf32>
    %209 = vector.shape_cast %208 : vector<8x8xf32> to vector<1x8x8xf32>
    %210 = vector.broadcast %209 : vector<1x8x8xf32> to vector<3x8x8xf32>
    "tpu.trace_start"() <{level = 10 : i32, message = "hwk,hkc->hwc"}> : () -> ()
    %cst_32 = arith.constant dense<0.000000e+00> : vector<3x3x8xf32>
    %211 = tpu.matmul %206, %210, %cst_32 {dimension_numbers = #tpu.dot_dimension_numbers<[2], [1], [1], [2], [0, 0, 0, 1, 1, 2], [0], [0]>} : vector<3x3x8xf32>, vector<3x8x8xf32>, vector<3x3x8xf32> -> vector<3x3x8xf32>
    "tpu.trace_stop"() : () -> ()
    %212 = arith.addf %205, %211 : vector<3x3x8xf32>
    %213 = vector.extract_strided_slice %176 {offsets = [1, 2, 0], sizes = [3, 3, 8], strides = [1, 1, 1]} : vector<5x5x8xf32> to vector<3x3x8xf32>
    %214 = vector.extract_strided_slice %177 {offsets = [5, 0, 0], sizes = [1, 8, 8], strides = [1, 1, 1]} : vector<9x8x8xf32> to vector<1x8x8xf32>
    %215 = vector.shape_cast %214 : vector<1x8x8xf32> to vector<8x8xf32>
    %216 = vector.shape_cast %215 : vector<8x8xf32> to vector<1x8x8xf32>
    %217 = vector.broadcast %216 : vector<1x8x8xf32> to vector<3x8x8xf32>
    "tpu.trace_start"() <{level = 10 : i32, message = "hwk,hkc->hwc"}> : () -> ()
    %cst_33 = arith.constant dense<0.000000e+00> : vector<3x3x8xf32>
    %218 = tpu.matmul %213, %217, %cst_33 {dimension_numbers = #tpu.dot_dimension_numbers<[2], [1], [1], [2], [0, 0, 0, 1, 1, 2], [0], [0]>} : vector<3x3x8xf32>, vector<3x8x8xf32>, vector<3x3x8xf32> -> vector<3x3x8xf32>
    "tpu.trace_stop"() : () -> ()
    %219 = arith.addf %212, %218 : vector<3x3x8xf32>
    %220 = vector.extract_strided_slice %176 {offsets = [2, 0, 0], sizes = [3, 3, 8], strides = [1, 1, 1]} : vector<5x5x8xf32> to vector<3x3x8xf32>
    %221 = vector.extract_strided_slice %177 {offsets = [6, 0, 0], sizes = [1, 8, 8], strides = [1, 1, 1]} : vector<9x8x8xf32> to vector<1x8x8xf32>
    %222 = vector.shape_cast %221 : vector<1x8x8xf32> to vector<8x8xf32>
    %223 = vector.shape_cast %222 : vector<8x8xf32> to vector<1x8x8xf32>
    %224 = vector.broadcast %223 : vector<1x8x8xf32> to vector<3x8x8xf32>
    "tpu.trace_start"() <{level = 10 : i32, message = "hwk,hkc->hwc"}> : () -> ()
    %cst_34 = arith.constant dense<0.000000e+00> : vector<3x3x8xf32>
    %225 = tpu.matmul %220, %224, %cst_34 {dimension_numbers = #tpu.dot_dimension_numbers<[2], [1], [1], [2], [0, 0, 0, 1, 1, 2], [0], [0]>} : vector<3x3x8xf32>, vector<3x8x8xf32>, vector<3x3x8xf32> -> vector<3x3x8xf32>
    "tpu.trace_stop"() : () -> ()
    %226 = arith.addf %219, %225 : vector<3x3x8xf32>
    %227 = vector.extract_strided_slice %176 {offsets = [2, 1, 0], sizes = [3, 3, 8], strides = [1, 1, 1]} : vector<5x5x8xf32> to vector<3x3x8xf32>
    %228 = vector.extract_strided_slice %177 {offsets = [7, 0, 0], sizes = [1, 8, 8], strides = [1, 1, 1]} : vector<9x8x8xf32> to vector<1x8x8xf32>
    %229 = vector.shape_cast %228 : vector<1x8x8xf32> to vector<8x8xf32>
    %230 = vector.shape_cast %229 : vector<8x8xf32> to vector<1x8x8xf32>
    %231 = vector.broadcast %230 : vector<1x8x8xf32> to vector<3x8x8xf32>
    "tpu.trace_start"() <{level = 10 : i32, message = "hwk,hkc->hwc"}> : () -> ()
    %cst_35 = arith.constant dense<0.000000e+00> : vector<3x3x8xf32>
    %232 = tpu.matmul %227, %231, %cst_35 {dimension_numbers = #tpu.dot_dimension_numbers<[2], [1], [1], [2], [0, 0, 0, 1, 1, 2], [0], [0]>} : vector<3x3x8xf32>, vector<3x8x8xf32>, vector<3x3x8xf32> -> vector<3x3x8xf32>
    "tpu.trace_stop"() : () -> ()
    %233 = arith.addf %226, %232 : vector<3x3x8xf32>
    %234 = vector.extract_strided_slice %176 {offsets = [2, 2, 0], sizes = [3, 3, 8], strides = [1, 1, 1]} : vector<5x5x8xf32> to vector<3x3x8xf32>
    %235 = vector.extract_strided_slice %177 {offsets = [8, 0, 0], sizes = [1, 8, 8], strides = [1, 1, 1]} : vector<9x8x8xf32> to vector<1x8x8xf32>
    %236 = vector.shape_cast %235 : vector<1x8x8xf32> to vector<8x8xf32>
    %237 = vector.shape_cast %236 : vector<8x8xf32> to vector<1x8x8xf32>
    %238 = vector.broadcast %237 : vector<1x8x8xf32> to vector<3x8x8xf32>
    "tpu.trace_start"() <{level = 10 : i32, message = "hwk,hkc->hwc"}> : () -> ()
    %cst_36 = arith.constant dense<0.000000e+00> : vector<3x3x8xf32>
    %239 = tpu.matmul %234, %238, %cst_36 {dimension_numbers = #tpu.dot_dimension_numbers<[2], [1], [1], [2], [0, 0, 0, 1, 1, 2], [0], [0]>} : vector<3x3x8xf32>, vector<3x8x8xf32>, vector<3x3x8xf32> -> vector<3x3x8xf32>
    "tpu.trace_stop"() : () -> ()
    %240 = arith.addf %233, %239 : vector<3x3x8xf32>
    %241 = vector.shape_cast %178 : vector<1x8xf32> to vector<1x1x8xf32>
    %242 = vector.broadcast %241 : vector<1x1x8xf32> to vector<3x3x8xf32>
    %243 = arith.addf %240, %242 : vector<3x3x8xf32>
    %cst_37 = arith.constant 0.000000e+00 : f32
    %244 = vector.broadcast %cst_37 : f32 to vector<3x3x8xf32>
    %245 = arith.maximumf %243, %244 : vector<3x3x8xf32>
    %c0_38 = arith.constant 0 : index
    %c0_39 = arith.constant 0 : index
    %246 = vector.load %arg8[%c0_38, %c0_39] : memref<72x10xf32, #tpu.memory_space<vmem>>, vector<72x10xf32>
    %c0_40 = arith.constant 0 : index
    %c0_41 = arith.constant 0 : index
    %247 = vector.load %arg9[%c0_40, %c0_41] : memref<1x10xf32, #tpu.memory_space<vmem>>, vector<1x10xf32>
    %248 = vector.extract_strided_slice %245 {offsets = [0, 0, 0], sizes = [1, 1, 8], strides = [1, 1, 1]} : vector<3x3x8xf32> to vector<1x1x8xf32>
    %249 = vector.shape_cast %248 : vector<1x1x8xf32> to vector<1x8xf32>
    %250 = vector.extract_strided_slice %246 {offsets = [0, 0], sizes = [8, 10], strides = [1, 1]} : vector<72x10xf32> to vector<8x10xf32>
    %cst_42 = arith.constant dense<0.000000e+00> : vector<1x10xf32>
    %251 = tpu.matmul %249, %250, %cst_42 {dimension_numbers = #tpu.dot_dimension_numbers<[1], [0], [0], [1], [0, 0, 1, 1], [], []>} : vector<1x8xf32>, vector<8x10xf32>, vector<1x10xf32> -> vector<1x10xf32>
    %252 = arith.addf %247, %251 : vector<1x10xf32>
    %253 = vector.extract_strided_slice %245 {offsets = [0, 1, 0], sizes = [1, 1, 8], strides = [1, 1, 1]} : vector<3x3x8xf32> to vector<1x1x8xf32>
    %254 = vector.shape_cast %253 : vector<1x1x8xf32> to vector<1x8xf32>
    %255 = vector.extract_strided_slice %246 {offsets = [8, 0], sizes = [8, 10], strides = [1, 1]} : vector<72x10xf32> to vector<8x10xf32>
    %cst_43 = arith.constant dense<0.000000e+00> : vector<1x10xf32>
    %256 = tpu.matmul %254, %255, %cst_43 {dimension_numbers = #tpu.dot_dimension_numbers<[1], [0], [0], [1], [0, 0, 1, 1], [], []>} : vector<1x8xf32>, vector<8x10xf32>, vector<1x10xf32> -> vector<1x10xf32>
    %257 = arith.addf %252, %256 : vector<1x10xf32>
    %258 = vector.extract_strided_slice %245 {offsets = [0, 2, 0], sizes = [1, 1, 8], strides = [1, 1, 1]} : vector<3x3x8xf32> to vector<1x1x8xf32>
    %259 = vector.shape_cast %258 : vector<1x1x8xf32> to vector<1x8xf32>
    %260 = vector.extract_strided_slice %246 {offsets = [16, 0], sizes = [8, 10], strides = [1, 1]} : vector<72x10xf32> to vector<8x10xf32>
    %cst_44 = arith.constant dense<0.000000e+00> : vector<1x10xf32>
    %261 = tpu.matmul %259, %260, %cst_44 {dimension_numbers = #tpu.dot_dimension_numbers<[1], [0], [0], [1], [0, 0, 1, 1], [], []>} : vector<1x8xf32>, vector<8x10xf32>, vector<1x10xf32> -> vector<1x10xf32>
    %262 = arith.addf %257, %261 : vector<1x10xf32>
    %263 = vector.extract_strided_slice %245 {offsets = [1, 0, 0], sizes = [1, 1, 8], strides = [1, 1, 1]} : vector<3x3x8xf32> to vector<1x1x8xf32>
    %264 = vector.shape_cast %263 : vector<1x1x8xf32> to vector<1x8xf32>
    %265 = vector.extract_strided_slice %246 {offsets = [24, 0], sizes = [8, 10], strides = [1, 1]} : vector<72x10xf32> to vector<8x10xf32>
    %cst_45 = arith.constant dense<0.000000e+00> : vector<1x10xf32>
    %266 = tpu.matmul %264, %265, %cst_45 {dimension_numbers = #tpu.dot_dimension_numbers<[1], [0], [0], [1], [0, 0, 1, 1], [], []>} : vector<1x8xf32>, vector<8x10xf32>, vector<1x10xf32> -> vector<1x10xf32>
    %267 = arith.addf %262, %266 : vector<1x10xf32>
    %268 = vector.extract_strided_slice %245 {offsets = [1, 1, 0], sizes = [1, 1, 8], strides = [1, 1, 1]} : vector<3x3x8xf32> to vector<1x1x8xf32>
    %269 = vector.shape_cast %268 : vector<1x1x8xf32> to vector<1x8xf32>
    %270 = vector.extract_strided_slice %246 {offsets = [32, 0], sizes = [8, 10], strides = [1, 1]} : vector<72x10xf32> to vector<8x10xf32>
    %cst_46 = arith.constant dense<0.000000e+00> : vector<1x10xf32>
    %271 = tpu.matmul %269, %270, %cst_46 {dimension_numbers = #tpu.dot_dimension_numbers<[1], [0], [0], [1], [0, 0, 1, 1], [], []>} : vector<1x8xf32>, vector<8x10xf32>, vector<1x10xf32> -> vector<1x10xf32>
    %272 = arith.addf %267, %271 : vector<1x10xf32>
    %273 = vector.extract_strided_slice %245 {offsets = [1, 2, 0], sizes = [1, 1, 8], strides = [1, 1, 1]} : vector<3x3x8xf32> to vector<1x1x8xf32>
    %274 = vector.shape_cast %273 : vector<1x1x8xf32> to vector<1x8xf32>
    %275 = vector.extract_strided_slice %246 {offsets = [40, 0], sizes = [8, 10], strides = [1, 1]} : vector<72x10xf32> to vector<8x10xf32>
    %cst_47 = arith.constant dense<0.000000e+00> : vector<1x10xf32>
    %276 = tpu.matmul %274, %275, %cst_47 {dimension_numbers = #tpu.dot_dimension_numbers<[1], [0], [0], [1], [0, 0, 1, 1], [], []>} : vector<1x8xf32>, vector<8x10xf32>, vector<1x10xf32> -> vector<1x10xf32>
    %277 = arith.addf %272, %276 : vector<1x10xf32>
    %278 = vector.extract_strided_slice %245 {offsets = [2, 0, 0], sizes = [1, 1, 8], strides = [1, 1, 1]} : vector<3x3x8xf32> to vector<1x1x8xf32>
    %279 = vector.shape_cast %278 : vector<1x1x8xf32> to vector<1x8xf32>
    %280 = vector.extract_strided_slice %246 {offsets = [48, 0], sizes = [8, 10], strides = [1, 1]} : vector<72x10xf32> to vector<8x10xf32>
    %cst_48 = arith.constant dense<0.000000e+00> : vector<1x10xf32>
    %281 = tpu.matmul %279, %280, %cst_48 {dimension_numbers = #tpu.dot_dimension_numbers<[1], [0], [0], [1], [0, 0, 1, 1], [], []>} : vector<1x8xf32>, vector<8x10xf32>, vector<1x10xf32> -> vector<1x10xf32>
    %282 = arith.addf %277, %281 : vector<1x10xf32>
    %283 = vector.extract_strided_slice %245 {offsets = [2, 1, 0], sizes = [1, 1, 8], strides = [1, 1, 1]} : vector<3x3x8xf32> to vector<1x1x8xf32>
    %284 = vector.shape_cast %283 : vector<1x1x8xf32> to vector<1x8xf32>
    %285 = vector.extract_strided_slice %246 {offsets = [56, 0], sizes = [8, 10], strides = [1, 1]} : vector<72x10xf32> to vector<8x10xf32>
    %cst_49 = arith.constant dense<0.000000e+00> : vector<1x10xf32>
    %286 = tpu.matmul %284, %285, %cst_49 {dimension_numbers = #tpu.dot_dimension_numbers<[1], [0], [0], [1], [0, 0, 1, 1], [], []>} : vector<1x8xf32>, vector<8x10xf32>, vector<1x10xf32> -> vector<1x10xf32>
    %287 = arith.addf %282, %286 : vector<1x10xf32>
    %288 = vector.extract_strided_slice %245 {offsets = [2, 2, 0], sizes = [1, 1, 8], strides = [1, 1, 1]} : vector<3x3x8xf32> to vector<1x1x8xf32>
    %289 = vector.shape_cast %288 : vector<1x1x8xf32> to vector<1x8xf32>
    %290 = vector.extract_strided_slice %246 {offsets = [64, 0], sizes = [8, 10], strides = [1, 1]} : vector<72x10xf32> to vector<8x10xf32>
    %cst_50 = arith.constant dense<0.000000e+00> : vector<1x10xf32>
    %291 = tpu.matmul %289, %290, %cst_50 {dimension_numbers = #tpu.dot_dimension_numbers<[1], [0], [0], [1], [0, 0, 1, 1], [], []>} : vector<1x8xf32>, vector<8x10xf32>, vector<1x10xf32> -> vector<1x10xf32>
    %292 = arith.addf %287, %291 : vector<1x10xf32>
    %c0_51 = arith.constant 0 : index
    %c0_52 = arith.constant 0 : index
    %c0_53 = arith.constant 0 : index
    %293 = vector.load %arg10[%c0_51, %c0_52, %c0_53] : memref<1x1x10xf32, #tpu.memory_space<vmem>>, vector<1x1x10xf32>
    %294 = vector.shape_cast %293 : vector<1x1x10xf32> to vector<1x10xf32>
    %295 = vector.shape_cast %292 : vector<1x10xf32> to vector<1x1x10xf32>
    tpu.vector_store %arg10[%c0_51, %c0_52, %c0_53], %295 {strides = array<i32>} : memref<1x1x10xf32, #tpu.memory_space<vmem>>, vector<1x1x10xf32>,
    return
  }
  func.func @transform_0(%arg0: i32) -> (i32, i32, i32, i32) {
    %c0_i32 = arith.constant 0 : i32
    %c0_i32_0 = arith.constant 0 : i32
    %c0_i32_1 = arith.constant 0 : i32
    %c0_i32_2 = arith.constant 0 : i32
    return %arg0, %c0_i32, %c0_i32_0, %c0_i32_1 : i32, i32, i32, i32
  }
  func.func @transform_1(%arg0: i32) -> (i32, i32, i32) {
    %c0_i32 = arith.constant 0 : i32
    %c0_i32_0 = arith.constant 0 : i32
    %c0_i32_1 = arith.constant 0 : i32
    %c0_i32_2 = arith.constant 0 : i32
    return %c0_i32, %c0_i32_0, %c0_i32_1 : i32, i32, i32
  }
  func.func @transform_2(%arg0: i32) -> (i32, i32) {
    %c0_i32 = arith.constant 0 : i32
    %c0_i32_0 = arith.constant 0 : i32
    %c0_i32_1 = arith.constant 0 : i32
    return %c0_i32, %c0_i32_0 : i32, i32
  }
  func.func @transform_3(%arg0: i32) -> (i32, i32, i32) {
    %c0_i32 = arith.constant 0 : i32
    %c0_i32_0 = arith.constant 0 : i32
    %c0_i32_1 = arith.constant 0 : i32
    %c0_i32_2 = arith.constant 0 : i32
    return %c0_i32, %c0_i32_0, %c0_i32_1 : i32, i32, i32
  }
  func.func @transform_4(%arg0: i32) -> (i32, i32) {
    %c0_i32 = arith.constant 0 : i32
    %c0_i32_0 = arith.constant 0 : i32
    %c0_i32_1 = arith.constant 0 : i32
    return %c0_i32, %c0_i32_0 : i32, i32
  }
  func.func @transform_5(%arg0: i32) -> (i32, i32, i32) {
    %c0_i32 = arith.constant 0 : i32
    %c0_i32_0 = arith.constant 0 : i32
    %c0_i32_1 = arith.constant 0 : i32
    %c0_i32_2 = arith.constant 0 : i32
    return %c0_i32, %c0_i32_0, %c0_i32_1 : i32, i32, i32
  }
  func.func @transform_6(%arg0: i32) -> (i32, i32) {
    %c0_i32 = arith.constant 0 : i32
    %c0_i32_0 = arith.constant 0 : i32
    %c0_i32_1 = arith.constant 0 : i32
    return %c0_i32, %c0_i32_0 : i32, i32
  }
  func.func @transform_7(%arg0: i32) -> (i32, i32) {
    %c0_i32 = arith.constant 0 : i32
    %c0_i32_0 = arith.constant 0 : i32
    %c0_i32_1 = arith.constant 0 : i32
    return %c0_i32, %c0_i32_0 : i32, i32
  }
  func.func @transform_8(%arg0: i32) -> (i32, i32) {
    %c0_i32 = arith.constant 0 : i32
    %c0_i32_0 = arith.constant 0 : i32
    %c0_i32_1 = arith.constant 0 : i32
    return %c0_i32, %c0_i32_0 : i32, i32
  }
  func.func @transform_9(%arg0: i32) -> (i32, i32, i32) {
    %c0_i32 = arith.constant 0 : i32
    %c0_i32_0 = arith.constant 0 : i32
    %c0_i32_1 = arith.constant 0 : i32
    return %arg0, %c0_i32, %c0_i32_0 : i32, i32, i32
  }
}

</mosaic_0001>

<bundles_post_ra>
// kernel: _lambda_.1
= control target key start
LH: loop header
LB: loop body
LE: loop exit
PB: predicated region body
PF: predicated region fallthrough
CT: control target
= control target key end

     0   :  { %14 = vsyncpa [#allocation3], 0  ;;  %s10416_s0 = inlined_call_operand.vmem [shape: f32[2,16,16,1], index: 0, kind: input, shape index: {}]   ;;  %s10417_s1 = inlined_call_operand.vmem [shape: f32[9,1,8], index: 1, kind: input, shape index: {}]   ;;  %s10418_s2 = inlined_call_operand.vmem [shape: f32[1,8], index: 2, kind: input, shape index: {}]   ;;  %s10419_s3 = inlined_call_operand.vmem [shape: f32[9,8,8], index: 3, kind: input, shape index: {}]   ;;  %s10420_s4 = inlined_call_operand.vmem [shape: f32[1,8], index: 4, kind: input, shape index: {}]   ;;  %s10421_s5 = inlined_call_operand.vmem [shape: f32[9,8,8], index: 5, kind: input, shape index: {}]   ;;  %s10422_s6 = inlined_call_operand.vmem [shape: f32[1,8], index: 6, kind: input, shape index: {}]   ;;  %s10423_s7 = inlined_call_operand.vmem [shape: f32[72,10], index: 7, kind: input, shape index: {}]   ;;  %s10424_s8 = inlined_call_operand.vmem [shape: f32[1,10], index: 8, kind: input, shape index: {}]   ;;  %s10425_s9 = inlined_call_operand.hbm [shape: f32[2,1,10], index: 9, kind: output, shape index: {}]  }
   0x1   :  { %16 = vsyncpa [#allocation3 + $0x1], 0  ;;  %s8768_s30 = smov 0   ;;  %s8770_s10 = smov 0  }
   0x2   :  { %s8772_s11 = smov 0   ;;  %s8774_s12 = smov 0  }
   0x3 LB: > { %s8789_s13 = sadd.s32 4294967295, %s8712_s12   ;;  %s7907_s14 = sadd.s32 4294967294, %s8712_s12   ;;  %s8712_s12 = sphi %s8774_s12, %s10451_s12   ;;  %s8708_s11 = sphi %s8772_s11, %s10450_s11   ;;  %s8704_s10 = sphi %s8770_s10, %s10449_s10   ;;  %s8700_s30 = sphi %s8768_s30, %s10448_s30  }
   0x4   : > { %s8793_s15 = sadd.s32 1, %s8712_s12   ;;  %s223_s16 = sadd.s32 1, %s8708_s11 }
   0x5   : > { %s220_s17 = ssub.s32 %s8712_s12, %s8793_s15  ;;  %p233_p0 = scmp.ne.s32.totalorder %s8708_s11, %s8704_s10 }
   0x6   : > { %p221_p1 = scmp.eq.s32.totalorder %s220_s17, 0  ;;  %p234_p2 = scmp.eq.s32.totalorder %s8789_s13, 1 }
   0x7   : > { %p239_p3 = scmp.ne.s32.totalorder %s8704_s10, %s8700_s30  ;;  %p240_p4 = scmp.eq.s32.totalorder %s7907_s14, 1 }
   0x8   : > { %s8804_s18 = scalar_select %p221_p1, %s8708_s11, %s223_s16  }
   0x9   : > { %p8806_p5 = por %p234_p2, %p233_p0  ;;  %p8810_p6 = por %p240_p4, %p239_p3 }
   0xa   : > { %p7910_p7 = scmp.ge.s32.totalorder %s8712_s12, 1  ;;  %p290_p8 = scmp.lt.s32.totalorder %s8712_s12, 3 }
   0xc   : > { %p291_p9 = pnand %p7910_p7, %p290_p8 }
   0xe   : > { %294 = sbr.rel (%p291_p9) target bundleno = 1222 (0x4c6), region = 56 }
  0x15   : > { %p325_p10 = scmp.lt.s32.totalorder %s8789_s13, 1  ;;  %v8714_v0 = vmov 0   ;;  %v8858_v34 = vld [vmem:[%s10417_s1 + $0x1] ss:$0 sm:$0xff]  ;;  %v8865_v39 = vld [vmem:[%s10417_s1] ss:$0 sm:$0xff] }
  0x16   : > { %8637 = vset.pattern.permute.xlu1 %v8714_v0  ;;  %8636 = vset.pattern.permute.xlu0 %v8714_v0  ;;  %v8870_v40 = vld [vmem:[%s10417_s1 + $0x2] ss:$0 sm:$0xff]  ;;  %vm608_vm0 = vcmask 1046528   ;;  %v10430_v42 = vmov 0.0   ;;  %vm769_vm1 = vcmask 1045504   ;;  %v1909_v63 = vld [vmem:[%s10419_s3 + $0x8] sm:$0xff] }
  0x17   : > { %s326_s21 = scalar_select %p325_p10, %s8789_s13, 1  ;;  %8172 = vmatprep.subr.mxu1 %v10430_v42  ;;  %8212 = vmatprep.subr.mxu0 %v10430_v42  ;;  %v8883_v56 = vld [vmem:[%s10417_s1 + $0x3] ss:$0 sm:$0xff]  ;;  %v8888_v57 = vld [vmem:[%s10417_s1 + $0x4] ss:$0 sm:$0xff]  ;;  %vm8716_vm2 = vmmov 0  }
  0x18   : > { %v8900_v0 = vld [vmem:[%s10417_s1 + $0x5] ss:$0 sm:$0xff]  ;;  %8173 = vmatpush3.msra.mxu1 %v1909_v63  ;;  %8174 = vmatprep.mubr.msk.f32.mxu1 %vm8716_vm2, %v10430_v42  ;;  %vm1854_vm3 = vcmask 1040384   ;;  %vm1862_vm4 = vcmask 1041408   ;;  %vm1870_vm5 = vcmask 1042432   ;;  %vm1878_vm6 = vcmask 1043456  }
  0x19   : > { %s8009_s22 = sshll.u32 %s326_s21, 8  ;;  %8177 = vmatprep.subr.mxu1 %v10430_v42  ;;  %8214 = vmatprep.mubr.msk.f32.mxu0 %vm8716_vm2, %v10430_v42  ;;  %vm1886_vm7 = vcmask 1044480   ;;  %vm1920_vm8 = vcmask 64512   ;;  %s323_s17 = sand.u32 1, %s8704_s10   ;;  %vm7837_vm9 = vcmask 73728  }
  0x1a   : > { %s8821_s25 = scalar_lea.vmem %s10416_s0, %s8009_s22  ;;  %s8006_s23 = sshll.u32 %s8789_s13, 4 }
  0x1b   : > { %v332_v1 = vld [vmem:[%s8821_s25 + $0x10] sm:$0xff]  ;;  %v330_v2 = vld [vmem:[%s8821_s25] sm:$0xff]  ;;  %v333_v3 = vld [vmem:[%s8821_s25 + $0x18] sm:$0xff]  ;;  %s324_s24 = scalar_lea.vmem [#allocation2], %s323_s17  ;;  %s10374_s28 = scalar_lea.hbm %s10425_s9, %s8006_s23 }
  0x1c   : > { %384 = vperm.xlu1 %8637, %v332_v1   ;;  %374 = vperm.xlu0 %8636, %v330_v2   ;;  %v331_v4 = vld [vmem:[%s8821_s25 + $0x8] sm:$0xff]  ;;  %v334_v6 = vld [vmem:[%s8821_s25 + $0x20] sm:$0xff]  ;;  %v337_v7 = vld [vmem:[%s8821_s25 + $0x38] sm:$0xff]  ;;  %s7840_s29 = scalar_lea.sflag [#allocation3], %s323_s17  ;;  %s8717_s13 = smov [#allocation2]  }
  0x1d   : > { %v335_v5 = vld [vmem:[%s8821_s25 + $0x28] sm:$0xff]  ;;  %v336_v8 = vld [vmem:[%s8821_s25 + $0x30] sm:$0xff]  ;;  %v338_v10 = vld [vmem:[%s8821_s25 + $0x40] sm:$0xff]  ;;  %s8654_s16 = sshll.u32 %s8717_s13, 4  ;;  %s8655_s16 = int_to_ptr.vmem [resolvable:$false] %s8654_s16 }
  0x1e   : > { %v339_v9 = vld [vmem:[%s8821_s25 + $0x48] sm:$0xff]  ;;  %v341_v11 = vld [vmem:[%s8821_s25 + $0x58] sm:$0xff]  ;;  %v340_v12 = vld [vmem:[%s8821_s25 + $0x50] sm:$0xff]  ;;  %s8656_s21 = scalar_lea.vmem %s8655_s16, 32 }
  0x1f   : > { %v343_v13 = vld [vmem:[%s8821_s25 + $0x68] sm:$0xff]  ;;  %v342_v14 = vld [vmem:[%s8821_s25 + $0x60] sm:$0xff]  ;;  %v345_v15 = vld [vmem:[%s8821_s25 + $0x78] sm:$0xff] }
  0x20   : > { %389 = vperm.xlu1 %8637, %v333_v3   ;;  %379 = vperm.xlu0 %8636, %v331_v4   ;;  %v344_v16 = vld [vmem:[%s8821_s25 + $0x70] sm:$0xff]  ;;  %v347_v17 = vld [vmem:[%s8821_s25 + $0x88] sm:$0xff]  ;;  %v346_v18 = vld [vmem:[%s8821_s25 + $0x80] sm:$0xff] }
  0x21   : > { %v349_v19 = vld [vmem:[%s8821_s25 + $0x98] sm:$0xff]  ;;  %v348_v20 = vld [vmem:[%s8821_s25 + $0x90] sm:$0xff]  ;;  %v351_v21 = vld [vmem:[%s8821_s25 + $0xa8] sm:$0xff] }
  0x22   : > { %v350_v22 = vld [vmem:[%s8821_s25 + $0xa0] sm:$0xff]  ;;  %v353_v23 = vld [vmem:[%s8821_s25 + $0xb8] sm:$0xff]  ;;  %v352_v24 = vld [vmem:[%s8821_s25 + $0xb0] sm:$0xff] }
  0x23   : > { %v355_v25 = vld [vmem:[%s8821_s25 + $0xc8] sm:$0xff]  ;;  %v354_v26 = vld [vmem:[%s8821_s25 + $0xc0] sm:$0xff]  ;;  %v357_v27 = vld [vmem:[%s8821_s25 + $0xd8] sm:$0xff] }
  0x24   : > { %399 = vperm.xlu1 %8637, %v335_v5   ;;  %394 = vperm.xlu0 %8636, %v334_v6   ;;  %v356_v28 = vld [vmem:[%s8821_s25 + $0xd0] sm:$0xff]  ;;  %v359_v29 = vld [vmem:[%s8821_s25 + $0xe8] sm:$0xff]  ;;  %v358_v30 = vld [vmem:[%s8821_s25 + $0xe0] sm:$0xff] }
  0x25   : > { %v361_v31 = vld [vmem:[%s8821_s25 + $0xf8] sm:$0xff]  ;;  %v360_v32 = vld [vmem:[%s8821_s25 + $0xf0] sm:$0xff]  ;;  %s7852_s25 = sshll.u32 %s324_s24, 4  ;;  %s10376_s25 = int_to_ptr.vmem [resolvable:$true] %s7852_s25 }
  0x26   : > { %s8650_s14 = scalar_lea.vmem %s10376_s25, 16  ;;  %p8657_p0 = scmp.lt.s32.totalorder %s10376_s25, %s8655_s16 }
  0x27   : > { %p8651_p11 = scmp.ne.s32.totalorder %s10376_s25, %s8650_s14  ;;  %p8658_p1 = scmp.lt.s32.totalorder %s8656_s21, %s8650_s14 }
  0x28   : > { %409 = vperm.xlu1 %8637, %v337_v7   ;;  %404 = vperm.xlu0 %8636, %v336_v8  }
  0x29   : > { %p8652_p12 = pnand %p8651_p11, %p8806_p5  ;;  %p8659_p2 = por %p8658_p1, %p8657_p0 }
  0x2b   : > { %p8653_p13 = pneg %p8652_p12 }
  0x2c   : > { %419 = vperm.xlu1 %8637, %v339_v9   ;;  %414 = vperm.xlu0 %8636, %v338_v10  }
  0x2d   : > { %p8660_p3 = pnand %p8659_p2, %p8653_p13 }
  0x30   : > { %429 = vperm.xlu1 %8637, %v341_v11   ;;  %424 = vperm.xlu0 %8636, %v340_v12  }
  0x34   : > { %439 = vperm.xlu1 %8637, %v343_v13   ;;  %434 = vperm.xlu0 %8636, %v342_v14  }
  0x38   : > { %449 = vperm.xlu1 %8637, %v345_v15   ;;  %444 = vperm.xlu0 %8636, %v344_v16  }
  0x3c   : > { %459 = vperm.xlu1 %8637, %v347_v17   ;;  %454 = vperm.xlu0 %8636, %v346_v18  }
  0x40   : > { %469 = vperm.xlu1 %8637, %v349_v19   ;;  %464 = vperm.xlu0 %8636, %v348_v20  }
  0x44   : > { %479 = vperm.xlu1 %8637, %v351_v21   ;;  %474 = vperm.xlu0 %8636, %v350_v22  }
  0x48   : > { %489 = vperm.xlu1 %8637, %v353_v23   ;;  %484 = vperm.xlu0 %8636, %v352_v24  }
  0x4c   : > { %499 = vperm.xlu1 %8637, %v355_v25   ;;  %494 = vperm.xlu0 %8636, %v354_v26  }
  0x50   : > { %509 = vperm.xlu1 %8637, %v357_v27   ;;  %504 = vperm.xlu0 %8636, %v356_v28  }
  0x54   : > { %875 = vperm.xlu1 %8637, %v359_v29   ;;  %870 = vperm.xlu0 %8636, %v358_v30   ;;  %v8917_v29 = vld [vmem:[%s10417_s1 + $0x6] ss:$0 sm:$0xff]  ;;  %v8922_v30 = vld [vmem:[%s10417_s1 + $0x7] ss:$0 sm:$0xff] }
  0x58   : > { %1267 = vperm.xlu1 %8637, %v361_v31   ;;  %1262 = vperm.xlu0 %8636, %v360_v32  }
  0x9b   : > { %v375_v33 = vpop.permute.xlu0 %374  ;;  %v385_v35 = vpop.permute.xlu1 %384 }
  0x9c   : > { %v552_v37 = vmul.f32 %v8858_v34, %v375_v33  ;;  %v713_v47 = vmul.f32 %v8870_v40, %v375_v33  ;;  %v518_v50 = vmul.f32 %v8865_v39, %v375_v33  ;;  %v554_v58 = vmul.f32 %v8858_v34, %v385_v35 }
  0x9d   : > { %v946_v4 = vmul.f32 %v8888_v57, %v385_v35  ;;  %v884_v7 = vmul.f32 %v8883_v56, %v385_v35  ;;  %v715_v11 = vmul.f32 %v8870_v40, %v385_v35  ;;  %v1106_v12 = vmul.f32 %v8900_v0, %v385_v35 }
  0x9e   : > { %v609_v43 = vrot.slane %v552_v37, 1  ;;  %v770_v54 = vrot.slane %v713_v47, 2  ;;  %v612_v6 = vrot.slane %v554_v58, 1  ;;  %v520_v17 = vmul.f32 %v8865_v39, %v385_v35 }
  0x9f   : > { %v380_v36 = vpop.permute.xlu0 %379  ;;  %v390_v44 = vpop.permute.xlu1 %389  ;;  %v1002_v18 = vrot.slane %v946_v4, 1  ;;  %v773_v24 = vrot.slane %v715_v11, 2  ;;  %v1162_v25 = vrot.slane %v1106_v12, 2 }
  0xa0   : > { %v553_v38 = vmul.f32 %v8858_v34, %v380_v36  ;;  %v519_v45 = vmul.f32 %v8865_v39, %v380_v36  ;;  %v714_v46 = vmul.f32 %v8870_v40, %v380_v36  ;;  %v555_v51 = vmul.f32 %v8858_v34, %v390_v44 }
  0xa1   : > { %v947_v60 = vmul.f32 %v8888_v57, %v390_v44  ;;  %v885_v61 = vmul.f32 %v8883_v56, %v390_v44  ;;  %v521_v1 = vmul.f32 %v8865_v39, %v390_v44  ;;  %v716_v2 = vmul.f32 %v8870_v40, %v390_v44 }
  0xa2   : > { %v610_v41 = vrot.slane %v553_v38, 1  ;;  %v771_v52 = vrot.slane %v714_v46, 2  ;;  %v613_v59 = vrot.slane %v555_v51, 1  ;;  %v1107_v9 = vmul.f32 %v8900_v0, %v390_v44 }
  0xa3   : > { %v400_v10 = vpop.permute.xlu1 %399  ;;  %v1003_v13 = vrot.slane %v947_v60, 1  ;;  %v774_v15 = vrot.slane %v716_v2, 2  ;;  %v395_v21 = vpop.permute.xlu0 %394 }
  0xa4   : > { %v611_v48 = vsel %vm608_vm0, %v609_v43, %v610_v41  ;;  %v680_v49 = vadd.f32 %v610_v41, %v519_v45  ;;  %v772_v62 = vsel %vm769_vm1, %v770_v54, %v771_v52  ;;  %v682_v8 = vadd.f32 %v613_v59, %v521_v1  ;;  %v8936_v45 = vld [vmem:[%s10417_s1 + $0x8] ss:$0 sm:$0xff] }
  0xa5   : > { %v679_v53 = vadd.f32 %v611_v48, %v518_v50  ;;  %v614_v14 = vsel %vm608_vm0, %v612_v6, %v613_v59  ;;  %v557_v20 = vmul.f32 %v8858_v34, %v400_v10  ;;  %v1163_v23 = vrot.slane %v1107_v9, 2 }
  0xa6   : > { %v841_v55 = vadd.f32 %v771_v52, %v680_v49  ;;  %v843_v22 = vadd.f32 %v774_v15, %v682_v8  ;;  %v681_v26 = vadd.f32 %v614_v14, %v520_v17  ;;  %v1004_v27 = vsel %vm608_vm0, %v1002_v18, %v1003_v13 }
  0xa7   : > { %v840_v3 = vadd.f32 %v772_v62, %v679_v53  ;;  %v887_v31 = vmul.f32 %v8883_v56, %v400_v10  ;;  %v949_v32 = vmul.f32 %v8888_v57, %v400_v10  ;;  %v556_v33 = vmul.f32 %v8858_v34, %v395_v21  ;;  %v410_v9 = vpop.permute.xlu1 %409 }
  0xa8   : > { %v913_v5 = vadd.f32 %v885_v61, %v841_v55  ;;  %v616_v36 = vrot.slane %v557_v20, 1  ;;  %v8928_v37 = vmul.f32 %v8870_v40, %v400_v10  ;;  %v775_v38 = vsel %vm769_vm1, %v773_v24, %v774_v15 }
  0xa9   : > { %v912_v16 = vadd.f32 %v884_v7, %v840_v3  ;;  %v1164_v41 = vsel %vm769_vm1, %v1162_v25, %v1163_v23  ;;  %v523_v43 = vmul.f32 %v8865_v39, %v400_v10  ;;  %v915_v44 = vadd.f32 %v887_v31, %v843_v22 }
  0xaa   : > { %v1073_v19 = vadd.f32 %v1003_v13, %v913_v5  ;;  %v1109_v46 = vmul.f32 %v8900_v0, %v400_v10  ;;  %v1277_v47 = vmul.f32 %v8917_v29, %v400_v10  ;;  %v1339_v48 = vmul.f32 %v8922_v30, %v400_v10 }
  0xab   : > { %v1072_v28 = vadd.f32 %v1004_v27, %v912_v16  ;;  %v1338_v49 = vmul.f32 %v8922_v30, %v395_v21  ;;  %v842_v50 = vadd.f32 %v775_v38, %v681_v26  ;;  %v1006_v52 = vrot.slane %v949_v32, 1 }
  0xac   : > { %v1233_v35 = vadd.f32 %v1163_v23, %v1073_v19  ;;  %v615_v53 = vrot.slane %v556_v33, 1  ;;  %v684_v54 = vadd.f32 %v616_v36, %v523_v43  ;;  %v777_v55 = vrot.slane %v8928_v37, 2  ;;  %v405_v23 = vpop.permute.xlu0 %404 }
  0xad   : > { %v1232_v51 = vadd.f32 %v1164_v41, %v1072_v28  ;;  %v948_v59 = vmul.f32 %v8888_v57, %v395_v21  ;;  %v1075_v60 = vadd.f32 %v1006_v52, %v915_v44  ;;  %v1499_v61 = vmul.f32 %v8936_v45, %v400_v10 }
  0xae   : > { %v1305_v58 = vadd.f32 %v1277_v47, %v1233_v35  ;;  %v717_v62 = vmul.f32 %v8870_v40, %v395_v21  ;;  %v1276_v63 = vmul.f32 %v8917_v29, %v395_v21  ;;  %v1166_v1 = vrot.slane %v1109_v46, 2 }
  0xaf   : > { %v1395_v2 = vrot.slane %v1339_v48, 1  ;;  %v1394_v3 = vrot.slane %v1338_v49, 1  ;;  %v1498_v4 = vmul.f32 %v8936_v45, %v395_v21  ;;  %v617_v5 = vsel %vm608_vm0, %v615_v53, %v616_v36 }
  0xb0   : > { %v886_v6 = vmul.f32 %v8883_v56, %v395_v21  ;;  %v1108_v7 = vmul.f32 %v8900_v0, %v395_v21  ;;  %v1304_v8 = vadd.f32 %v1276_v63, %v1232_v51  ;;  %v845_v11 = vadd.f32 %v777_v55, %v684_v54  ;;  %v8978_v54 = vld [vmem:[%s10418_s2] ss:$0 sm:$0xff] }
  0xb1   : > { %v1465_v12 = vadd.f32 %v1395_v2, %v1305_v58  ;;  %v522_v10 = vmul.f32 %v8865_v39, %v395_v21  ;;  %v1005_v13 = vrot.slane %v948_v59, 1  ;;  %v1235_v14 = vadd.f32 %v1166_v1, %v1075_v60 }
  0xb2   : > { %v1555_v15 = vrot.slane %v1499_v61, 2  ;;  %v776_v16 = vrot.slane %v717_v62, 2  ;;  %v914_v17 = vadd.f32 %v886_v6, %v842_v50  ;;  %v1396_v19 = vsel %vm608_vm0, %v1394_v3, %v1395_v2  ;;  %v420_v6 = vpop.permute.xlu1 %419 }
  0xb3   : > { %v683_v18 = vadd.f32 %v617_v5, %v522_v10  ;;  %v1554_v20 = vrot.slane %v1498_v4, 2  ;;  %v559_v22 = vmul.f32 %v8858_v34, %v410_v9  ;;  %v1165_v24 = vrot.slane %v1108_v7, 2 }
  0xb4   : > { %v1464_v25 = vadd.f32 %v1396_v19, %v1304_v8  ;;  %v8955_v26 = vmul.f32 %v8870_v40, %v410_v9  ;;  %v951_v27 = vmul.f32 %v8888_v57, %v410_v9  ;;  %v8958_v21 = vadd.f32 %v1555_v15, %v1465_v12 }
  0xb5   : > { %v1007_v28 = vsel %vm608_vm0, %v1005_v13, %v1006_v52  ;;  %v525_v31 = vmul.f32 %v8865_v39, %v410_v9  ;;  %v889_v32 = vmul.f32 %v8883_v56, %v410_v9  ;;  %v1279_v35 = vmul.f32 %v8917_v29, %v410_v9 }
  0xb6   : > { %v1074_v33 = vadd.f32 %v1007_v28, %v914_v17  ;;  %v1341_v36 = vmul.f32 %v8922_v30, %v410_v9  ;;  %v558_v37 = vmul.f32 %v8858_v34, %v405_v23  ;;  %v1556_v38 = vsel %vm769_vm1, %v1554_v20, %v1555_v15 }
  0xb7   : > { %v619_v41 = vrot.slane %v559_v22, 1  ;;  %v917_v43 = vadd.f32 %v889_v32, %v845_v11  ;;  %v8968_v44 = vmul.f32 %v8900_v0, %v410_v9  ;;  %v1624_v46 = vadd.f32 %v1556_v38, %v1464_v25 }
  0xb8   : > { %v780_v47 = vrot.slane %v8955_v26, 2  ;;  %v1009_v48 = vrot.slane %v951_v27, 1  ;;  %v1307_v49 = vadd.f32 %v1279_v35, %v1235_v14  ;;  %v1501_v50 = vmul.f32 %v8936_v45, %v410_v9 }
  0xb9   : > { %v778_v51 = vsel %vm769_vm1, %v776_v16, %v777_v55  ;;  %v1167_v52 = vsel %vm769_vm1, %v1165_v24, %v1166_v1  ;;  %v1340_v53 = vmul.f32 %v8922_v30, %v405_v23  ;;  %v1398_v58 = vrot.slane %v1341_v36, 1 }
  0xba   : > { %v1234_v59 = vadd.f32 %v1167_v52, %v1074_v33  ;;  %v618_v60 = vrot.slane %v558_v37, 1  ;;  %v950_v61 = vmul.f32 %v8888_v57, %v405_v23  ;;  %v686_v62 = vadd.f32 %v619_v41, %v525_v31  ;;  %v415_v31 = vpop.permute.xlu0 %414 }
  0xbb   : > { %v1077_v63 = vadd.f32 %v1009_v48, %v917_v43  ;;  %v1169_v2 = vrot.slane %v8968_v44, 2  ;;  %v844_v3 = vadd.f32 %v778_v51, %v683_v18  ;;  %v1467_v55 = vadd.f32 %v1398_v58, %v1307_v49 }
  0xbc   : > { %v719_v1 = vmul.f32 %v8870_v40, %v405_v23  ;;  %v1278_v4 = vmul.f32 %v8917_v29, %v405_v23  ;;  %v1500_v5 = vmul.f32 %v8936_v45, %v405_v23  ;;  %v8986_v7 = vadd.f32 %v8978_v54, %v1624_v46 }
  0xbd   : > { %v1558_v8 = vrot.slane %v1501_v50, 2  ;;  %v888_v9 = vmul.f32 %v8883_v56, %v405_v23  ;;  %v1397_v11 = vrot.slane %v1340_v53, 1  ;;  %v620_v12 = vsel %vm608_vm0, %v618_v60, %v619_v41 }
  0xbe   : > { %v1008_v10 = vrot.slane %v950_v61, 1  ;;  %v1110_v13 = vmul.f32 %v8900_v0, %v405_v23  ;;  %v1306_v14 = vadd.f32 %v1278_v4, %v1234_v59  ;;  %v847_v15 = vadd.f32 %v780_v47, %v686_v62 }
  0xbf   : > { %v1237_v16 = vadd.f32 %v1169_v2, %v1077_v63  ;;  %v524_v17 = vmul.f32 %v8865_v39, %v405_v23  ;;  %v561_v18 = vmul.f32 %v8858_v34, %v420_v6  ;;  %v8993_v19 = vadd.f32 %v1558_v8, %v1467_v55 }
  0xc0   : > { %v779_v20 = vrot.slane %v719_v1, 2  ;;  %v916_v22 = vadd.f32 %v888_v9, %v844_v3  ;;  %v1557_v24 = vrot.slane %v1500_v5, 2  ;;  %v1399_v26 = vsel %vm608_vm0, %v1397_v11, %v1398_v58 }
  0xc1   : > { %v685_v25 = vadd.f32 %v620_v12, %v524_v17  ;;  %v891_v27 = vmul.f32 %v8883_v56, %v420_v6  ;;  %v953_v28 = vmul.f32 %v8888_v57, %v420_v6  ;;  %v1010_v32 = vsel %vm608_vm0, %v1008_v10, %v1009_v48 }
  0xc2   : > { %v1168_v33 = vrot.slane %v1110_v13, 2  ;;  %v1466_v35 = vadd.f32 %v1399_v26, %v1306_v14  ;;  %v527_v23 = vmul.f32 %v8865_v39, %v420_v6  ;;  %v622_v36 = vrot.slane %v561_v18, 1  ;;  %v430_v18 = vpop.permute.xlu1 %429 }
  0xc3   : > { %v919_v37 = vadd.f32 %v891_v27, %v847_v15  ;;  %v1281_v38 = vmul.f32 %v8917_v29, %v420_v6  ;;  %v1343_v41 = vmul.f32 %v8922_v30, %v420_v6  ;;  %v1559_v43 = vsel %vm769_vm1, %v1557_v24, %v1558_v8 }
  0xc4   : > { %v781_v44 = vsel %vm769_vm1, %v779_v20, %v780_v47  ;;  %v560_v46 = vmul.f32 %v8858_v34, %v415_v31  ;;  %v952_v49 = vmul.f32 %v8888_v57, %v415_v31  ;;  %v1012_v50 = vrot.slane %v953_v28, 1 }
  0xc5   : > { %v1113_v48 = vmul.f32 %v8900_v0, %v420_v6  ;;  %v1309_v51 = vadd.f32 %v1281_v38, %v1237_v16  ;;  %v846_v52 = vadd.f32 %v781_v44, %v685_v25  ;;  %v1076_v53 = vadd.f32 %v1010_v32, %v916_v22  ;;  %v425_v32 = vpop.permute.xlu0 %424 }
  0xc6   : > { %v1626_v58 = vadd.f32 %v1559_v43, %v1466_v35  ;;  %v9008_v59 = vmul.f32 %v8870_v40, %v420_v6  ;;  %v1503_v60 = vmul.f32 %v8936_v45, %v420_v6  ;;  %v1079_v61 = vadd.f32 %v1012_v50, %v919_v37 }
  0xc7   : > { %v1401_v62 = vrot.slane %v1343_v41, 1  ;;  %v890_v47 = vmul.f32 %v8883_v56, %v415_v31  ;;  %v1342_v63 = vmul.f32 %v8922_v30, %v415_v31  ;;  %v688_v3 = vadd.f32 %v622_v36, %v527_v23 }
  0xc8   : > { %v621_v55 = vrot.slane %v560_v46, 1  ;;  %v1011_v1 = vrot.slane %v952_v49, 1  ;;  %v1112_v4 = vmul.f32 %v8900_v0, %v415_v31  ;;  %v1172_v5 = vrot.slane %v1113_v48, 2 }
  0xc9   : > { %v1469_v8 = vadd.f32 %v1401_v62, %v1309_v51  ;;  %v1170_v9 = vsel %vm769_vm1, %v1168_v33, %v1169_v2  ;;  %v918_v11 = vadd.f32 %v890_v47, %v846_v52  ;;  %v9016_v12 = vadd.f32 %v8978_v54, %v1626_v58 }
  0xca   : > { %v783_v6 = vrot.slane %v9008_v59, 2  ;;  %v1561_v10 = vrot.slane %v1503_v60, 2  ;;  %v1236_v13 = vadd.f32 %v1170_v9, %v1076_v53  ;;  %v1239_v14 = vadd.f32 %v1172_v5, %v1079_v61 }
  0xcb   : > { %v721_v15 = vmul.f32 %v8870_v40, %v415_v31  ;;  %v1280_v16 = vmul.f32 %v8917_v29, %v415_v31  ;;  %v1400_v17 = vrot.slane %v1342_v63, 1  ;;  %v623_v20 = vsel %vm608_vm0, %v621_v55, %v622_v36 }
  0xcc   : > { %v1013_v22 = vsel %vm608_vm0, %v1011_v1, %v1012_v50  ;;  %v1171_v2 = vrot.slane %v1112_v4, 2  ;;  %v1502_v24 = vmul.f32 %v8936_v45, %v415_v31  ;;  %v849_v25 = vadd.f32 %v783_v6, %v688_v3 }
  0xcd   : > { %v1629_v26 = vadd.f32 %v1561_v10, %v1469_v8  ;;  %v526_v27 = vmul.f32 %v8865_v39, %v415_v31  ;;  %v1078_v28 = vadd.f32 %v1013_v22, %v918_v11  ;;  %v1308_v33 = vadd.f32 %v1280_v16, %v1236_v13 }
  0xce   : > { %v563_v35 = vmul.f32 %v8858_v34, %v430_v18  ;;  %v1283_v23 = vmul.f32 %v8917_v29, %v430_v18  ;;  %v1345_v37 = vmul.f32 %v8922_v30, %v430_v18  ;;  %v782_v36 = vrot.slane %v721_v15, 2 }
  0xcf   : > { %v687_v38 = vadd.f32 %v623_v20, %v526_v27  ;;  %v1402_v41 = vsel %vm608_vm0, %v1400_v17, %v1401_v62  ;;  %v9030_v43 = vmul.f32 %v8870_v40, %v430_v18  ;;  %v1560_v44 = vrot.slane %v1502_v24, 2 }
  0xd0   : > { %v1311_v46 = vadd.f32 %v1283_v23, %v1239_v14  ;;  %v1173_v31 = vsel %vm769_vm1, %v1171_v2, %v1172_v5  ;;  %v1344_v49 = vmul.f32 %v8922_v30, %v425_v32  ;;  %v893_v50 = vmul.f32 %v8883_v56, %v430_v18  ;;  %v440_v2 = vpop.permute.xlu1 %439 }
  0xd1   : > { %v9036_v48 = vmul.f32 %v8888_v57, %v430_v18  ;;  %v1238_v51 = vadd.f32 %v1173_v31, %v1078_v28  ;;  %v562_v52 = vmul.f32 %v8858_v34, %v425_v32  ;;  %v1468_v53 = vadd.f32 %v1402_v41, %v1308_v33 }
  0xd2   : > { %v625_v58 = vrot.slane %v563_v35, 1  ;;  %v1404_v59 = vrot.slane %v1345_v37, 1  ;;  %v1505_v60 = vmul.f32 %v8936_v45, %v430_v18  ;;  %v529_v61 = vmul.f32 %v8865_v39, %v430_v18 }
  0xd3   : > { %v921_v62 = vadd.f32 %v893_v50, %v849_v25  ;;  %v9042_v47 = vmul.f32 %v8900_v0, %v430_v18  ;;  %v1282_v63 = vmul.f32 %v8917_v29, %v425_v32  ;;  %v786_v3 = vrot.slane %v9030_v43, 2 }
  0xd4   : > { %v1471_v55 = vadd.f32 %v1404_v59, %v1311_v46  ;;  %v1403_v1 = vrot.slane %v1344_v49, 1  ;;  %v1504_v4 = vmul.f32 %v8936_v45, %v425_v32  ;;  %v1562_v5 = vsel %vm769_vm1, %v1560_v44, %v1561_v10 }
  0xd5   : > { %v1015_v8 = vrot.slane %v9036_v48, 1  ;;  %v624_v9 = vrot.slane %v562_v52, 1  ;;  %v1310_v11 = vadd.f32 %v1282_v63, %v1238_v51  ;;  %v1628_v13 = vadd.f32 %v1562_v5, %v1468_v53  ;;  %v435_v51 = vpop.permute.xlu0 %434 }
  0xd6   : > { %v690_v14 = vadd.f32 %v625_v58, %v529_v61  ;;  %v1564_v15 = vrot.slane %v1505_v60, 2  ;;  %v784_v16 = vsel %vm769_vm1, %v782_v36, %v783_v6  ;;  %v1175_v18 = vrot.slane %v9042_v47, 2 }
  0xd7   : > { %v1081_v17 = vadd.f32 %v1015_v8, %v921_v62  ;;  %v848_v20 = vadd.f32 %v784_v16, %v687_v38  ;;  %v723_v22 = vmul.f32 %v8870_v40, %v425_v32  ;;  %v892_v25 = vmul.f32 %v8883_v56, %v425_v32 }
  0xd8   : > { %v1631_v24 = vadd.f32 %v1564_v15, %v1471_v55  ;;  %v1405_v10 = vsel %vm608_vm0, %v1403_v1, %v1404_v59  ;;  %v1563_v27 = vrot.slane %v1504_v4, 2  ;;  %v626_v28 = vsel %vm608_vm0, %v624_v9, %v625_v58 }
  0xd9   : > { %v954_v33 = vmul.f32 %v8888_v57, %v425_v32  ;;  %v1114_v35 = vmul.f32 %v8900_v0, %v425_v32  ;;  %v1470_v6 = vadd.f32 %v1405_v10, %v1310_v11  ;;  %v1663_v23 = vadd.f32 %v8978_v54, %v1629_v26 }
  0xda   : > { %v851_v37 = vadd.f32 %v786_v3, %v690_v14  ;;  %v528_v38 = vmul.f32 %v8865_v39, %v425_v32  ;;  %v565_v36 = vmul.f32 %v8858_v34, %v440_v2  ;;  %v1662_v41 = vadd.f32 %v8978_v54, %v1628_v13 }
  0xdb   : > { %v1241_v43 = vadd.f32 %v1175_v18, %v1081_v17  ;;  %v785_v44 = vrot.slane %v723_v22, 2  ;;  %v920_v46 = vadd.f32 %v892_v25, %v848_v20  ;;  %v1565_v49 = vsel %vm769_vm1, %v1563_v27, %v1564_v15 }
  0xdc   : > { %v689_v31 = vadd.f32 %v626_v28, %v528_v38  ;;  %v895_v50 = vmul.f32 %v8883_v56, %v440_v2  ;;  %v957_v48 = vmul.f32 %v8888_v57, %v440_v2  ;;  %v1665_v26 = vadd.f32 %v8978_v54, %v1631_v24 }
  0xdd   : > { %v1014_v52 = vrot.slane %v954_v33, 1  ;;  %v1174_v53 = vrot.slane %v1114_v35, 2  ;;  %v1630_v32 = vadd.f32 %v1565_v49, %v1470_v6  ;;  %v531_v58 = vmul.f32 %v8865_v39, %v440_v2 }
  0xde   : > { %v628_v59 = vrot.slane %v565_v36, 1  ;;  %v9067_v60 = vmul.f32 %v8870_v40, %v440_v2  ;;  %v923_v61 = vadd.f32 %v895_v50, %v851_v37  ;;  %v1117_v62 = vmul.f32 %v8900_v0, %v440_v2  ;;  %v450_v37 = vpop.permute.xlu1 %449 }
  0xdf   : > { %v787_v47 = vsel %vm769_vm1, %v785_v44, %v786_v3  ;;  %v564_v63 = vmul.f32 %v8858_v34, %v435_v51  ;;  %v956_v55 = vmul.f32 %v8888_v57, %v435_v51  ;;  %v1018_v1 = vrot.slane %v957_v48, 1 }
  0xe0   : > { %v1285_v4 = vmul.f32 %v8917_v29, %v440_v2  ;;  %v1347_v5 = vmul.f32 %v8922_v30, %v440_v2  ;;  %v850_v9 = vadd.f32 %v787_v47, %v689_v31  ;;  %v9075_v11 = vmax.f32 %v1663_v23, %v1665_v26 }
  0xe1   : > { %v1016_v13 = vsel %vm608_vm0, %v1014_v52, %v1015_v8  ;;  %v1664_v14 = vadd.f32 %v8978_v54, %v1630_v32  ;;  %v9080_v15 = vmul.f32 %v8936_v45, %v440_v2  ;;  %v1083_v16 = vadd.f32 %v1018_v1, %v923_v61  ;;  %v9097_v52 = vpop.permute.xlu0 %444 }
  0xe2   : > { %v1080_v3 = vadd.f32 %v1016_v13, %v920_v46  ;;  %v1313_v17 = vadd.f32 %v1285_v4, %v1241_v43  ;;  %v894_v20 = vmul.f32 %v8883_v56, %v435_v51  ;;  %v789_v22 = vrot.slane %v9067_v60, 2 }
  0xe3   : > { %v627_v24 = vrot.slane %v564_v63, 1  ;;  %v1017_v25 = vrot.slane %v956_v55, 1  ;;  %v1116_v10 = vmul.f32 %v8900_v0, %v435_v51  ;;  %v692_v27 = vadd.f32 %v628_v59, %v531_v58  ;;  %v1908_v55 = vld [vmem:[%s10419_s3] sm:$0xff] }
  0xe4   : > { %v1178_v28 = vrot.slane %v1117_v62, 2  ;;  %v1407_v33 = vrot.slane %v1347_v5, 1  ;;  %v922_v8 = vadd.f32 %v894_v20, %v850_v9  ;;  %v9085_v35 = vmax.f32 %v1662_v41, %v1664_v14  ;;  %8213 = vmatpush3.msra.mxu0 %v1908_v55 }
  0xe5   : > { %v1567_v2 = vrot.slane %v9080_v15, 2  ;;  %v1176_v6 = vsel %vm769_vm1, %v1174_v53, %v1175_v18  ;;  %v1346_v23 = vmul.f32 %v8922_v30, %v435_v51  ;;  %v725_v44 = vmul.f32 %v8870_v40, %v435_v51  ;;  %8222 = vmatprep.subr.mxu0 %v10430_v42 }
  0xe6   : > { %v1243_v38 = vadd.f32 %v1178_v28, %v1083_v16  ;;  %v1473_v36 = vadd.f32 %v1407_v33, %v1313_v17  ;;  %v1240_v43 = vadd.f32 %v1176_v6, %v1080_v3  ;;  %v629_v46 = vsel %vm608_vm0, %v627_v24, %v628_v59 }
  0xe7   : > { %v1019_v31 = vsel %vm608_vm0, %v1017_v25, %v1018_v1  ;;  %v1177_v49 = vrot.slane %v1116_v10, 2  ;;  %v1284_v41 = vmul.f32 %v8917_v29, %v435_v51  ;;  %v1506_v48 = vmul.f32 %v8936_v45, %v435_v51 }
  0xe8   : > { %v1082_v50 = vadd.f32 %v1019_v31, %v922_v8  ;;  %v1287_v18 = vmul.f32 %v8917_v29, %v450_v37  ;;  %v1349_v26 = vmul.f32 %v8922_v30, %v450_v37  ;;  %v853_v53 = vadd.f32 %v789_v22, %v692_v27 }
  0xe9   : > { %v530_v32 = vmul.f32 %v8865_v39, %v435_v51  ;;  %v1406_v58 = vrot.slane %v1346_v23, 1  ;;  %v9103_v59 = vmul.f32 %v8858_v34, %v450_v37  ;;  %v1708_v61 = vrot.slane %v9085_v35, 1 }
  0xea   : > { %v1633_v62 = vadd.f32 %v1567_v2, %v1473_v36  ;;  %v1312_v47 = vadd.f32 %v1284_v41, %v1240_v43  ;;  %v1315_v63 = vadd.f32 %v1287_v18, %v1243_v38  ;;  %v788_v4 = vrot.slane %v725_v44, 2  ;;  %v460_v44 = vpop.permute.xlu1 %459 }
  0xeb   : > { %v691_v1 = vadd.f32 %v629_v46, %v530_v32  ;;  %v1179_v5 = vsel %vm769_vm1, %v1177_v49, %v1178_v28  ;;  %v1348_v51 = vmul.f32 %v8922_v30, %v9097_v52  ;;  %v1566_v9 = vrot.slane %v1506_v48, 2 }
  0xec   : > { %v1410_v13 = vrot.slane %v1349_v26, 1  ;;  %v1509_v14 = vmul.f32 %v8936_v45, %v450_v37  ;;  %v1242_v15 = vadd.f32 %v1179_v5, %v1082_v50  ;;  %v1408_v3 = vsel %vm608_vm0, %v1406_v58, %v1407_v33 }
  0xed   : > { %v533_v16 = vmul.f32 %v8865_v39, %v450_v37  ;;  %v631_v17 = vrot.slane %v9103_v59, 1  ;;  %v9118_v20 = vmul.f32 %v8870_v40, %v450_v37  ;;  %v1472_v24 = vadd.f32 %v1408_v3, %v1312_v47 }
  0xee   : > { %v959_v25 = vmul.f32 %v8888_v57, %v450_v37  ;;  %v1475_v10 = vadd.f32 %v1410_v13, %v1315_v63  ;;  %v1286_v27 = vmul.f32 %v8917_v29, %v9097_v52  ;;  %v897_v28 = vmul.f32 %v8883_v56, %v450_v37 }
  0xef   : > { %v9125_v8 = vmul.f32 %v8900_v0, %v450_v37  ;;  %v1409_v33 = vrot.slane %v1348_v51, 1  ;;  %v1508_v6 = vmul.f32 %v8936_v45, %v9097_v52  ;;  %v1568_v23 = vsel %vm769_vm1, %v1566_v9, %v1567_v2 }
  0xf0   : > { %v1570_v38 = vrot.slane %v1509_v14, 2  ;;  %v566_v36 = vmul.f32 %v8858_v34, %v9097_v52  ;;  %v1314_v43 = vadd.f32 %v1286_v27, %v1242_v15  ;;  %v694_v46 = vadd.f32 %v631_v17, %v533_v16 }
  0xf1   : > { %v792_v31 = vrot.slane %v9118_v20, 2  ;;  %v925_v49 = vadd.f32 %v897_v28, %v853_v53  ;;  %v790_v37 = vsel %vm769_vm1, %v788_v4, %v789_v22  ;;  %v1632_v41 = vadd.f32 %v1568_v23, %v1472_v24 }
  0xf2   : > { %v1021_v50 = vrot.slane %v959_v25, 1  ;;  %v1635_v48 = vadd.f32 %v1570_v38, %v1475_v10  ;;  %v852_v18 = vadd.f32 %v790_v37, %v691_v1  ;;  %v958_v2 = vmul.f32 %v8888_v57, %v9097_v52 }
  0xf3   : > { %v1411_v26 = vsel %vm608_vm0, %v1409_v33, %v1410_v13  ;;  %v1569_v32 = vrot.slane %v1508_v6, 2  ;;  %v9140_v58 = vmul.f32 %v8858_v34, %v460_v44  ;;  %v9143_v59 = vmax.f32 %v9085_v35, %v1708_v61  ;;  %v455_v33 = vpop.permute.xlu0 %454 }
  0xf4   : > { %v1667_v60 = vadd.f32 %v8978_v54, %v1633_v62  ;;  %v630_v53 = vrot.slane %v566_v36, 1  ;;  %v1474_v22 = vadd.f32 %v1411_v26, %v1314_v43  ;;  %v855_v47 = vadd.f32 %v792_v31, %v694_v46 }
  0xf5   : > { %v1085_v63 = vadd.f32 %v1021_v50, %v925_v49  ;;  %v1181_v55 = vrot.slane %v9125_v8, 2  ;;  %v896_v1 = vmul.f32 %v8883_v56, %v9097_v52  ;;  %v1666_v4 = vadd.f32 %v8978_v54, %v1632_v41 }
  0xf6   : > { %v1669_v5 = vadd.f32 %v8978_v54, %v1635_v48  ;;  %v727_v51 = vmul.f32 %v8870_v40, %v9097_v52  ;;  %v1118_v35 = vmul.f32 %v8900_v0, %v9097_v52  ;;  %v1020_v62 = vrot.slane %v958_v2, 1  ;;  %v470_v2 = vpop.permute.xlu1 %469 }
  0xf7   : > { %v924_v61 = vadd.f32 %v896_v1, %v852_v18  ;;  %v1571_v9 = vsel %vm769_vm1, %v1569_v32, %v1570_v38  ;;  %v634_v13 = vrot.slane %v9140_v58, 1  ;;  %v632_v14 = vsel %vm608_vm0, %v630_v53, %v631_v17 }
  0xf8   : > { %v1634_v15 = vadd.f32 %v1571_v9, %v1474_v22  ;;  %v899_v3 = vmul.f32 %v8883_v56, %v460_v44  ;;  %v961_v16 = vmul.f32 %v8888_v57, %v460_v44  ;;  %v1245_v20 = vadd.f32 %v1181_v55, %v1085_v63 }
  0xf9   : > { %v532_v24 = vmul.f32 %v8865_v39, %v9097_v52  ;;  %v535_v25 = vmul.f32 %v8865_v39, %v460_v44  ;;  %v9164_v10 = vmul.f32 %v8870_v40, %v460_v44  ;;  %v9166_v27 = vmax.f32 %v1667_v60, %v1669_v5 }
  0xfa   : > { %v791_v28 = vrot.slane %v727_v51, 2  ;;  %v927_v8 = vadd.f32 %v899_v3, %v855_v47  ;;  %v9169_v17 = vmul.f32 %v8900_v0, %v460_v44  ;;  %v1022_v23 = vsel %vm608_vm0, %v1020_v62, %v1021_v50 }
  0xfb   : > { %v693_v6 = vadd.f32 %v632_v14, %v532_v24  ;;  %v1180_v38 = vrot.slane %v1118_v35, 2  ;;  %v696_v36 = vadd.f32 %v634_v13, %v535_v25  ;;  %v1084_v43 = vadd.f32 %v1022_v23, %v924_v61 }
  0xfc   : > { %v1668_v52 = vadd.f32 %v8978_v54, %v1634_v15  ;;  %v1024_v46 = vrot.slane %v961_v16, 1  ;;  %v1289_v49 = vmul.f32 %v8917_v29, %v460_v44  ;;  %v795_v37 = vrot.slane %v9164_v10, 2 }
  0xfd   : > { %v9176_v41 = vmul.f32 %v8922_v30, %v460_v44  ;;  %v9179_v48 = vmul.f32 %v8936_v45, %v460_v44  ;;  %v568_v18 = vmul.f32 %v8858_v34, %v455_v33  ;;  %v1184_v32 = vrot.slane %v9169_v17, 2 }
  0xfe   : > { %v1087_v26 = vadd.f32 %v1024_v46, %v927_v8  ;;  %v9184_v58 = vadd.f32 %v1289_v49, %v1245_v20  ;;  %v857_v60 = vadd.f32 %v795_v37, %v696_v36  ;;  %v793_v53 = vsel %vm769_vm1, %v791_v28, %v792_v31 }
  0xff   : > { %v1182_v22 = vsel %vm769_vm1, %v1180_v38, %v1181_v55  ;;  %v960_v47 = vmul.f32 %v8888_v57, %v455_v33  ;;  %v9189_v63 = vmax.f32 %v1666_v4, %v1668_v52  ;;  %v854_v44 = vadd.f32 %v793_v53, %v693_v6  ;;  %v465_v52 = vpop.permute.xlu0 %464 }
 0x100   : > { %v534_v1 = vmul.f32 %v8865_v39, %v455_v33  ;;  %v9193_v5 = vmul.f32 %v8858_v34, %v470_v2  ;;  %v10428_v51 = vrot.slane %v9176_v41, 1  ;;  %v10426_v35 = vrot.slane %v9179_v48, 2 }
 0x101   : > { %v633_v61 = vrot.slane %v568_v18, 1  ;;  %v1350_v62 = vmul.f32 %v8922_v30, %v455_v33  ;;  %v1247_v31 = vadd.f32 %v1184_v32, %v1087_v26  ;;  %v1244_v9 = vadd.f32 %v1182_v22, %v1084_v43 }
 0x102   : > { %v729_v55 = vmul.f32 %v8870_v40, %v455_v33  ;;  %v898_v4 = vmul.f32 %v8883_v56, %v455_v33  ;;  %v1023_v14 = vrot.slane %v960_v47, 1  ;;  %v1510_v15 = vmul.f32 %v8936_v45, %v455_v33 }
 0x103   : > { %v901_v3 = vmul.f32 %v8883_v56, %v470_v2  ;;  %v9203_v16 = vmul.f32 %v8888_v57, %v470_v2  ;;  %v1120_v24 = vmul.f32 %v8900_v0, %v455_v33  ;;  %v1288_v25 = vmul.f32 %v8917_v29, %v455_v33 }
 0x104   : > { %v926_v20 = vadd.f32 %v898_v4, %v854_v44  ;;  %v637_v10 = vrot.slane %v9193_v5, 1  ;;  %v635_v8 = vsel %vm608_vm0, %v633_v61, %v634_v13  ;;  %v1412_v17 = vrot.slane %v1350_v62, 1 }
 0x105   : > { %v929_v6 = vadd.f32 %v901_v3, %v857_v60  ;;  %v794_v23 = vrot.slane %v729_v55, 2  ;;  %v1316_v38 = vadd.f32 %v1288_v25, %v1244_v9  ;;  %v537_v36 = vmul.f32 %v8865_v39, %v470_v2  ;;  %v480_v25 = vpop.permute.xlu1 %479 }
 0x106   : > { %v9212_v43 = vmul.f32 %v8870_v40, %v470_v2  ;;  %v1025_v49 = vsel %vm608_vm0, %v1023_v14, %v1024_v46  ;;  %v1572_v18 = vrot.slane %v1510_v15, 2  ;;  %v1027_v33 = vrot.slane %v9203_v16, 1 }
 0x107   : > { %v9217_v26 = vmul.f32 %v8900_v0, %v470_v2  ;;  %v695_v53 = vadd.f32 %v635_v8, %v534_v1  ;;  %v1086_v13 = vadd.f32 %v1025_v49, %v926_v20  ;;  %v1183_v22 = vrot.slane %v1120_v24, 2 }
 0x108   : > { %v698_v60 = vadd.f32 %v637_v10, %v537_v36  ;;  %v1414_v47 = vsel %vm608_vm0, %v1412_v17, %v10428_v51  ;;  %v1089_v44 = vadd.f32 %v1027_v33, %v929_v6  ;;  %v1291_v5 = vmul.f32 %v8917_v29, %v470_v2 }
 0x109   : > { %v570_v61 = vmul.f32 %v8858_v34, %v465_v52  ;;  %v9224_v46 = vadd.f32 %v1414_v47, %v1316_v38  ;;  %v798_v62 = vrot.slane %v9212_v43, 2  ;;  %v9228_v9 = vmul.f32 %v8922_v30, %v470_v2 }
 0x10a   : > { %v9231_v1 = vmul.f32 %v8936_v45, %v470_v2  ;;  %v9236_v55 = vsel %vm769_vm1, %v1572_v18, %v10426_v35  ;;  %v1187_v4 = vrot.slane %v9217_v26, 2  ;;  %v9239_v14 = vadd.f32 %v1291_v5, %v1247_v31 }
 0x10b   : > { %v796_v15 = vsel %vm769_vm1, %v794_v23, %v795_v37  ;;  %v859_v3 = vadd.f32 %v798_v62, %v698_v60  ;;  %v731_v20 = vmul.f32 %v8870_v40, %v465_v52  ;;  %v962_v24 = vmul.f32 %v8888_v57, %v465_v52 }
 0x10c   : > { %v856_v16 = vadd.f32 %v796_v15, %v695_v53  ;;  %v1249_v2 = vadd.f32 %v1187_v4, %v1089_v44  ;;  %v1185_v8 = vsel %vm769_vm1, %v1183_v22, %v1184_v32  ;;  %v636_v17 = vrot.slane %v570_v61, 1  ;;  %v475_v22 = vpop.permute.xlu0 %474 }
 0x10d   : > { %v1122_v6 = vmul.f32 %v8900_v0, %v465_v52  ;;  %v10427_v38 = vrot.slane %v9228_v9, 1  ;;  %v1246_v36 = vadd.f32 %v1185_v8, %v1086_v13  ;;  %v1352_v37 = vmul.f32 %v8922_v30, %v465_v52 }
 0x10e   : > { %v900_v23 = vmul.f32 %v8883_v56, %v465_v52  ;;  %v573_v40 = vmul.f32 %v8858_v34, %v480_v25  ;;  %v1293_v43 = vmul.f32 %v8917_v29, %v480_v25  ;;  %v9253_v49 = vmul.f32 %v8922_v30, %v480_v25 }
 0x10f   : > { %v536_v32 = vmul.f32 %v8865_v39, %v465_v52  ;;  %v797_v18 = vrot.slane %v731_v20, 2  ;;  %v1026_v26 = vrot.slane %v962_v24, 1  ;;  %v1290_v53 = vmul.f32 %v8917_v29, %v465_v52  ;;  %v9267_v20 = vld [vmem:[%s10417_s1 + $0x1] ss:$0 sm:$0xff] }
 0x110   : > { %v638_v13 = vsel %vm608_vm0, %v636_v17, %v637_v10  ;;  %v928_v60 = vadd.f32 %v900_v23, %v856_v16  ;;  %v1186_v47 = vrot.slane %v1122_v6, 2  ;;  %v1321_v44 = vadd.f32 %v1293_v43, %v1249_v2 }
 0x111   : > { %v1318_v5 = vadd.f32 %v1290_v53, %v1246_v36  ;;  %v1415_v61 = vrot.slane %v1352_v37, 1  ;;  %v903_v34 = vmul.f32 %v8883_v56, %v480_v25  ;;  %v965_v15 = vmul.f32 %v8888_v57, %v480_v25  ;;  %v9274_v56 = vld [vmem:[%s10417_s1 + $0x2] ss:$0 sm:$0xff]  ;;  %v9285_v37 = vld [vmem:[%s10417_s1] ss:$0 sm:$0xff] }
 0x112   : > { %v640_v8 = vrot.slane %v573_v40, 1  ;;  %v1419_v35 = vrot.slane %v9253_v49, 1  ;;  %v9262_v39 = vmul.f32 %v8936_v45, %v480_v25  ;;  %v572_v10 = vmul.f32 %v9267_v20, %v475_v22 }
 0x113   : > { %v697_v16 = vadd.f32 %v638_v13, %v536_v32  ;;  %v1028_v24 = vsel %vm608_vm0, %v1026_v26, %v1027_v33  ;;  %v9277_v2 = vmul.f32 %v9274_v56, %v480_v25  ;;  %v931_v17 = vadd.f32 %v903_v34, %v859_v3 }
 0x114   : > { %v1088_v6 = vadd.f32 %v1028_v24, %v928_v60  ;;  %v9280_v36 = vmul.f32 %v8936_v45, %v465_v52  ;;  %v539_v33 = vmul.f32 %v9285_v37, %v480_v25  ;;  %v1481_v23 = vadd.f32 %v1419_v35, %v1321_v44  ;;  %v490_v24 = vpop.permute.xlu1 %489 }
 0x115   : > { %v1417_v40 = vsel %vm608_vm0, %v1415_v61, %v10427_v38  ;;  %v1030_v43 = vrot.slane %v965_v15, 1  ;;  %v9292_v49 = vmul.f32 %v8900_v0, %v480_v25  ;;  %v964_v3 = vmul.f32 %v8888_v57, %v475_v22 }
 0x116   : > { %v700_v52 = vadd.f32 %v640_v8, %v539_v33  ;;  %v1579_v32 = vrot.slane %v9262_v39, 2  ;;  %v799_v26 = vsel %vm769_vm1, %v797_v18, %v798_v62  ;;  %v639_v53 = vrot.slane %v572_v10, 1  ;;  %v9310_v10 = vld [vmem:[%s10417_s1 + $0x3] ss:$0 sm:$0xff]  ;;  %v9470_v39 = vld [vmem:[%s10419_s3 + $0x8] sm:$0xff] }
 0x117   : > { %v801_v13 = vrot.slane %v9277_v2, 2  ;;  %v1091_v60 = vadd.f32 %v1030_v43, %v931_v17  ;;  %v858_v44 = vadd.f32 %v799_v26, %v697_v16  ;;  %v1188_v34 = vsel %vm769_vm1, %v1186_v47, %v1187_v4 }
 0x118   : > { %v1641_v61 = vadd.f32 %v1579_v32, %v1481_v23  ;;  %v733_v25 = vmul.f32 %v9274_v56, %v475_v22  ;;  %v9303_v57 = vmul.f32 %v8900_v0, %v475_v22  ;;  %v1354_v15 = vmul.f32 %v8922_v30, %v475_v22 }
 0x119   : > { %v1190_v62 = vrot.slane %v9292_v49, 2  ;;  %v1248_v18 = vadd.f32 %v1188_v34, %v1088_v6  ;;  %v902_v4 = vmul.f32 %v9310_v10, %v475_v22  ;;  %v1029_v47 = vrot.slane %v964_v3, 1 }
 0x11a   : > { %v9313_v16 = vadd.f32 %v1417_v40, %v1318_v5  ;;  %v861_v17 = vadd.f32 %v801_v13, %v700_v52  ;;  %v641_v0 = vsel %vm608_vm0, %v639_v53, %v640_v8  ;;  %v575_v33 = vmul.f32 %v9267_v20, %v490_v24  ;;  %v9327_v52 = vpop.permute.xlu0 %484 }
 0x11b   : > { %v1251_v6 = vadd.f32 %v1190_v62, %v1091_v60  ;;  %v538_v23 = vmul.f32 %v9285_v37, %v475_v22  ;;  %v930_v26 = vadd.f32 %v902_v4, %v858_v44  ;;  %v1292_v34 = vmul.f32 %v8917_v29, %v475_v22 }
 0x11c   : > { %v9324_v28 = vadd.f32 %v8978_v54, %v1641_v61  ;;  %v800_v5 = vrot.slane %v733_v25, 2  ;;  %v1189_v40 = vrot.slane %v9303_v57, 2  ;;  %v1418_v3 = vrot.slane %v1354_v15, 1  ;;  %v9340_v61 = vld [vmem:[%s10417_s1 + $0x4] ss:$0 sm:$0xff] }
 0x11d   : > { %v699_v8 = vadd.f32 %v641_v0, %v538_v23  ;;  %v1031_v53 = vsel %vm608_vm0, %v1029_v47, %v1030_v43  ;;  %v1320_v50 = vadd.f32 %v1292_v34, %v1248_v18  ;;  %v9331_v60 = vmul.f32 %v8936_v45, %v475_v22 }
 0x11e   : > { %v643_v31 = vrot.slane %v575_v33, 1  ;;  %v9334_v44 = vmul.f32 %v9274_v56, %v490_v24  ;;  %v905_v29 = vmul.f32 %v9310_v10, %v490_v24  ;;  %v9343_v25 = vmul.f32 %v9340_v61, %v490_v24  ;;  %v9362_v33 = vld [vmem:[%s10417_s1 + $0x6] ss:$0 sm:$0xff] }
 0x11f   : > { %v1090_v57 = vadd.f32 %v1031_v53, %v930_v26  ;;  %v541_v43 = vmul.f32 %v9285_v37, %v490_v24  ;;  %v574_v45 = vmul.f32 %v9267_v20, %v9327_v52  ;;  %v1420_v22 = vsel %vm608_vm0, %v1418_v3, %v1419_v35  ;;  %v9376_v26 = vld [vmem:[%s10417_s1 + $0x5] ss:$0 sm:$0xff] }
 0x120   : > { %v933_v15 = vadd.f32 %v905_v29, %v861_v17  ;;  %v9350_v18 = vmul.f32 %v8922_v30, %v490_v24  ;;  %v1659_v4 = vadd.f32 %v8978_v54, %v8958_v21  ;;  %v9356_v47 = vadd.f32 %v1420_v22, %v1320_v50 }
 0x121   : > { %v1578_v0 = vrot.slane %v9331_v60, 2  ;;  %v1295_v35 = vmul.f32 %v9362_v33, %v490_v24  ;;  %v1661_v30 = vadd.f32 %v8978_v54, %v8993_v19  ;;  %v702_v17 = vadd.f32 %v643_v31, %v541_v43 }
 0x122   : > { %v804_v21 = vrot.slane %v9334_v44, 2  ;;  %v10429_v50 = vrot.slane %v9343_v25, 1  ;;  %v1686_v23 = vmax.f32 %v8986_v7, %v9016_v12  ;;  %v9379_v34 = vmul.f32 %v9376_v26, %v490_v24  ;;  %v9389_v7 = vld [vmem:[%s10417_s1 + $0x8] ss:$0 sm:$0xff] }
 0x123   : > { %v1323_v54 = vadd.f32 %v1295_v35, %v1251_v6  ;;  %v642_v19 = vrot.slane %v574_v45, 1  ;;  %v1687_v3 = vmax.f32 %v1659_v4, %v1661_v30  ;;  %v1422_v44 = vrot.slane %v9350_v18, 1  ;;  %v9402_v45 = vld [vmem:[%s10417_s1 + $0x7] ss:$0 sm:$0xff] }
 0x124   : > { %v9383_v53 = vadd.f32 %v10429_v50, %v933_v15  ;;  %v9392_v12 = vmul.f32 %v9389_v7, %v490_v24  ;;  %v1707_v29 = vrot.slane %v1686_v23, 1  ;;  %v802_v6 = vsel %vm769_vm1, %v800_v5, %v801_v13 }
 0x125   : > { %v735_v43 = vmul.f32 %v9274_v56, %v9327_v52  ;;  %v1356_v22 = vmul.f32 %v9402_v45, %v9327_v52  ;;  %v1735_v15 = vrot.slane %v1687_v3, 1  ;;  %v9406_v18 = vadd.f32 %v804_v21, %v702_v17 }
 0x126   : > { %v860_v24 = vadd.f32 %v802_v6, %v699_v8  ;;  %v1191_v2 = vsel %vm769_vm1, %v1189_v40, %v1190_v62  ;;  %v1721_v13 = vmax.f32 %v1686_v23, %v1707_v29  ;;  %v644_v4 = vsel %vm608_vm0, %v642_v19, %v643_v31  ;;  %v9417_v31 = vpop.permute.xlu1 %499 }
 0x127   : > { %v1250_v5 = vadd.f32 %v1191_v2, %v1090_v57  ;;  %v1749_v35 = vmax.f32 %v1687_v3, %v1735_v15  ;;  %v540_v30 = vmul.f32 %v9285_v37, %v9327_v52  ;;  %v803_v50 = vrot.slane %v735_v43, 2 }
 0x128   : > { %v1763_v38 = vrot.slane %v1721_v13, 1  ;;  %v1777_v51 = vrot.slane %v1721_v13, 2  ;;  %v1294_v8 = vmul.f32 %v9362_v33, %v9327_v52  ;;  %v1421_v17 = vrot.slane %v1356_v22, 1 }
 0x129   : > { %v701_v49 = vadd.f32 %v644_v4, %v540_v30  ;;  %v1791_v62 = vrot.slane %v1721_v13, 3  ;;  %v1516_v57 = vmul.f32 %v9389_v7, %v9327_v52  ;;  %v1812_v23 = vrot.slane %v1749_v35, 4 }
 0x12a   : > { %v1855_v40 = vsel %vm1854_vm3, %v1721_v13, %v1763_v38  ;;  %v1483_v3 = vadd.f32 %v1422_v44, %v1323_v54  ;;  %v1322_v29 = vadd.f32 %v1294_v8, %v1250_v5  ;;  %v1826_v6 = vrot.slane %v1749_v35, 5  ;;  %v9427_v13 = vpop.permute.xlu0 %494 }
 0x12b   : > { %v1863_v19 = vsel %vm1862_vm4, %v1855_v40, %v1777_v51  ;;  %v1840_v22 = vrot.slane %v1749_v35, 6  ;;  %v969_v38 = vmul.f32 %v9340_v61, %v9417_v31  ;;  %v805_v2 = vsel %vm769_vm1, %v803_v50, %v804_v21 }
 0x12c   : > { %v1871_v43 = vsel %vm1870_vm5, %v1863_v19, %v1791_v62  ;;  %v1582_v4 = vrot.slane %v9392_v12, 2  ;;  %v904_v51 = vmul.f32 %v9310_v10, %v9327_v52  ;;  %v862_v5 = vadd.f32 %v805_v2, %v701_v49 }
 0x12d   : > { %v1879_v15 = vsel %vm1878_vm6, %v1871_v43, %v1812_v23  ;;  %v966_v35 = vmul.f32 %v9340_v61, %v9327_v52  ;;  %v1423_v30 = vsel %vm608_vm0, %v1421_v17, %v1422_v44  ;;  %v1581_v8 = vrot.slane %v1516_v57, 2 }
 0x12e   : > { %v1887_v54 = vsel %vm1886_vm7, %v1879_v15, %v1826_v6  ;;  %v1482_v40 = vadd.f32 %v1423_v30, %v1322_v29  ;;  %v906_v50 = vmul.f32 %v9310_v10, %v9427_v13  ;;  %v1036_v12 = vrot.slane %v969_v38, 1  ;;  %v9465_v30 = vpop.permute.xlu1 %509 }
 0x12f   : > { %v1894_v62 = vsel %vm769_vm1, %v1887_v54, %v1840_v22  ;;  %v9443_v23 = vmul.f32 %v9376_v26, %v9417_v31  ;;  %v968_v49 = vmul.f32 %v9340_v61, %v9427_v13  ;;  %v1128_v44 = vmul.f32 %v9376_v26, %v9427_v13 }
 0x130   : > { %v9437_v21 = vmax.f32 %v1894_v62, 0.0  ;;  %v1643_v17 = vadd.f32 %v1582_v4, %v1483_v3  ;;  %v1126_v57 = vmul.f32 %v9376_v26, %v9327_v52  ;;  %v934_v29 = vadd.f32 %v906_v50, %v862_v5 }
 0x131   : > { %v1032_v6 = vrot.slane %v966_v35, 1  ;;  %v1583_v43 = vsel %vm769_vm1, %v1581_v8, %v1582_v4  ;;  %v907_v22 = vmul.f32 %v9310_v10, %v9417_v31  ;;  %v1035_v15 = vrot.slane %v968_v49, 1 }
 0x132   : > { %10436 = vst [vmem:[#allocation5_spill] sm:$0xff] %v9437_v21  ;;  %v1919_v19 = vrot.slane %v9437_v21, 1  ;;  %v1580_v38 = vsel %vm769_vm1, %v1578_v0, %v1579_v32  ;;  %v1193_v3 = vrot.slane %v9379_v34, 2  ;;  %v932_v2 = vadd.f32 %v904_v51, %v860_v24  ;;  %v9484_v24 = vld [vmem:[%s10418_s2] ss:$0 sm:$0xff] }
 0x133   : > { %v1642_v52 = vadd.f32 %v1583_v43, %v1482_v40  ;;  %v935_v54 = vadd.f32 %v907_v22, %v9406_v18  ;;  %v1196_v4 = vrot.slane %v9443_v23, 2  ;;  %v1037_v5 = vsel %vm608_vm0, %v1035_v15, %v1036_v12  ;;  %v9476_v18 = vpop.permute.xlu0 %504 }
 0x134   : > { %8175 = vmatmul.mubr.msk.f32.vlgmr.msra.gmra.mrb[0].mxu1 %vm1920_vm8, %v1919_v19  ;;  %v1195_v35 = vrot.slane %v1128_v44, 2  ;;  %v1640_v60 = vadd.f32 %v1580_v38, %v9356_v47  ;;  %v1253_v0 = vadd.f32 %v1193_v3, %v9383_v53  ;;  %v1094_v34 = vadd.f32 %v1037_v5, %v934_v29 }
 0x135   : > { %8178 = vmatpush3.msra.mxu1 %v9470_v39  ;;  %8179 = vmatprep.mubr.msk.f32.mxu1 %vm8716_vm2, %v10430_v42  ;;  %v1677_v51 = vadd.f32 %v9484_v24, %v1643_v17  ;;  %v10437_v8 = vrot.slane %v9343_v25, 1  ;;  %v1192_v53 = vrot.slane %v1126_v57, 2  ;;  %v9492_v62 = vmul.f32 %v9402_v45, %v9417_v31 }
 0x136   : > { %8182 = vmatprep.subr.mxu1 %v10430_v42  ;;  %v1676_v50 = vadd.f32 %v9484_v24, %v1642_v52  ;;  %v9497_v23 = vmul.f32 %v9402_v45, %v9465_v30  ;;  %v1736_v49 = vrot.slane %v9075_v11, 1  ;;  %v1095_v44 = vadd.f32 %v1036_v12, %v935_v54 }
 0x137   : > { %v1034_v47 = vsel %vm608_vm0, %v1032_v6, %v10437_v8  ;;  %v1297_v25 = vmul.f32 %v9362_v33, %v9417_v31  ;;  %v1197_v17 = vsel %vm769_vm1, %v1195_v35, %v1196_v4  ;;  %v1360_v57 = vmul.f32 %v9402_v45, %v9476_v18 }
 0x138   : > { %v1092_v40 = vadd.f32 %v1034_v47, %v932_v2  ;;  %v1254_v19 = vadd.f32 %v1197_v17, %v1094_v34  ;;  %v1750_v29 = vmax.f32 %v9075_v11, %v1736_v49  ;;  %v1764_v6 = vrot.slane %v9143_v59, 1 }
 0x139   : > { %v1778_v43 = vrot.slane %v9143_v59, 2  ;;  %v1425_v22 = vrot.slane %v9492_v62, 1  ;;  %v9511_v12 = vmul.f32 %v9389_v7, %v9417_v31  ;;  %v1194_v15 = vsel %vm769_vm1, %v1192_v53, %v1193_v3 }
 0x13a   : > { %v1358_v38 = vmul.f32 %v9402_v45, %v9427_v13  ;;  %v1252_v2 = vadd.f32 %v1194_v15, %v1092_v40  ;;  %v1428_v52 = vrot.slane %v9497_v23, 1  ;;  %v9519_v11 = vmul.f32 %v9389_v7, %v9465_v30 }
 0x13b   : > { %v1298_v54 = vmul.f32 %v9362_v33, %v9476_v18  ;;  %v1427_v5 = vrot.slane %v1360_v57, 1  ;;  %v1520_v35 = vmul.f32 %v9389_v7, %v9476_v18  ;;  %v1792_v34 = vrot.slane %v9143_v59, 3 }
 0x13c   : > { %v1856_v3 = vsel %vm1854_vm3, %v9143_v59, %v1764_v6  ;;  %v1296_v8 = vmul.f32 %v9362_v33, %v9427_v13  ;;  %v1813_v53 = vrot.slane %v1750_v29, 4  ;;  %v1424_v40 = vrot.slane %v1358_v38, 1 }
 0x13d   : > { %v1326_v47 = vadd.f32 %v1298_v54, %v1254_v19  ;;  %v1864_v62 = vsel %vm1862_vm4, %v1856_v3, %v1778_v43  ;;  %v1518_v23 = vmul.f32 %v9389_v7, %v9427_v13  ;;  %v1827_v49 = vrot.slane %v1750_v29, 5 }
 0x13e   : > { %v1872_v17 = vsel %vm1870_vm5, %v1864_v62, %v1792_v34  ;;  %v1255_v57 = vadd.f32 %v1196_v4, %v1095_v44  ;;  %v1324_v15 = vadd.f32 %v1296_v8, %v1252_v2  ;;  %v1841_v42 = vrot.slane %v1750_v29, 6 }
 0x13f   : > { %v1880_v32 = vsel %vm1878_vm6, %v1872_v17, %v1813_v53  ;;  %v1588_v59 = vrot.slane %v9519_v11, 2  ;;  %v1429_v6 = vsel %vm608_vm0, %v1427_v5, %v1428_v52  ;;  %v1587_v19 = vrot.slane %v1520_v35, 2 }
 0x140   : > { %v1888_v54 = vsel %vm1886_vm7, %v1880_v32, %v1827_v49  ;;  %v1325_v43 = vadd.f32 %v1297_v25, %v1253_v0  ;;  %v1585_v38 = vrot.slane %v9511_v12, 2  ;;  %v1486_v3 = vadd.f32 %v1429_v6, %v1326_v47 }
 0x141   : > { %v1895_v21 = vsel %vm769_vm1, %v1888_v54, %v1841_v42  ;;  %v1426_v34 = vsel %vm608_vm0, %v1424_v40, %v1425_v22  ;;  %v1584_v4 = vrot.slane %v1518_v23, 2  ;;  %v1299_v44 = vmul.f32 %v9362_v33, %v9465_v30 }
 0x142   : > { %v9543_v29 = vmax.f32 %v1895_v21, 0.0  ;;  %v1674_v2 = vadd.f32 %v9484_v24, %v1640_v60  ;;  %v577_v11 = vmul.f32 %v9267_v20, %v9417_v31  ;;  %v576_v32 = vmul.f32 %v9267_v20, %v9427_v13 }
 0x143   : > { %v1484_v0 = vadd.f32 %v1426_v34, %v1324_v15  ;;  %v1695_v25 = vmax.f32 %v9324_v28, %v1677_v51  ;;  %v1327_v42 = vadd.f32 %v1299_v44, %v1255_v57  ;;  %v1589_v12 = vsel %vm769_vm1, %v1587_v19, %v1588_v59 }
 0x144   : > { %v1994_v5 = vrot.slane %v9543_v29, 1  ;;  %v10438_v21 = vrot.slane %v9176_v41, 1  ;;  %v1636_v60 = vadd.f32 %v9236_v55, %v9224_v46  ;;  %v1694_v8 = vmax.f32 %v1674_v2, %v1676_v50 }
 0x145   : > { %v1646_v47 = vadd.f32 %v1589_v12, %v1486_v3  ;;  %v10439_v53 = vrot.slane %v9228_v9, 1  ;;  %v10440_v28 = vrot.slane %v9231_v1, 2  ;;  %v10441_v51 = vrot.slane %v9280_v36, 2 }
 0x146   : > { %v1477_v35 = vadd.f32 %v10438_v21, %v9184_v58  ;;  %v1485_v23 = vadd.f32 %v1425_v22, %v1325_v43  ;;  %v1586_v49 = vsel %vm769_vm1, %v1584_v4, %v1585_v38  ;;  %8180 = vmatmul.mubr.msk.f32.vlgmr.msra.gmra.mrb[2].mxu1 %vm1920_vm8, %v1994_v5  ;;  %v646_v58 = vrot.slane %v577_v11, 1 }
 0x147   : > { %v1479_v62 = vadd.f32 %v10439_v53, %v9239_v14  ;;  %v1577_v40 = vsel %vm769_vm1, %v10441_v51, %v10440_v28  ;;  %v645_v46 = vrot.slane %v576_v32, 1  ;;  %v1644_v55 = vadd.f32 %v1586_v49, %v1484_v0  ;;  %8183 = vmatpush3.msra.mxu1 %v9470_v39 }
 0x148   : > { %v1638_v41 = vadd.f32 %v1577_v40, %v9313_v16  ;;  %v10442_v9 = vmov 0.0   ;;  %v10443_v14 = vrot.slane %v9166_v27, 1  ;;  %v10444_v50 = vrot.slane %v9189_v63, 1 }
 0x149   : > { %8184 = vmatprep.mubr.msk.f32.mxu1 %vm8716_vm2, %v10442_v9  ;;  %v1739_v17 = vrot.slane %v1695_v25, 1  ;;  %v1487_v16 = vadd.f32 %v1428_v52, %v1327_v42  ;;  %8187 = vmatprep.subr.mxu1 %v10442_v9  ;;  %v1711_v57 = vrot.slane %v1694_v8, 1  ;;  %v737_v15 = vmul.f32 %v9274_v56, %v9427_v13 }
 0x14a   : > { %v9577_v36 = vmax.f32 %v9166_v27, %v10443_v14  ;;  %v9582_v22 = vmax.f32 %v9189_v63, %v10444_v50  ;;  %v1680_v6 = vadd.f32 %v9484_v24, %v1646_v47  ;;  %v738_v19 = vmul.f32 %v9274_v56, %v9417_v31 }
 0x14b   : > { %v10445_v27 = vrot.slane %v9179_v48, 2  ;;  %v9595_v63 = vadd.f32 %v9484_v24, %v1636_v60  ;;  %v10446_v52 = vmov %v10440_v28  ;;  %v1645_v3 = vadd.f32 %v1585_v38, %v1485_v23  ;;  %v9621_v60 = vpop.permute.xlu1 %875  ;;  %v9639_v28 = vpop.permute.xlu0 %870 }
 0x14c   : > { %v1639_v43 = vadd.f32 %v10446_v52, %v1479_v62  ;;  %v1672_v34 = vadd.f32 %v9484_v24, %v1638_v41  ;;  %v1678_v4 = vadd.f32 %v9484_v24, %v1644_v55  ;;  %v647_v44 = vsel %vm608_vm0, %v645_v46, %v646_v58 }
 0x14d   : > { %v9592_v54 = vadd.f32 %v10445_v27, %v1477_v35  ;;  %v9604_v2 = vmul.f32 %v9267_v20, %v9465_v30  ;;  %v9606_v48 = vmax.f32 %v1695_v25, %v1739_v17  ;;  %v543_v11 = vmul.f32 %v9285_v37, %v9417_v31 }
 0x14e   : > { %v542_v1 = vmul.f32 %v9285_v37, %v9427_v13  ;;  %v1647_v32 = vadd.f32 %v1588_v59, %v1487_v16  ;;  %v9612_v38 = vmax.f32 %v1694_v8, %v1711_v57  ;;  %v806_v0 = vrot.slane %v737_v15, 2 }
 0x14f   : > { %v1696_v42 = vmax.f32 %v1678_v4, %v1680_v6  ;;  %v807_v12 = vrot.slane %v738_v19, 2  ;;  %v9615_v21 = vadd.f32 %v9484_v24, %v1645_v3  ;;  %v704_v35 = vadd.f32 %v646_v58, %v543_v11 }
 0x150   : > { %v9619_v25 = vmul.f32 %v9340_v61, %v9465_v30  ;;  %v703_v31 = vadd.f32 %v647_v44, %v542_v1  ;;  %v9625_v13 = vmul.f32 %v9376_v26, %v9465_v30  ;;  %v970_v59 = vmul.f32 %v9340_v61, %v9476_v18 }
 0x151   : > { %v649_v8 = vrot.slane %v9604_v2, 1  ;;  %v578_v47 = vmul.f32 %v9267_v20, %v9476_v18  ;;  %v9633_v53 = vadd.f32 %v9484_v24, %v1647_v32  ;;  %v9637_v62 = vmul.f32 %v9310_v10, %v9465_v30 }
 0x152   : > { %v9643_v51 = vmul.f32 %v9274_v56, %v9465_v30  ;;  %v739_v40 = vmul.f32 %v9274_v56, %v9476_v18  ;;  %v1712_v23 = vrot.slane %v1696_v42, 1  ;;  %v9649_v20 = vmul.f32 %v9402_v45, %v9621_v60 }
 0x153   : > { %v808_v49 = vsel %vm769_vm1, %v806_v0, %v807_v12  ;;  %v648_v41 = vrot.slane %v578_v47, 1  ;;  %v9652_v58 = vadd.f32 %v807_v12, %v704_v35  ;;  %v1039_v46 = vrot.slane %v9619_v25, 1 }
 0x154   : > { %v864_v55 = vadd.f32 %v808_v49, %v703_v31  ;;  %v1130_v14 = vmul.f32 %v9376_v26, %v9476_v18  ;;  %v1199_v50 = vrot.slane %v9625_v13, 2  ;;  %v1038_v17 = vrot.slane %v970_v59, 1  ;;  %v9866_v13 = vld [vmem:[%s10419_s3 + $0x18] sm:$0xff] }
 0x155   : > { %v972_v56 = vmul.f32 %v9340_v61, %v9639_v28  ;;  %v650_v16 = vsel %vm608_vm0, %v648_v41, %v649_v8  ;;  %v908_v57 = vmul.f32 %v9310_v10, %v9476_v18  ;;  %v810_v15 = vrot.slane %v9643_v51, 2 }
 0x156   : > { %v544_v6 = vmul.f32 %v9285_v37, %v9476_v18  ;;  %v809_v19 = vrot.slane %v739_v40, 2  ;;  %v9666_v27 = vmax.f32 %v1696_v42, %v1712_v23  ;;  %v1431_v52 = vrot.slane %v9649_v20, 1 }
 0x157   : > { %v1765_v3 = vrot.slane %v9582_v22, 1  ;;  %v1779_v4 = vrot.slane %v9582_v22, 2  ;;  %v936_v44 = vadd.f32 %v908_v57, %v864_v55  ;;  %v1198_v2 = vrot.slane %v1130_v14, 2 }
 0x158   : > { %v9673_v11 = vmul.f32 %v9402_v45, %v9639_v28  ;;  %v705_v1 = vadd.f32 %v650_v16, %v544_v6  ;;  %v1040_v18 = vsel %vm608_vm0, %v1038_v17, %v1039_v46  ;;  %v1041_v32 = vrot.slane %v972_v56, 1 }
 0x159   : > { %v545_v0 = vmul.f32 %v9285_v37, %v9465_v30  ;;  %v9682_v42 = vmul.f32 %v9340_v61, %v9621_v60  ;;  %v811_v12 = vsel %vm769_vm1, %v809_v19, %v810_v15  ;;  %v1793_v35 = vrot.slane %v9582_v22, 3  ;;  %v9712_v19 = vpop.permute.xlu1 %1267 }
 0x15a   : > { %v1814_v31 = vrot.slane %v9577_v36, 4  ;;  %v1857_v59 = vsel %vm1854_vm3, %v9582_v22, %v1765_v3  ;;  %v1671_v51 = vadd.f32 %v9484_v24, %v9592_v54  ;;  %v1673_v37 = vadd.f32 %v9484_v24, %v1639_v43 }
 0x15b   : > { %v1865_v47 = vsel %vm1862_vm4, %v1857_v59, %v1779_v4  ;;  %v1692_v30 = vmax.f32 %v9595_v63, %v1672_v34  ;;  %v1096_v61 = vadd.f32 %v1040_v18, %v936_v44  ;;  %v866_v40 = vadd.f32 %v811_v12, %v705_v1 }
 0x15c   : > { %v1828_v23 = vrot.slane %v9577_v36, 5  ;;  %v1873_v49 = vsel %vm1870_vm5, %v1865_v47, %v1793_v35  ;;  %v1842_v41 = vrot.slane %v9577_v36, 6  ;;  %v1693_v22 = vmax.f32 %v1671_v51, %v1673_v37 }
 0x15d   : > { %v1881_v55 = vsel %vm1878_vm6, %v1873_v49, %v1814_v31  ;;  %v1710_v14 = vrot.slane %v1692_v30, 1  ;;  %v9700_v17 = vmul.f32 %v9376_v26, %v9621_v60  ;;  %v910_v54 = vmul.f32 %v9310_v10, %v9639_v28 }
 0x15e   : > { %v1132_v63 = vmul.f32 %v9376_v26, %v9639_v28  ;;  %v1889_v43 = vsel %vm1886_vm7, %v1881_v55, %v1828_v23  ;;  %v1042_v34 = vrot.slane %v9682_v42, 1  ;;  %v1738_v16 = vrot.slane %v1693_v22, 1 }
 0x15f   : > { %v1896_v36 = vsel %vm769_vm1, %v1889_v43, %v1842_v41  ;;  %v1724_v56 = vmax.f32 %v1692_v30, %v1710_v14  ;;  %v1200_v57 = vsel %vm769_vm1, %v1198_v2, %v1199_v50  ;;  %v706_v6 = vadd.f32 %v649_v8, %v545_v0  ;;  %v1263_v0 = vpop.permute.xlu0 %1262 }
 0x160   : > { %v938_v3 = vadd.f32 %v910_v54, %v866_v40  ;;  %v9714_v4 = vmax.f32 %v1896_v36, 0.0  ;;  %v1752_v44 = vmax.f32 %v1693_v22, %v1738_v16  ;;  %v1767_v18 = vrot.slane %v9612_v38, 1 }
 0x161   : > { %v1766_v26 = vrot.slane %v1724_v56, 1  ;;  %v1780_v1 = vrot.slane %v1724_v56, 2  ;;  %v1202_v12 = vrot.slane %v9700_v17, 2  ;;  %v1201_v35 = vrot.slane %v1132_v63, 2 }
 0x162   : > { %v9719_v31 = vrot.slane %v9714_v4, 1  ;;  %v1781_v59 = vrot.slane %v9612_v38, 2  ;;  %v9724_v8 = vmul.f32 %v9402_v45, %v9712_v19  ;;  %v1043_v2 = vsel %vm608_vm0, %v1041_v32, %v1042_v34 }
 0x163   : > { %v1794_v47 = vrot.slane %v1724_v56, 3  ;;  %v1858_v51 = vsel %vm1854_vm3, %v1724_v56, %v1766_v26  ;;  %v867_v37 = vadd.f32 %v810_v15, %v706_v6  ;;  %v1098_v30 = vadd.f32 %v1043_v2, %v938_v3 }
 0x164   : > { %8185 = vmatmul.mubr.msk.f32.vlgmr.msra.gmra.mrb[4].mxu1 %vm1920_vm8, %v9719_v31  ;;  %v1815_v40 = vrot.slane %v1752_v44, 4  ;;  %v1866_v23 = vsel %vm1862_vm4, %v1858_v51, %v1780_v1  ;;  %v1829_v49 = vrot.slane %v1752_v44, 5  ;;  %v1795_v32 = vrot.slane %v9612_v38, 3 }
 0x165   : > { %v1874_v41 = vsel %vm1870_vm5, %v1866_v23, %v1794_v47  ;;  %8188 = vmatpush3.msra.mxu1 %v9470_v39  ;;  %8189 = vmatprep.mubr.msk.f32.mxu1 %vm8716_vm2, %v10442_v9  ;;  %v1859_v15 = vsel %vm1854_vm3, %v9612_v38, %v1767_v18  ;;  %v1203_v55 = vsel %vm769_vm1, %v1201_v35, %v1202_v12  ;;  %v1843_v63 = vrot.slane %v1752_v44, 6 }
 0x166   : > { %v1364_v22 = vmul.f32 %v9402_v45, %v1263_v0  ;;  %v1882_v14 = vsel %vm1878_vm6, %v1874_v41, %v1815_v40  ;;  %8192 = vmatprep.subr.mxu1 %v10442_v9  ;;  %v1867_v54 = vsel %vm1862_vm4, %v1859_v15, %v1781_v59  ;;  %v1816_v36 = vrot.slane %v9606_v48, 4 }
 0x167   : > { %v1890_v43 = vsel %vm1886_vm7, %v1882_v14, %v1829_v49  ;;  %v1875_v56 = vsel %vm1870_vm5, %v1867_v54, %v1795_v32  ;;  %v1256_v38 = vadd.f32 %v1200_v57, %v1096_v61  ;;  %v911_v16 = vmul.f32 %v9310_v10, %v9621_v60  ;;  %v9767_v10 = vld [vmem:[%s10419_s3 + $0x10] sm:$0xff] }
 0x168   : > { %v1258_v6 = vadd.f32 %v1203_v55, %v1098_v30  ;;  %v1830_v45 = vrot.slane %v9606_v48, 5  ;;  %v1434_v3 = vrot.slane %v9724_v8, 1  ;;  %v1897_v26 = vsel %vm769_vm1, %v1890_v43, %v1843_v63  ;;  %v8649_v43 = vld [vmem:[%s10419_s3] sm:$0xff] }
 0x169   : > { %v1844_v1 = vrot.slane %v9606_v48, 6  ;;  %v1883_v44 = vsel %vm1878_vm6, %v1875_v56, %v1816_v36  ;;  %v9759_v18 = vmul.f32 %v9389_v7, %v9712_v19  ;;  %v1302_v61 = vmul.f32 %v9362_v33, %v1263_v0 }
 0x16a   : > { %v9762_v57 = vmax.f32 %v1897_v26, 0.0  ;;  %v1891_v35 = vsel %vm1886_vm7, %v1883_v44, %v1830_v45  ;;  %v939_v59 = vadd.f32 %v911_v16, %v867_v37  ;;  %v1433_v2 = vrot.slane %v1364_v22, 1 }
 0x16b   : > { %v1524_v48 = vmul.f32 %v9389_v7, %v1263_v0  ;;  %v1898_v47 = vsel %vm769_vm1, %v1891_v35, %v1844_v1  ;;  %v1300_v51 = vmul.f32 %v9362_v33, %v9639_v28  ;;  %v1330_v30 = vadd.f32 %v1302_v61, %v1258_v6 }
 0x16c   : > { %8215 = vmatmul.mubr.msk.f32.vlgmr.msra.gmra.mrb[0].mxu0 %vm1920_vm8, %v9762_v57  ;;  %v9777_v40 = vrot.slane %v9762_v57, 1  ;;  %v9779_v23 = vmax.f32 %v1898_v47, 0.0  ;;  %v937_v37 = vadd.f32 %v9637_v62, %v9652_v58  ;;  %v9785_v0 = vmul.f32 %v9389_v7, %v9621_v60  ;;  %v10447_v62 = vld [vmem:[#allocation5_spill] sm:$0xff] }
 0x16d   : > { %v1430_v49 = vrot.slane %v9673_v11, 1  ;;  %v1522_v41 = vmul.f32 %v9389_v7, %v9639_v28  ;;  %8223 = vmatpush3.msra.mxu0 %v9767_v10  ;;  %8224 = vmatprep.mubr.msk.f32.mxu0 %vm8716_vm2, %v10442_v9  ;;  %v1697_v32 = vmax.f32 %v9615_v21, %v9633_v53  ;;  %v1328_v15 = vadd.f32 %v1300_v51, %v1256_v38 }
 0x16e   : > { %8190 = vmatmul.mubr.msk.f32.vlgmr.msra.gmra.mrb[6].mxu1 %vm1920_vm8, %v9777_v40  ;;  %v2649_v58 = vrot.slane %v10447_v62, 2  ;;  %8232 = vmatprep.subr.mxu0 %v10442_v9  ;;  %v9800_v11 = vrot.slane %v9779_v23, 1  ;;  %v1099_v7 = vadd.f32 %v1042_v34, %v939_v59  ;;  %v1594_v28 = vrot.slane %v9759_v18, 2 }
 0x16f   : > { %v1435_v21 = vsel %vm608_vm0, %v1433_v2, %v1434_v3  ;;  %v1593_v53 = vrot.slane %v1524_v48, 2  ;;  %8193 = vmatpush3.msra.mxu1 %v9470_v39  ;;  %8194 = vmatprep.mubr.msk.f32.mxu1 %vm8716_vm2, %v10442_v9  ;;  %v1768_v42 = vrot.slane %v9666_v27, 1  ;;  %v1097_v34 = vadd.f32 %v1039_v46, %v937_v37 }
 0x170   : > { %v1490_v55 = vadd.f32 %v1435_v21, %v1330_v30  ;;  %8225 = vmatmul.mubr.msk.f32.vlgmr.msra.gmra.mrb[2].mxu0 %vm1920_vm8, %v2649_v58  ;;  %8197 = vmatprep.subr.mxu1 %v10442_v9  ;;  %v1591_v22 = vrot.slane %v9785_v0, 2  ;;  %v1432_v14 = vsel %vm608_vm0, %v1430_v49, %v1431_v52  ;;  %v1590_v39 = vrot.slane %v1522_v41, 2 }
 0x171   : > { %8233 = vmatpush3.msra.mxu0 %v9767_v10  ;;  %8234 = vmatprep.mubr.msk.f32.mxu0 %vm8716_vm2, %v10442_v9  ;;  %v1488_v54 = vadd.f32 %v1432_v14, %v1328_v15  ;;  %v9824_v63 = vrot.slane %v9714_v4, 2  ;;  %v1259_v25 = vadd.f32 %v1202_v12, %v1099_v7  ;;  %v1595_v46 = vsel %vm769_vm1, %v1593_v53, %v1594_v28 }
 0x172   : > { %8195 = vmatmul.mubr.msk.f32.vlgmr.msra.gmra.mrb[8].mxu1 %vm1920_vm8, %v9800_v11  ;;  %8242 = vmatprep.subr.mxu0 %v10442_v9  ;;  %v1740_v36 = vrot.slane %v1697_v32, 1  ;;  %v1782_v56 = vrot.slane %v9666_v27, 2  ;;  %v1650_v38 = vadd.f32 %v1595_v46, %v1490_v55  ;;  %v1860_v17 = vsel %vm1854_vm3, %v9666_v27, %v1768_v42 }
 0x173   : > { %8198 = vmatpush3.msra.mxu1 %v8649_v43  ;;  %8199 = vmatprep.mubr.msk.f32.mxu1 %vm8716_vm2, %v10442_v9  ;;  %v1257_v12 = vadd.f32 %v1199_v50, %v1097_v34  ;;  %v1303_v16 = vmul.f32 %v9362_v33, %v9712_v19  ;;  %v1592_v6 = vsel %vm769_vm1, %v1590_v39, %v1591_v22  ;;  %v9858_v1 = vrot.slane %v9779_v23, 2 }
 0x174   : > { %8235 = vmatmul.mubr.msk.f32.vlgmr.msra.gmra.mrb[4].mxu0 %vm1920_vm8, %v9824_v63  ;;  %8202 = vmatprep.subr.mxu1 %v10442_v9  ;;  %v1301_v45 = vmul.f32 %v9362_v33, %v9621_v60  ;;  %v1648_v26 = vadd.f32 %v1592_v6, %v1488_v54  ;;  %v1754_v33 = vmax.f32 %v1697_v32, %v1740_v36  ;;  %v1796_v44 = vrot.slane %v9666_v27, 3 }
 0x175   : > { %8243 = vmatpush3.msra.mxu0 %v9767_v10  ;;  %8244 = vmatprep.mubr.msk.f32.mxu0 %vm8716_vm2, %v10442_v9  ;;  %v1331_v50 = vadd.f32 %v1303_v16, %v1259_v25  ;;  %v1868_v60 = vsel %vm1862_vm4, %v1860_v17, %v1782_v56  ;;  %v1684_v19 = vadd.f32 %v9484_v24, %v1650_v38  ;;  %v2722_v32 = vrot.slane %v9543_v29, 2  ;;  %v1915_v56 = vld [vmem:[%s10419_s3 + $0x38] sm:$0xff] }
 0x176   : > { %8200 = vmatmul.mubr.msk.f32.vlgmr.msra.gmra.mrb[10].mxu1 %vm1920_vm8, %v10447_v62  ;;  %8252 = vmatprep.subr.mxu0 %v10442_v9  ;;  %v1329_v61 = vadd.f32 %v1301_v45, %v1257_v12  ;;  %v1682_v35 = vadd.f32 %v9484_v24, %v1648_v26  ;;  %v1876_v59 = vsel %vm1870_vm5, %v1868_v60, %v1796_v44  ;;  %v1817_v27 = vrot.slane %v1754_v33, 4 }
 0x177   : > { %8203 = vmatpush3.msra.mxu1 %v8649_v43  ;;  %8204 = vmatprep.mubr.msk.f32.mxu1 %vm8716_vm2, %v10442_v9  ;;  %v1491_v2 = vadd.f32 %v1434_v3, %v1331_v50  ;;  %v9903_v3 = vld [vmem:[%s10419_s3 + $0x20] sm:$0xff]  ;;  %v1831_v51 = vrot.slane %v1754_v33, 5  ;;  %v1845_v18 = vrot.slane %v1754_v33, 6  ;;  %v9948_v58 = vrot.slane %v9762_v57, 2 }
 0x178   : > { %8245 = vmatmul.mubr.msk.f32.vlgmr.msra.gmra.mrb[6].mxu0 %vm1920_vm8, %v9858_v1  ;;  %8207 = vmatprep.subr.mxu1 %v10442_v9  ;;  %v1698_v48 = vmax.f32 %v1682_v35, %v1684_v19  ;;  %v1489_v47 = vadd.f32 %v1431_v52, %v1329_v61  ;;  %v1884_v8 = vsel %vm1878_vm6, %v1876_v59, %v1817_v27 }
 0x179   : > { %8253 = vmatpush3.msra.mxu0 %v9866_v13  ;;  %8254 = vmatprep.mubr.msk.f32.mxu0 %vm8716_vm2, %v10442_v9  ;;  %v1651_v20 = vadd.f32 %v1594_v28, %v1491_v2  ;;  %v1892_v30 = vsel %vm1886_vm7, %v1884_v8, %v1831_v51 }
 0x17a   : > { %8205 = vmatmul.mubr.msk.f32.vlgmr.msra.gmra.mrb[12].mxu1 %vm1920_vm8, %v9543_v29  ;;  %8262 = vmatprep.subr.mxu0 %v10442_v9  ;;  %v1713_v52 = vrot.slane %v1698_v48, 1  ;;  %v1649_v37 = vadd.f32 %v1591_v22, %v1489_v47  ;;  %v1899_v0 = vsel %vm769_vm1, %v1892_v30, %v1845_v18  ;;  %v9992_v22 = vld [vmem:[%s10419_s3 + $0x30] sm:$0xff] }
 0x17b   : > { %8208 = vmatpush3.msra.mxu1 %v8649_v43  ;;  %8209 = vmatprep.mubr.msk.f32.mxu1 %vm8716_vm2, %v10442_v9  ;;  %v1685_v49 = vadd.f32 %v9484_v24, %v1651_v20  ;;  %v9939_v62 = vmax.f32 %v1899_v0, 0.0 }
 0x17c   : > { %8255 = vmatmul.mubr.msk.f32.vlgmr.msra.gmra.mrb[8].mxu0 %vm1920_vm8, %v9714_v4  ;;  %8217 = vmatprep.subr.mxu1 %v10442_v9  ;;  %v1727_v41 = vmax.f32 %v1698_v48, %v1713_v52  ;;  %v1683_v15 = vadd.f32 %v9484_v24, %v1649_v37 }
 0x17d   : > { %8263 = vmatpush3.msra.mxu0 %v9866_v13  ;;  %8264 = vmatprep.mubr.msk.f32.mxu0 %vm8716_vm2, %v10442_v9  ;;  %v3657_v7 = vrot.slane %v9939_v62, 1 }
 0x17e   : > { %8210 = vmatmul.mubr.msk.f32.vlgmr.msra.gmra.mrb[14].mxu1 %vm1920_vm8, %v9714_v4  ;;  %8272 = vmatprep.subr.mxu0 %v10442_v9  ;;  %v1769_v24 = vrot.slane %v1727_v41, 1  ;;  %v1783_v21 = vrot.slane %v1727_v41, 2  ;;  %v1797_v34 = vrot.slane %v1727_v41, 3 }
 0x17f   : > { %8218 = vmatpush3.msra.mxu1 %v8649_v43  ;;  %8219 = vmatprep.mubr.msk.f32.mxu1 %vm8716_vm2, %v10442_v9 }
 0x180   : > { %8265 = vmatmul.mubr.msk.f32.vlgmr.msra.gmra.mrb[10].mxu0 %vm1920_vm8, %v9779_v23  ;;  %8227 = vmatprep.subr.mxu1 %v10442_v9  ;;  %v1861_v53 = vsel %vm1854_vm3, %v1727_v41, %v1769_v24 }
 0x181   : > { %8273 = vmatpush3.msra.mxu0 %v9903_v3  ;;  %8274 = vmatprep.mubr.msk.f32.mxu0 %vm8716_vm2, %v10442_v9  ;;  %v1869_v42 = vsel %vm1862_vm4, %v1861_v53, %v1783_v21 }
 0x182   : > { %8220 = vmatmul.mubr.msk.f32.vlgmr.msra.gmra.mrb[16].mxu1 %vm1920_vm8, %v9779_v23  ;;  %8282 = vmatprep.subr.mxu0 %v10442_v9  ;;  %v1877_v14 = vsel %vm1870_vm5, %v1869_v42, %v1797_v34 }
 0x183   : > { %8228 = vmatpush3.msra.mxu1 %v9767_v10  ;;  %8229 = vmatprep.mubr.msk.f32.mxu1 %vm8716_vm2, %v10442_v9 }
 0x184   : > { %8275 = vmatmul.mubr.msk.f32.vlgmr.msra.gmra.mrb[12].mxu0 %vm1920_vm8, %v1994_v5  ;;  %8237 = vmatprep.subr.mxu1 %v10442_v9  ;;  %v1699_v5 = vmax.f32 %v1683_v15, %v1685_v49 }
 0x185   : > { %8283 = vmatpush3.msra.mxu0 %v9903_v3  ;;  %8284 = vmatprep.mubr.msk.f32.mxu0 %vm8716_vm2, %v10442_v9 }
 0x186   : > { %8230 = vmatmul.mubr.msk.f32.vlgmr.msra.gmra.mrb[18].mxu1 %vm1920_vm8, %v2722_v32  ;;  %8292 = vmatprep.subr.mxu0 %v10442_v9  ;;  %v1741_v28 = vrot.slane %v1699_v5, 1 }
 0x187   : > { %8238 = vmatpush3.msra.mxu1 %v9767_v10  ;;  %8239 = vmatprep.mubr.msk.f32.mxu1 %vm8716_vm2, %v10442_v9  ;;  %v9960_v10 = vld [vmem:[%s10419_s3 + $0x28] sm:$0xff] }
 0x188   : > { %8285 = vmatmul.mubr.msk.f32.vlgmr.msra.gmra.mrb[14].mxu0 %vm1920_vm8, %v9777_v40  ;;  %8247 = vmatprep.subr.mxu1 %v10442_v9  ;;  %v1755_v55 = vmax.f32 %v1699_v5, %v1741_v28 }
 0x189   : > { %8293 = vmatpush3.msra.mxu0 %v9903_v3  ;;  %8294 = vmatprep.mubr.msk.f32.mxu0 %vm8716_vm2, %v10442_v9 }
 0x18a   : > { %8240 = vmatmul.mubr.msk.f32.vlgmr.msra.gmra.mrb[20].mxu1 %vm1920_vm8, %v9948_v58  ;;  %8302 = vmatprep.subr.mxu0 %v10442_v9  ;;  %v1818_v39 = vrot.slane %v1755_v55, 4  ;;  %v1832_v25 = vrot.slane %v1755_v55, 5  ;;  %v1846_v43 = vrot.slane %v1755_v55, 6 }
 0x18b   : > { %8248 = vmatpush3.msra.mxu1 %v9866_v13  ;;  %8249 = vmatprep.mubr.msk.f32.mxu1 %vm8716_vm2, %v10442_v9 }
 0x18c   : > { %8295 = vmatmul.mubr.msk.f32.vlgmr.msra.gmra.mrb[16].mxu0 %vm1920_vm8, %v3657_v7  ;;  %8257 = vmatprep.subr.mxu1 %v10442_v9  ;;  %v1885_v54 = vsel %vm1878_vm6, %v1877_v14, %v1818_v39 }
 0x18d   : > { %8303 = vmatpush3.msra.mxu0 %v9960_v10  ;;  %8304 = vmatprep.mubr.msk.f32.mxu0 %vm8716_vm2, %v10442_v9  ;;  %v1893_v46 = vsel %vm1886_vm7, %v1885_v54, %v1832_v25 }
 0x18e   : > { %8250 = vmatmul.mubr.msk.f32.vlgmr.msra.gmra.mrb[22].mxu1 %vm1920_vm8, %v9543_v29  ;;  %8312 = vmatprep.subr.mxu0 %v10442_v9  ;;  %v1900_v36 = vsel %vm769_vm1, %v1893_v46, %v1846_v43  ;;  %v1916_v29 = vld [vmem:[%s10419_s3 + $0x40] sm:$0xff] }
 0x18f   : > { %8258 = vmatpush3.msra.mxu1 %v9866_v13  ;;  %8259 = vmatprep.mubr.msk.f32.mxu1 %vm8716_vm2, %v10442_v9 }
 0x190   : > { %8305 = vmatmul.mubr.msk.f32.vlgmr.msra.gmra.mrb[18].mxu0 %vm1920_vm8, %v9824_v63  ;;  %8267 = vmatprep.subr.mxu1 %v10442_v9 }
 0x191   : > { %8313 = vmatpush3.msra.mxu0 %v9960_v10  ;;  %8314 = vmatprep.mubr.msk.f32.mxu0 %vm8716_vm2, %v10442_v9 }
 0x192   : > { %8260 = vmatmul.mubr.msk.f32.vlgmr.msra.gmra.mrb[24].mxu1 %vm1920_vm8, %v9762_v57  ;;  %8322 = vmatprep.subr.mxu0 %v10442_v9 }
 0x193   : > { %8268 = vmatpush3.msra.mxu1 %v9866_v13  ;;  %8269 = vmatprep.mubr.msk.f32.mxu1 %vm8716_vm2, %v10442_v9 }
 0x194   : > { %8315 = vmatmul.mubr.msk.f32.vlgmr.msra.gmra.mrb[20].mxu0 %vm1920_vm8, %v9858_v1  ;;  %8277 = vmatprep.subr.mxu1 %v10442_v9 }
 0x195   : > { %8323 = vmatpush3.msra.mxu0 %v9992_v22  ;;  %8324 = vmatprep.mubr.msk.f32.mxu0 %vm8716_vm2, %v10442_v9 }
 0x196   : > { %8270 = vmatmul.mubr.msk.f32.vlgmr.msra.gmra.mrb[26].mxu1 %vm1920_vm8, %v9939_v62  ;;  %8332 = vmatprep.subr.mxu0 %v10442_v9 }
 0x197   : > { %8278 = vmatpush3.msra.mxu1 %v9903_v3  ;;  %8279 = vmatprep.mubr.msk.f32.mxu1 %vm8716_vm2, %v10442_v9 }
 0x198   : > { %8325 = vmatmul.mubr.msk.f32.vlgmr.msra.gmra.mrb[22].mxu0 %vm1920_vm8, %v9714_v4  ;;  %8287 = vmatprep.subr.mxu1 %v10442_v9  ;;  %v1907_v4 = vmax.f32 %v1900_v36, 0.0 }
 0x199   : > { %8333 = vmatpush3.msra.mxu0 %v9992_v22  ;;  %8334 = vmatprep.mubr.msk.f32.mxu0 %vm8716_vm2, %v10442_v9 }
 0x19a   : > { %8280 = vmatmul.mubr.msk.f32.vlgmr.msra.gmra.mrb[28].mxu1 %vm1920_vm8, %v9719_v31  ;;  %8342 = vmatprep.subr.mxu0 %v10442_v9 }
 0x19b   : > { %8288 = vmatpush3.msra.mxu1 %v9903_v3  ;;  %8289 = vmatprep.mubr.msk.f32.mxu1 %vm8716_vm2, %v10442_v9 }
 0x19c   : > { %8335 = vmatmul.mubr.msk.f32.vlgmr.msra.gmra.mrb[24].mxu0 %vm1920_vm8, %v9779_v23  ;;  %8297 = vmatprep.subr.mxu1 %v10442_v9  ;;  %v5089_v23 = vrot.slane %v1907_v4, 2 }
 0x19d   : > { %8343 = vmatpush3.msra.mxu0 %v9992_v22  ;;  %8344 = vmatprep.mubr.msk.f32.mxu0 %vm8716_vm2, %v10442_v9 }
 0x19e   : > { %8290 = vmatmul.mubr.msk.f32.vlgmr.msra.gmra.mrb[30].mxu1 %vm1920_vm8, %v9800_v11  ;;  %8352 = vmatprep.subr.mxu0 %v10442_v9 }
 0x19f   : > { %8298 = vmatpush3.msra.mxu1 %v9960_v10  ;;  %8299 = vmatprep.mubr.msk.f32.mxu1 %vm8716_vm2, %v10442_v9 }
 0x1a0   : > { %8345 = vmatmul.mubr.msk.f32.vlgmr.msra.gmra.mrb[26].mxu0 %vm1920_vm8, %v1907_v4  ;;  %8307 = vmatprep.subr.mxu1 %v10442_v9 }
 0x1a1   : > { %8353 = vmatpush3.msra.mxu0 %v1915_v56  ;;  %8354 = vmatprep.mubr.msk.f32.mxu0 %vm8716_vm2, %v10442_v9 }
 0x1a2   : > { %8300 = vmatmul.mubr.msk.f32.vlgmr.msra.gmra.mrb[32].mxu1 %vm1920_vm8, %v2722_v32  ;;  %8362 = vmatprep.subr.mxu0 %v10442_v9 }
 0x1a3   : > { %8308 = vmatpush3.msra.mxu1 %v9960_v10  ;;  %8309 = vmatprep.mubr.msk.f32.mxu1 %vm8716_vm2, %v10442_v9 }
 0x1a4   : > { %8355 = vmatmul.mubr.msk.f32.vlgmr.msra.gmra.mrb[28].mxu0 %vm1920_vm8, %v9777_v40  ;;  %8317 = vmatprep.subr.mxu1 %v10442_v9  ;;  %v4015_v40 = vrot.slane %v9939_v62, 2 }
 0x1a5   : > { %8363 = vmatpush3.msra.mxu0 %v1915_v56  ;;  %8364 = vmatprep.mubr.msk.f32.mxu0 %vm8716_vm2, %v10442_v9 }
 0x1a6   : > { %8310 = vmatmul.mubr.msk.f32.vlgmr.msra.gmra.mrb[34].mxu1 %vm1920_vm8, %v9948_v58  ;;  %8372 = vmatprep.subr.mxu0 %v10442_v9 }
 0x1a7   : > { %8318 = vmatpush3.msra.mxu1 %v9960_v10  ;;  %8319 = vmatprep.mubr.msk.f32.mxu1 %vm8716_vm2, %v10442_v9 }
 0x1a8   : > { %8365 = vmatmul.mubr.msk.f32.vlgmr.msra.gmra.mrb[30].mxu0 %vm1920_vm8, %v3657_v7  ;;  %8327 = vmatprep.subr.mxu1 %v10442_v9 }
 0x1a9   : > { %8373 = vmatpush3.msra.mxu0 %v1916_v29  ;;  %8374 = vmatprep.mubr.msk.f32.mxu0 %vm8716_vm2, %v10442_v9 }
 0x1aa   : > { %8320 = vmatmul.mubr.msk.f32.vlgmr.msra.gmra.mrb[36].mxu1 %vm1920_vm8, %v4015_v40  ;;  %8382 = vmatprep.subr.mxu0 %v10442_v9 }
 0x1ab   : > { %8328 = vmatpush3.msra.mxu1 %v9992_v22  ;;  %8329 = vmatprep.mubr.msk.f32.mxu1 %vm8716_vm2, %v10442_v9 }
 0x1ac   : > { %8375 = vmatmul.mubr.msk.f32.vlgmr.msra.gmra.mrb[32].mxu0 %vm1920_vm8, %v9824_v63  ;;  %8337 = vmatprep.subr.mxu1 %v10442_v9  ;;  %v10127_v63 = vld [vmem:[%s10421_s5 + $0x8] sm:$0xff] }
 0x1ad   : > { %8383 = vmatpush3.msra.mxu0 %v1916_v29  ;;  %8384 = vmatprep.mubr.msk.f32.mxu0 %vm8716_vm2, %v10442_v9 }
 0x1ae   : > { %8330 = vmatmul.mubr.msk.f32.vlgmr.msra.gmra.mrb[38].mxu1 %vm1920_vm8, %v9762_v57  ;;  %8392 = vmatprep.subr.mxu0 %v10442_v9  ;;  %v4731_v57 = vrot.slane %v1907_v4, 1 }
 0x1af   : > { %8338 = vmatpush3.msra.mxu1 %v9992_v22  ;;  %8339 = vmatprep.mubr.msk.f32.mxu1 %vm8716_vm2, %v10442_v9 }
 0x1b0   : > { %8385 = vmatmul.mubr.msk.f32.vlgmr.msra.gmra.mrb[34].mxu0 %vm1920_vm8, %v9858_v1  ;;  %8347 = vmatprep.subr.mxu1 %v10442_v9 }
 0x1b1   : > { %8393 = vmatpush3.msra.mxu0 %v1916_v29  ;;  %8394 = vmatprep.mubr.msk.f32.mxu0 %vm8716_vm2, %v10442_v9 }
 0x1b2   : > { %8340 = vmatmul.mubr.msk.f32.vlgmr.msra.gmra.mrb[40].mxu1 %vm1920_vm8, %v9939_v62  ;;  %8402 = vmatprep.subr.mxu0 %v10442_v9 }
 0x1b3   : > { %8348 = vmatpush3.msra.mxu1 %v1915_v56  ;;  %8349 = vmatprep.mubr.msk.f32.mxu1 %vm8716_vm2, %v10442_v9 }
 0x1b4   : > { %8395 = vmatmul.mubr.msk.f32.vlgmr.msra.gmra.mrb[36].mxu0 %vm1920_vm8, %v5089_v23  ;;  %8357 = vmatprep.subr.mxu1 %v10442_v9 }
 0x1b5   : > { %8404 = vmatprep.mubr.msk.f32.mxu0 %vm8716_vm2, %v10442_v9  ;;  %8403 = vmatpush3.msra.mxu0 %v10127_v63 }
 0x1b6   : > { %8350 = vmatmul.mubr.msk.f32.vlgmr.msra.gmra.mrb[42].mxu1 %vm1920_vm8, %v9719_v31  ;;  %8412 = vmatprep.subr.mxu0 %v10442_v9 }
 0x1b7   : > { %8358 = vmatpush3.msra.mxu1 %v1915_v56  ;;  %8359 = vmatprep.mubr.msk.f32.mxu1 %vm8716_vm2, %v10442_v9 }
 0x1b8   : > { %8367 = vmatprep.subr.mxu1 %v10442_v9 }
 0x1ba   : > { %8360 = vmatmul.mubr.msk.f32.vlgmr.msra.gmra.mrb[44].mxu1 %vm1920_vm8, %v9800_v11 }
 0x1bb   : > { %8368 = vmatpush3.msra.mxu1 %v1915_v56  ;;  %8369 = vmatprep.mubr.msk.f32.mxu1 %vm8716_vm2, %v10442_v9 }
 0x1bc   : > { %8377 = vmatprep.subr.mxu1 %v10442_v9 }
 0x1be   : > { %8370 = vmatmul.mubr.msk.f32.vlgmr.msra.gmra.mrb[46].mxu1 %vm1920_vm8, %v4731_v57 }
 0x1bf   : > { %8378 = vmatpush3.msra.mxu1 %v1916_v29  ;;  %8379 = vmatprep.mubr.msk.f32.mxu1 %vm8716_vm2, %v10442_v9 }
 0x1c0   : > { %8387 = vmatprep.subr.mxu1 %v10442_v9 }
 0x1c2   : > { %8380 = vmatmul.mubr.msk.f32.vlgmr.msra.gmra.mrb[48].mxu1 %vm1920_vm8, %v9948_v58 }
 0x1c3   : > { %8388 = vmatpush3.msra.mxu1 %v1916_v29  ;;  %8389 = vmatprep.mubr.msk.f32.mxu1 %vm8716_vm2, %v10442_v9 }
 0x1c4   : > { %8397 = vmatprep.subr.mxu1 %v10442_v9 }
 0x1c6   : > { %8390 = vmatmul.mubr.msk.f32.vlgmr.msra.gmra.mrb[50].mxu1 %vm1920_vm8, %v4015_v40 }
 0x1c7   : > { %8399 = vmatprep.mubr.msk.f32.mxu1 %vm8716_vm2, %v10442_v9  ;;  %8398 = vmatpush3.msra.mxu1 %v10127_v63 }
 0x1c8   : > { %8407 = vmatprep.subr.mxu1 %v10442_v9 }
 0x207   : > { %v1989_v31 = vpop.f32.mrb[0].mxu1 }
 0x208   : > { %v8176_v11 = vpop.f32.mrb[1].mxu1 }
 0x219   : > { %v2063_v38 = vpop.f32.mrb[2].mxu1 }
 0x21a   : > { %v8181_v17 = vpop.f32.mrb[3].mxu1 }
 0x237   : > { %v2137_v12 = vpop.f32.mrb[4].mxu1 }
 0x238   : > { %v8186_v16 = vpop.f32.mrb[5].mxu1 }
 0x23f   : > { %v2573_v6 = vpop.f32.mrb[0].mxu0 }
 0x240   : > { %v8216_v45 = vpop.f32.mrb[1].mxu0 }
 0x241   : > { %v2211_v26 = vpop.f32.mrb[6].mxu1 }
 0x242   : > { %v2574_v1 = vadd.f32 %v2573_v6, %v2211_v26  ;;  %v8191_v13 = vpop.f32.mrb[7].mxu1 }
 0x243   : > { %v2718_v50 = vpop.f32.mrb[2].mxu0 }
 0x244   : > { %v8226_v33 = vpop.f32.mrb[3].mxu0 }
 0x245   : > { %v2285_v60 = vpop.f32.mrb[8].mxu1 }
 0x246   : > { %v8196_v19 = vpop.f32.mrb[9].mxu1 }
 0x247   : > { %v2864_v44 = vpop.f32.mrb[4].mxu0 }
 0x248   : > { %v8236_v61 = vpop.f32.mrb[5].mxu0 }
 0x249   : > { %v2357_v35 = vpop.f32.mrb[10].mxu1 }
 0x24a   : > { %v2358_v59 = vadd.f32 %v2357_v35, %v1989_v31  ;;  %v8201_v2 = vpop.f32.mrb[11].mxu1 }
 0x24b   : > { %v3010_v27 = vpop.f32.mrb[6].mxu0 }
 0x24c   : > { %v8246_v48 = vpop.f32.mrb[7].mxu0  ;;  %v3014_v47 = vadd.f32 %v2718_v50, %v2358_v59 }
 0x24d   : > { %v2429_v8 = vpop.f32.mrb[12].mxu1 }
 0x24e   : > { %v2430_v3 = vadd.f32 %v2429_v8, %v2063_v38  ;;  %v8206_v51 = vpop.f32.mrb[13].mxu1 }
 0x24f   : > { %v3155_v20 = vpop.f32.mrb[8].mxu0 }
 0x250   : > { %v8256_v52 = vpop.f32.mrb[9].mxu0 }
 0x251   : > { %v2501_v30 = vpop.f32.mrb[14].mxu1 }
 0x252   : > { %v2502_v37 = vadd.f32 %v2501_v30, %v2137_v12  ;;  %v8211_v18 = vpop.f32.mrb[15].mxu1 }
 0x253   : > { %v3295_v49 = vpop.f32.mrb[10].mxu0 }
 0x254   : > { %v8266_v0 = vpop.f32.mrb[11].mxu0  ;;  %v3016_v41 = vadd.f32 %v2864_v44, %v2502_v37 }
 0x255   : > { %v2645_v32 = vpop.f32.mrb[16].mxu1 }
 0x256   : > { %v2646_v15 = vadd.f32 %v2645_v32, %v2285_v60  ;;  %v8221_v62 = vpop.f32.mrb[17].mxu1 }
 0x257   : > { %v3443_v5 = vpop.f32.mrb[12].mxu0 }
 0x258   : > { %v8276_v24 = vpop.f32.mrb[13].mxu0  ;;  %v3018_v58 = vadd.f32 %v3010_v27, %v2646_v15 }
 0x259   : > { %v2791_v7 = vpop.f32.mrb[18].mxu1 }
 0x25a   : > { %v3015_v10 = vadd.f32 %v2791_v7, %v2430_v3  ;;  %v8231_v28 = vpop.f32.mrb[19].mxu1 }
 0x25b   : > { %v3583_v21 = vpop.f32.mrb[14].mxu0 }
 0x25c   : > { %v8286_v53 = vpop.f32.mrb[15].mxu0  ;;  %v3373_v55 = vadd.f32 %v3155_v20, %v3015_v10 }
 0x25d   : > { %v2937_v42 = vpop.f32.mrb[20].mxu1 }
 0x25e   : > { %v3017_v34 = vadd.f32 %v2937_v42, %v2574_v1  ;;  %v8241_v22 = vpop.f32.mrb[21].mxu1 }
 0x25f   : > { %v3726_v14 = vpop.f32.mrb[16].mxu0 }
 0x260   : > { %v8296_v39 = vpop.f32.mrb[17].mxu0  ;;  %v3375_v54 = vadd.f32 %v3295_v49, %v3017_v34 }
 0x261   : > { %v3085_v25 = vpop.f32.mrb[22].mxu1 }
 0x262   : > { %v3372_v46 = vadd.f32 %v3085_v25, %v3014_v47  ;;  %v8251_v43 = vpop.f32.mrb[23].mxu1 }
 0x263   : > { %v3871_v36 = vpop.f32.mrb[18].mxu0 }
 0x264   : > { %v8306_v4 = vpop.f32.mrb[19].mxu0  ;;  %v3730_v56 = vadd.f32 %v3443_v5, %v3372_v46  ;;  %v10136_v46 = vld [vmem:[%s10420_s4] ss:$0 sm:$0xff] }
 0x265   : > { %v3225_v29 = vpop.f32.mrb[24].mxu1 }
 0x266   : > { %v3374_v40 = vadd.f32 %v3225_v29, %v3016_v41  ;;  %v8261_v23 = vpop.f32.mrb[25].mxu1 }
 0x267   : > { %v4011_v57 = vpop.f32.mrb[20].mxu0 }
 0x268   : > { %v8316_v31 = vpop.f32.mrb[21].mxu0  ;;  %v3732_v11 = vadd.f32 %v3583_v21, %v3374_v40 }
 0x269   : > { %v3368_v38 = vpop.f32.mrb[26].mxu1 }
 0x26a   : > { %v3376_v17 = vadd.f32 %v3368_v38, %v3018_v58  ;;  %v8271_v12 = vpop.f32.mrb[27].mxu1 }
 0x26b   : > { %v4159_v16 = vpop.f32.mrb[22].mxu0 }
 0x26c   : > { %v8326_v6 = vpop.f32.mrb[23].mxu0  ;;  %v3734_v45 = vadd.f32 %v3726_v14, %v3376_v17 }
 0x26d   : > { %v3513_v26 = vpop.f32.mrb[28].mxu1 }
 0x26e   : > { %v3731_v1 = vadd.f32 %v3513_v26, %v3373_v55  ;;  %v8281_v13 = vpop.f32.mrb[29].mxu1 }
 0x26f   : > { %v4299_v50 = vpop.f32.mrb[24].mxu0  ;;  %v5183_v13 = vld [vmem:[%s10421_s5] sm:$0xff] }
 0x270   : > { %v8336_v33 = vpop.f32.mrb[25].mxu0  ;;  %v4089_v60 = vadd.f32 %v3871_v36, %v3731_v1 }
 0x271   : > { %v3653_v19 = vpop.f32.mrb[30].mxu1 }
 0x272   : > { %v3733_v44 = vadd.f32 %v3653_v19, %v3375_v54  ;;  %v8291_v61 = vpop.f32.mrb[31].mxu1 }
 0x273   : > { %v4442_v35 = vpop.f32.mrb[26].mxu0 }
 0x274   : > { %v8346_v59 = vpop.f32.mrb[27].mxu0  ;;  %v4091_v2 = vadd.f32 %v4011_v57, %v3733_v44  ;;  %v5185_v44 = vld [vmem:[%s10421_s5 + $0x10] sm:$0xff] }
 0x275   : > { %v3801_v27 = vpop.f32.mrb[32].mxu1 }
 0x276   : > { %v4088_v48 = vadd.f32 %v3801_v27, %v3730_v56  ;;  %v8301_v47 = vpop.f32.mrb[33].mxu1 }
 0x277   : > { %v4587_v8 = vpop.f32.mrb[28].mxu0 }
 0x278   : > { %v8356_v3 = vpop.f32.mrb[29].mxu0  ;;  %v4446_v51 = vadd.f32 %v4159_v16, %v4088_v48  ;;  %v5187_v48 = vld [vmem:[%s10421_s5 + $0x20] sm:$0xff] }
 0x279   : > { %v3941_v20 = vpop.f32.mrb[34].mxu1 }
 0x27a   : > { %v4090_v52 = vadd.f32 %v3941_v20, %v3732_v11  ;;  %v8311_v30 = vpop.f32.mrb[35].mxu1  ;;  %v5189_v20 = vld [vmem:[%s10421_s5 + $0x30] sm:$0xff] }
 0x27b   : > { %v4727_v37 = vpop.f32.mrb[30].mxu0 }
 0x27c   : > { %v8366_v18 = vpop.f32.mrb[31].mxu0  ;;  %v4448_v49 = vadd.f32 %v4299_v50, %v4090_v52 }
 0x27d   : > { %v4084_v0 = vpop.f32.mrb[36].mxu1 }
 0x27e   : > { %v4092_v41 = vadd.f32 %v4084_v0, %v3734_v45  ;;  %v8321_v32 = vpop.f32.mrb[37].mxu1 }
 0x27f   : > { %v4875_v15 = vpop.f32.mrb[32].mxu0  ;;  %v7161_v32 = vld [vmem:[%s10423_s7] sm:$0xff] }
 0x280   : > { %v8376_v62 = vpop.f32.mrb[33].mxu0  ;;  %v4450_v5 = vadd.f32 %v4442_v35, %v4092_v41 }
 0x281   : > { %v4229_v24 = vpop.f32.mrb[38].mxu1 }
 0x282   : > { %v4447_v58 = vadd.f32 %v4229_v24, %v4089_v60  ;;  %v8331_v7 = vpop.f32.mrb[39].mxu1 }
 0x283   : > { %v5015_v10 = vpop.f32.mrb[34].mxu0 }
 0x284   : > { %v8386_v28 = vpop.f32.mrb[35].mxu0  ;;  %v4805_v21 = vadd.f32 %v4587_v8, %v4447_v58 }
 0x285   : > { %v4369_v53 = vpop.f32.mrb[40].mxu1 }
 0x286   : > { %v4449_v55 = vadd.f32 %v4369_v53, %v4091_v2  ;;  %v8341_v42 = vpop.f32.mrb[41].mxu1  ;;  %v5186_v2 = vld [vmem:[%s10421_s5 + $0x18] sm:$0xff] }
 0x287   : > { %v5158_v34 = vpop.f32.mrb[36].mxu0 }
 0x288   : > { %v8396_v22 = vpop.f32.mrb[37].mxu0  ;;  %v4807_v14 = vadd.f32 %v4727_v37, %v4449_v55  ;;  %v5190_v37 = vld [vmem:[%s10421_s5 + $0x38] sm:$0xff] }
 0x289   : > { %v4517_v39 = vpop.f32.mrb[42].mxu1 }
 0x28a   : > { %v4804_v54 = vadd.f32 %v4517_v39, %v4446_v51  ;;  %v8351_v25 = vpop.f32.mrb[43].mxu1  ;;  %v5188_v51 = vld [vmem:[%s10421_s5 + $0x28] sm:$0xff] }
 0x28c   : > { %v5162_v43 = vadd.f32 %v4875_v15, %v4804_v54 }
 0x28d   : > { %v4657_v36 = vpop.f32.mrb[44].mxu1 }
 0x28e   : > { %v5173_v4 = vadd.f32 %v10136_v46, %v5162_v43  ;;  %v4806_v56 = vadd.f32 %v4657_v36, %v4448_v49  ;;  %v8361_v29 = vpop.f32.mrb[45].mxu1  ;;  %v5191_v49 = vld [vmem:[%s10421_s5 + $0x40] sm:$0xff] }
 0x290   : > { %v5178_v40 = vmax.f32 %v5173_v4, 0.0  ;;  %v5164_v23 = vadd.f32 %v5015_v10, %v4806_v56 }
 0x291   : > { %v4800_v57 = vpop.f32.mrb[46].mxu1 }
 0x292   : > { %v5194_v31 = vrot.slane %v5178_v40, 1  ;;  %v5175_v11 = vadd.f32 %v10136_v46, %v5164_v23  ;;  %v4808_v38 = vadd.f32 %v4800_v57, %v4450_v5  ;;  %v8371_v17 = vpop.f32.mrb[47].mxu1  ;;  %v5631_v35 = vrot.slane %v5178_v40, 2 }
 0x294   : > { %v10140_v12 = vmax.f32 %v5175_v11, 0.0  ;;  %v10142_v16 = vadd.f32 %v5158_v34, %v4808_v38  ;;  %8400 = vmatmul.mubr.msk.f32.vlgmr.msra.gmra.mrb[52].mxu1 %vm1920_vm8, %v5194_v31 }
 0x295   : > { %v4945_v6 = vpop.f32.mrb[48].mxu1  ;;  %8408 = vmatpush3.msra.mxu1 %v10127_v63  ;;  %8409 = vmatprep.mubr.msk.f32.mxu1 %vm8716_vm2, %v10442_v9 }
 0x296   : > { %v5163_v45 = vadd.f32 %v4945_v6, %v4805_v21  ;;  %v8381_v26 = vpop.f32.mrb[49].mxu1  ;;  %v10149_v1 = vrot.slane %v10140_v12, 1  ;;  %8417 = vmatprep.subr.mxu1 %v10442_v9  ;;  %v10181_v59 = vrot.slane %v10140_v12, 2  ;;  %v5177_v52 = vadd.f32 %v10136_v46, %v10142_v16 }
 0x298   : > { %v5174_v50 = vadd.f32 %v10136_v46, %v5163_v45  ;;  %8410 = vmatmul.mubr.msk.f32.vlgmr.msra.gmra.mrb[54].mxu1 %vm1920_vm8, %v10149_v1  ;;  %v5182_v30 = vmax.f32 %v5177_v52, 0.0 }
 0x299   : > { %v5085_v63 = vpop.f32.mrb[50].mxu1  ;;  %8418 = vmatpush3.msra.mxu1 %v5183_v13  ;;  %8419 = vmatprep.mubr.msk.f32.mxu1 %vm8716_vm2, %v10442_v9 }
 0x29a   : > { %v10160_v33 = vmax.f32 %v5174_v50, 0.0  ;;  %v5165_v60 = vadd.f32 %v5085_v63, %v4807_v14  ;;  %v8391_v19 = vpop.f32.mrb[51].mxu1  ;;  %8427 = vmatprep.subr.mxu1 %v10442_v9  ;;  %v7073_v0 = vrot.slane %v5182_v30, 2  ;;  %v6857_v41 = vrot.slane %v5182_v30, 1 }
 0x29c   : > { %v5268_v61 = vrot.slane %v10160_v33, 1  ;;  %8420 = vmatmul.mubr.msk.f32.vlgmr.msra.gmra.mrb[56].mxu1 %vm1920_vm8, %v10160_v33  ;;  %v5176_v27 = vadd.f32 %v10136_v46, %v5165_v60  ;;  %v5704_v47 = vrot.slane %v10160_v33, 2 }
 0x29d   : > { %8428 = vmatpush3.msra.mxu1 %v5185_v44  ;;  %8429 = vmatprep.mubr.msk.f32.mxu1 %vm8716_vm2, %v10442_v9 }
 0x29e   : > { %8405 = vmatmul.mubr.msk.f32.vlgmr.msra.gmra.mrb[38].mxu0 %vm1920_vm8, %v5268_v61  ;;  %8437 = vmatprep.subr.mxu1 %v10442_v9  ;;  %v10209_v8 = vmax.f32 %v5176_v27, 0.0 }
 0x29f   : > { %8413 = vmatpush3.msra.mxu0 %v5183_v13  ;;  %8414 = vmatprep.mubr.msk.f32.mxu0 %vm8716_vm2, %v10442_v9 }
 0x2a0   : > { %8430 = vmatmul.mubr.msk.f32.vlgmr.msra.gmra.mrb[58].mxu1 %vm1920_vm8, %v5631_v35  ;;  %8422 = vmatprep.subr.mxu0 %v10442_v9  ;;  %v6209_v3 = vrot.slane %v10209_v8, 1  ;;  %v6425_v18 = vrot.slane %v10209_v8, 2 }
 0x2a1   : > { %8438 = vmatpush3.msra.mxu1 %v5185_v44  ;;  %8439 = vmatprep.mubr.msk.f32.mxu1 %vm8716_vm2, %v10442_v9 }
 0x2a2   : > { %8415 = vmatmul.mubr.msk.f32.vlgmr.msra.gmra.mrb[40].mxu0 %vm1920_vm8, %v5178_v40  ;;  %8447 = vmatprep.subr.mxu1 %v10442_v9 }
 0x2a3   : > { %8423 = vmatpush3.msra.mxu0 %v5183_v13  ;;  %8424 = vmatprep.mubr.msk.f32.mxu0 %vm8716_vm2, %v10442_v9 }
 0x2a4   : > { %8440 = vmatmul.mubr.msk.f32.vlgmr.msra.gmra.mrb[60].mxu1 %vm1920_vm8, %v10181_v59  ;;  %8432 = vmatprep.subr.mxu0 %v10442_v9 }
 0x2a5   : > { %8448 = vmatpush3.msra.mxu1 %v5186_v2  ;;  %8449 = vmatprep.mubr.msk.f32.mxu1 %vm8716_vm2, %v10442_v9 }
 0x2a6   : > { %8425 = vmatmul.mubr.msk.f32.vlgmr.msra.gmra.mrb[42].mxu0 %vm1920_vm8, %v10140_v12  ;;  %8457 = vmatprep.subr.mxu1 %v10442_v9 }
 0x2a7   : > { %8433 = vmatpush3.msra.mxu0 %v5185_v44  ;;  %8434 = vmatprep.mubr.msk.f32.mxu0 %vm8716_vm2, %v10442_v9 }
 0x2a8   : > { %8450 = vmatmul.mubr.msk.f32.vlgmr.msra.gmra.mrb[62].mxu1 %vm1920_vm8, %v10140_v12  ;;  %8442 = vmatprep.subr.mxu0 %v10442_v9 }
 0x2a9   : > { %8458 = vmatpush3.msra.mxu1 %v5187_v48  ;;  %8459 = vmatprep.mubr.msk.f32.mxu1 %vm8716_vm2, %v10442_v9 }
 0x2aa   : > { %8435 = vmatmul.mubr.msk.f32.vlgmr.msra.gmra.mrb[44].mxu0 %vm1920_vm8, %v5704_v47  ;;  %8467 = vmatprep.subr.mxu1 %v10442_v9 }
 0x2ab   : > { %8443 = vmatpush3.msra.mxu0 %v5186_v2  ;;  %8444 = vmatprep.mubr.msk.f32.mxu0 %vm8716_vm2, %v10442_v9 }
 0x2ac   : > { %8460 = vmatmul.mubr.msk.f32.vlgmr.msra.gmra.mrb[64].mxu1 %vm1920_vm8, %v5268_v61  ;;  %8452 = vmatprep.subr.mxu0 %v10442_v9 }
 0x2ad   : > { %8468 = vmatpush3.msra.mxu1 %v5187_v48  ;;  %8469 = vmatprep.mubr.msk.f32.mxu1 %vm8716_vm2, %v10442_v9 }
 0x2ae   : > { %8445 = vmatmul.mubr.msk.f32.vlgmr.msra.gmra.mrb[46].mxu0 %vm1920_vm8, %v10160_v33  ;;  %8477 = vmatprep.subr.mxu1 %v10442_v9 }
 0x2af   : > { %8453 = vmatpush3.msra.mxu0 %v5186_v2  ;;  %8454 = vmatprep.mubr.msk.f32.mxu0 %vm8716_vm2, %v10442_v9 }
 0x2b0   : > { %8470 = vmatmul.mubr.msk.f32.vlgmr.msra.gmra.mrb[66].mxu1 %vm1920_vm8, %v6209_v3  ;;  %8462 = vmatprep.subr.mxu0 %v10442_v9 }
 0x2b1   : > { %8478 = vmatpush3.msra.mxu1 %v5188_v51  ;;  %8479 = vmatprep.mubr.msk.f32.mxu1 %vm8716_vm2, %v10442_v9 }
 0x2b2   : > { %8455 = vmatmul.mubr.msk.f32.vlgmr.msra.gmra.mrb[48].mxu0 %vm1920_vm8, %v10209_v8  ;;  %8487 = vmatprep.subr.mxu1 %v10442_v9 }
 0x2b3   : > { %8463 = vmatpush3.msra.mxu0 %v5187_v48  ;;  %8464 = vmatprep.mubr.msk.f32.mxu0 %vm8716_vm2, %v10442_v9 }
 0x2b4   : > { %8480 = vmatmul.mubr.msk.f32.vlgmr.msra.gmra.mrb[68].mxu1 %vm1920_vm8, %v10181_v59  ;;  %8472 = vmatprep.subr.mxu0 %v10442_v9 }
 0x2b5   : > { %8488 = vmatpush3.msra.mxu1 %v5189_v20  ;;  %8489 = vmatprep.mubr.msk.f32.mxu1 %vm8716_vm2, %v10442_v9 }
 0x2b6   : > { %8465 = vmatmul.mubr.msk.f32.vlgmr.msra.gmra.mrb[50].mxu0 %vm1920_vm8, %v10149_v1  ;;  %8497 = vmatprep.subr.mxu1 %v10442_v9 }
 0x2b7   : > { %8473 = vmatpush3.msra.mxu0 %v5188_v51  ;;  %8474 = vmatprep.mubr.msk.f32.mxu0 %vm8716_vm2, %v10442_v9 }
 0x2b8   : > { %8490 = vmatmul.mubr.msk.f32.vlgmr.msra.gmra.mrb[70].mxu1 %vm1920_vm8, %v10140_v12  ;;  %8482 = vmatprep.subr.mxu0 %v10442_v9 }
 0x2b9   : > { %8498 = vmatpush3.msra.mxu1 %v5189_v20  ;;  %8499 = vmatprep.mubr.msk.f32.mxu1 %vm8716_vm2, %v10442_v9 }
 0x2ba   : > { %8475 = vmatmul.mubr.msk.f32.vlgmr.msra.gmra.mrb[52].mxu0 %vm1920_vm8, %v5704_v47  ;;  %8507 = vmatprep.subr.mxu1 %v10442_v9 }
 0x2bb   : > { %8483 = vmatpush3.msra.mxu0 %v5188_v51  ;;  %8484 = vmatprep.mubr.msk.f32.mxu0 %vm8716_vm2, %v10442_v9 }
 0x2bc   : > { %8500 = vmatmul.mubr.msk.f32.vlgmr.msra.gmra.mrb[72].mxu1 %vm1920_vm8, %v5182_v30  ;;  %8492 = vmatprep.subr.mxu0 %v10442_v9 }
 0x2bd   : > { %8508 = vmatpush3.msra.mxu1 %v5190_v37  ;;  %8509 = vmatprep.mubr.msk.f32.mxu1 %vm8716_vm2, %v10442_v9 }
 0x2be   : > { %8485 = vmatmul.mubr.msk.f32.vlgmr.msra.gmra.mrb[54].mxu0 %vm1920_vm8, %v6425_v18  ;;  %8517 = vmatprep.subr.mxu1 %v10442_v9 }
 0x2bf   : > { %8493 = vmatpush3.msra.mxu0 %v5189_v20  ;;  %8494 = vmatprep.mubr.msk.f32.mxu0 %vm8716_vm2, %v10442_v9 }
 0x2c0   : > { %8510 = vmatmul.mubr.msk.f32.vlgmr.msra.gmra.mrb[74].mxu1 %vm1920_vm8, %v6209_v3  ;;  %8502 = vmatprep.subr.mxu0 %v10442_v9 }
 0x2c1   : > { %8518 = vmatpush3.msra.mxu1 %v5191_v49  ;;  %8519 = vmatprep.mubr.msk.f32.mxu1 %vm8716_vm2, %v10442_v9 }
 0x2c2   : > { %8495 = vmatmul.mubr.msk.f32.vlgmr.msra.gmra.mrb[56].mxu0 %vm1920_vm8, %v10209_v8  ;;  %8527 = vmatprep.subr.mxu1 %v10442_v9 }
 0x2c3   : > { %8503 = vmatpush3.msra.mxu0 %v5190_v37  ;;  %8504 = vmatprep.mubr.msk.f32.mxu0 %vm8716_vm2, %v10442_v9 }
 0x2c4   : > { %8520 = vmatmul.mubr.msk.f32.vlgmr.msra.gmra.mrb[76].mxu1 %vm1920_vm8, %v10181_v59  ;;  %8512 = vmatprep.subr.mxu0 %v10442_v9 }
 0x2c5   : > { %8528 = vmatpush3.msra.mxu1 %v5191_v49  ;;  %8529 = vmatprep.mubr.msk.f32.mxu1 %vm8716_vm2, %v10442_v9 }
 0x2c6   : > { %8505 = vmatmul.mubr.msk.f32.vlgmr.msra.gmra.mrb[58].mxu0 %vm1920_vm8, %v10149_v1 }
 0x2c7   : > { %8513 = vmatpush3.msra.mxu0 %v5190_v37  ;;  %8514 = vmatprep.mubr.msk.f32.mxu0 %vm8716_vm2, %v10442_v9 }
 0x2c8   : > { %8530 = vmatmul.mubr.msk.f32.vlgmr.msra.gmra.mrb[78].mxu1 %vm1920_vm8, %v7073_v0  ;;  %8522 = vmatprep.subr.mxu0 %v10442_v9 }
 0x2ca   : > { %8515 = vmatmul.mubr.msk.f32.vlgmr.msra.gmra.mrb[60].mxu0 %vm1920_vm8, %v6857_v41 }
 0x2cb   : > { %8523 = vmatpush3.msra.mxu0 %v5191_v49  ;;  %8524 = vmatprep.mubr.msk.f32.mxu0 %vm8716_vm2, %v10442_v9 }
 0x2cc   : > { %8532 = vmatprep.subr.mxu0 %v10442_v9 }
 0x2ce   : > { %8525 = vmatmul.mubr.msk.f32.vlgmr.msra.gmra.mrb[62].mxu0 %vm1920_vm8, %v6425_v18 }
 0x2cf   : > { %8534 = vmatprep.mubr.msk.f32.mxu0 %vm8716_vm2, %v10442_v9  ;;  %8533 = vmatpush3.msra.mxu0 %v7161_v32 }
 0x2d0   : > { %8537 = vmatprep.subr.mxu0 %v10442_v9 }
 0x367   : > { %v5263_v15 = vpop.f32.mrb[52].mxu1 }
 0x368   : > { %v8401_v62 = vpop.f32.mrb[53].mxu1 }
 0x36b   : > { %v5411_v5 = vpop.f32.mrb[54].mxu1 }
 0x36c   : > { %v8411_v24 = vpop.f32.mrb[55].mxu1 }
 0x36f   : > { %v5555_v58 = vpop.f32.mrb[56].mxu1 }
 0x370   : > { %v8421_v7 = vpop.f32.mrb[57].mxu1 }
 0x371   : > { %v5337_v10 = vpop.f32.mrb[38].mxu0  ;;  %v7996_v7 = vld [vmem:[%s10422_s6] ss:$0 sm:$0xff] }
 0x372   : > { %v5556_v28 = vadd.f32 %v5555_v58, %v5337_v10  ;;  %v8406_v21 = vpop.f32.mrb[39].mxu0 }
 0x373   : > { %v5700_v53 = vpop.f32.mrb[58].mxu1 }
 0x374   : > { %v8431_v55 = vpop.f32.mrb[59].mxu1 }
 0x375   : > { %v5483_v42 = vpop.f32.mrb[40].mxu0 }
 0x376   : > { %v5484_v34 = vadd.f32 %v5483_v42, %v5263_v15  ;;  %v8416_v22 = vpop.f32.mrb[41].mxu0 }
 0x377   : > { %v5846_v14 = vpop.f32.mrb[60].mxu1 }
 0x378   : > { %v8441_v39 = vpop.f32.mrb[61].mxu1  ;;  %v5850_v54 = vadd.f32 %v5700_v53, %v5484_v34 }
 0x379   : > { %v5627_v25 = vpop.f32.mrb[42].mxu0  ;;  %v7162_v39 = vld [vmem:[%s10423_s7 + $0x8] sm:$0xff] }
 0x37a   : > { %v5628_v46 = vadd.f32 %v5627_v25, %v5411_v5  ;;  %v8426_v43 = vpop.f32.mrb[43].mxu0 }
 0x37b   : > { %v5989_v36 = vpop.f32.mrb[62].mxu1 }
 0x37c   : > { %v8451_v4 = vpop.f32.mrb[63].mxu1  ;;  %v5852_v56 = vadd.f32 %v5846_v14, %v5628_v46 }
 0x37d   : > { %v5773_v29 = vpop.f32.mrb[44].mxu0 }
 0x37e   : > { %v5851_v40 = vadd.f32 %v5773_v29, %v5556_v28  ;;  %v8436_v23 = vpop.f32.mrb[45].mxu0 }
 0x37f   : > { %v6135_v57 = vpop.f32.mrb[64].mxu1  ;;  %v7165_v23 = vld [vmem:[%s10423_s7 + $0x20] sm:$0xff] }
 0x380   : > { %v8461_v31 = vpop.f32.mrb[65].mxu1  ;;  %v6067_v11 = vadd.f32 %v5989_v36, %v5851_v40  ;;  %v7163_v36 = vld [vmem:[%s10423_s7 + $0x10] sm:$0xff] }
 0x381   : > { %v5919_v38 = vpop.f32.mrb[46].mxu0  ;;  %v7166_v31 = vld [vmem:[%s10423_s7 + $0x28] sm:$0xff] }
 0x382   : > { %v6066_v17 = vadd.f32 %v5919_v38, %v5850_v54  ;;  %v8446_v12 = vpop.f32.mrb[47].mxu0  ;;  %v7167_v38 = vld [vmem:[%s10423_s7 + $0x30] sm:$0xff] }
 0x383   : > { %v6278_v16 = vpop.f32.mrb[66].mxu1 }
 0x384   : > { %v8471_v6 = vpop.f32.mrb[67].mxu1  ;;  %v6282_v45 = vadd.f32 %v6135_v57, %v6066_v17 }
 0x385   : > { %v6062_v26 = vpop.f32.mrb[48].mxu0 }
 0x386   : > { %v6068_v1 = vadd.f32 %v6062_v26, %v5852_v56  ;;  %v8456_v13 = vpop.f32.mrb[49].mxu0  ;;  %v7164_v56 = vld [vmem:[%s10423_s7 + $0x18] sm:$0xff] }
 0x387   : > { %v6421_v50 = vpop.f32.mrb[68].mxu1 }
 0x388   : > { %v8481_v63 = vpop.f32.mrb[69].mxu1  ;;  %v6284_v33 = vadd.f32 %v6278_v16, %v6068_v1  ;;  %v7168_v16 = vld [vmem:[%s10423_s7 + $0x38] sm:$0xff]  ;;  %v7170_v1 = vld [vmem:[%s10424_s8] sm:$0x1] }
 0x389   : > { %v6205_v60 = vpop.f32.mrb[50].mxu0 }
 0x38a   : > { %v6283_v19 = vadd.f32 %v6205_v60, %v6067_v11  ;;  %v8466_v44 = vpop.f32.mrb[51].mxu0 }
 0x38b   : > { %v6567_v61 = vpop.f32.mrb[70].mxu1 }
 0x38c   : > { %v8491_v35 = vpop.f32.mrb[71].mxu1  ;;  %v6499_v59 = vadd.f32 %v6421_v50, %v6283_v19 }
 0x38d   : > { %v6351_v2 = vpop.f32.mrb[52].mxu0 }
 0x38e   : > { %v6498_v27 = vadd.f32 %v6351_v2, %v6282_v45  ;;  %v8476_v48 = vpop.f32.mrb[53].mxu0  ;;  %v7169_v45 = vld [vmem:[%s10423_s7 + $0x40] sm:$0xff] }
 0x38f   : > { %v6710_v47 = vpop.f32.mrb[72].mxu1 }
 0x390   : > { %v8501_v8 = vpop.f32.mrb[73].mxu1  ;;  %v6714_v3 = vadd.f32 %v6567_v61, %v6498_v27 }
 0x391   : > { %v6494_v51 = vpop.f32.mrb[54].mxu0 }
 0x392   : > { %v6500_v20 = vadd.f32 %v6494_v51, %v6284_v33  ;;  %v8486_v52 = vpop.f32.mrb[55].mxu0 }
 0x393   : > { %v6853_v30 = vpop.f32.mrb[74].mxu1 }
 0x394   : > { %v8511_v37 = vpop.f32.mrb[75].mxu1  ;;  %v6716_v18 = vadd.f32 %v6710_v47, %v6500_v20 }
 0x395   : > { %v6637_v49 = vpop.f32.mrb[56].mxu0 }
 0x396   : > { %v6715_v0 = vadd.f32 %v6637_v49, %v6499_v59  ;;  %v8496_v41 = vpop.f32.mrb[57].mxu0 }
 0x397   : > { %v6999_v32 = vpop.f32.mrb[76].mxu1 }
 0x398   : > { %v8521_v15 = vpop.f32.mrb[77].mxu1  ;;  %v6931_v62 = vadd.f32 %v6853_v30, %v6715_v0 }
 0x399   : > { %v6783_v5 = vpop.f32.mrb[58].mxu0 }
 0x39a   : > { %v6930_v24 = vadd.f32 %v6783_v5, %v6714_v3  ;;  %v8506_v58 = vpop.f32.mrb[59].mxu0 }
 0x39b   : > { %v7142_v10 = vpop.f32.mrb[78].mxu1 }
 0x39c   : > { %v7146_v28 = vadd.f32 %v6999_v32, %v6930_v24  ;;  %v8531_v21 = vpop.f32.mrb[79].mxu1 }
 0x39d   : > { %v6926_v53 = vpop.f32.mrb[60].mxu0 }
 0x39e   : > { %v7155_v55 = vadd.f32 %v7996_v7, %v7146_v28  ;;  %v6932_v42 = vadd.f32 %v6926_v53, %v6716_v18  ;;  %v8516_v34 = vpop.f32.mrb[61].mxu0 }
 0x3a0   : > { %v7158_v22 = vmax.f32 %v7155_v55, 0.0  ;;  %v7148_v14 = vadd.f32 %v7142_v10, %v6932_v42 }
 0x3a1   : > { %v7069_v54 = vpop.f32.mrb[62].mxu0 }
 0x3a2   : > { %v7147_v25 = vadd.f32 %v7069_v54, %v6931_v62  ;;  %v8526_v46 = vpop.f32.mrb[63].mxu0  ;;  %8535 = vmatmul.mubr.msk.f32.vlgmr.msra.gmra.mrb[64].mxu0 %vm1920_vm8, %v7158_v22  ;;  %v7245_v43 = vrot.slane %v7158_v22, 1  ;;  %v7319_v4 = vrot.slane %v7158_v22, 2  ;;  %v7157_v17 = vadd.f32 %v7996_v7, %v7148_v14 }
 0x3a3   : > { %8538 = vmatpush3.msra.mxu0 %v7162_v39  ;;  %8539 = vmatprep.mubr.msk.f32.mxu0 %vm8716_vm2, %v10442_v9 }
 0x3a4   : > { %8542 = vmatprep.subr.mxu0 %v10442_v9  ;;  %v7156_v29 = vadd.f32 %v7996_v7, %v7147_v25  ;;  %v7160_v12 = vmax.f32 %v7157_v17, 0.0 }
 0x3a6   : > { %v7159_v40 = vmax.f32 %v7156_v29, 0.0  ;;  %v7689_v6 = vrot.slane %v7160_v12, 1  ;;  %v7763_v26 = vrot.slane %v7160_v12, 2 }
 0x3a8   : > { %v7467_v57 = vrot.slane %v7159_v40, 1  ;;  %v7541_v11 = vrot.slane %v7159_v40, 2 }
 0x3aa   : > { %8540 = vmatmul.mubr.msk.f32.vlgmr.msra.gmra.mrb[64].mxu0 %vm1920_vm8, %v7245_v43 }
 0x3ab   : > { %8543 = vmatpush3.msra.mxu0 %v7163_v36  ;;  %8544 = vmatprep.mubr.msk.f32.mxu0 %vm8716_vm2, %v10442_v9 }
 0x3ac   : > { %8547 = vmatprep.subr.mxu0 %v10442_v9 }
 0x3b2   : > { %8545 = vmatmul.mubr.msk.f32.vlgmr.msra.gmra.mrb[64].mxu0 %vm1920_vm8, %v7319_v4 }
 0x3b3   : > { %8548 = vmatpush3.msra.mxu0 %v7164_v56  ;;  %8549 = vmatprep.mubr.msk.f32.mxu0 %vm8716_vm2, %v10442_v9 }
 0x3b4   : > { %8552 = vmatprep.subr.mxu0 %v10442_v9 }
 0x3ba   : > { %8550 = vmatmul.mubr.msk.f32.vlgmr.msra.gmra.mrb[64].mxu0 %vm1920_vm8, %v7159_v40 }
 0x3bb   : > { %8553 = vmatpush3.msra.mxu0 %v7165_v23  ;;  %8554 = vmatprep.mubr.msk.f32.mxu0 %vm8716_vm2, %v10442_v9 }
 0x3bc   : > { %8557 = vmatprep.subr.mxu0 %v10442_v9 }
 0x3c2   : > { %8555 = vmatmul.mubr.msk.f32.vlgmr.msra.gmra.mrb[64].mxu0 %vm1920_vm8, %v7467_v57 }
 0x3c3   : > { %8558 = vmatpush3.msra.mxu0 %v7166_v31  ;;  %8559 = vmatprep.mubr.msk.f32.mxu0 %vm8716_vm2, %v10442_v9 }
 0x3c4   : > { %8562 = vmatprep.subr.mxu0 %v10442_v9 }
 0x3ca   : > { %8560 = vmatmul.mubr.msk.f32.vlgmr.msra.gmra.mrb[64].mxu0 %vm1920_vm8, %v7541_v11 }
 0x3cb   : > { %8563 = vmatpush3.msra.mxu0 %v7167_v38  ;;  %8564 = vmatprep.mubr.msk.f32.mxu0 %vm8716_vm2, %v10442_v9 }
 0x3cc   : > { %8567 = vmatprep.subr.mxu0 %v10442_v9 }
 0x3d2   : > { %8565 = vmatmul.mubr.msk.f32.vlgmr.msra.gmra.mrb[64].mxu0 %vm1920_vm8, %v7160_v12 }
 0x3d3   : > { %8568 = vmatpush3.msra.mxu0 %v7168_v16  ;;  %8569 = vmatprep.mubr.msk.f32.mxu0 %vm8716_vm2, %v10442_v9 }
 0x3d4   : > { %8572 = vmatprep.subr.mxu0 %v10442_v9 }
 0x3da   : > { %8570 = vmatmul.mubr.msk.f32.vlgmr.msra.gmra.mrb[64].mxu0 %vm1920_vm8, %v7689_v6 }
 0x3db   : > { %8573 = vmatpush3.msra.mxu0 %v7169_v45  ;;  %8574 = vmatprep.mubr.msk.f32.mxu0 %vm8716_vm2, %v10442_v9 }
 0x3e2   : > { %8575 = vmatmul.mubr.msk.f32.vlgmr.msra.gmra.mrb[64].mxu0 %vm1920_vm8, %v7763_v26 }
 0x4b5   : > { %v7832_v13 = vpop.f32.mrb[64].mxu0 }
 0x4b6   : > { %v8577_v50 = vadd.f32 %v7832_v13, %v7170_v1  ;;  %v8576_v63 = vpop.f32.mrb[65].mxu0 }
 0x4b8   : > { %7838 = vst.msk [vmem:[%s324_s24] sm:$0x1] %vm7837_vm9, %v8577_v50 }
 0x4b9   : > { %8663 = shalt.err (!%p8660_p3)
}
 0x4ba   : > { %s8664_s17 = scalar_lea.hbm %s10374_s28, 16  ;;  %s8668_s24 = scalar_lea.hbm %s10425_s9, 32 }
 0x4bb   : > { %p8665_p4 = scmp.ne.s32.totalorder %s10374_s28, %s8664_s17  ;;  %p8669_p9 = scmp.lt.u32.totalorder %s10374_s28, %s10425_s9 }
 0x4bc   : > { %p8670_p10 = scmp.lt.u32.totalorder %s8668_s24, %s8664_s17  ;;  %p8672_p12 = scmp.lt.u32.totalorder %s8664_s17, %s10374_s28 }
 0x4bd   : > { %p8666_p7 = pnand %p8665_p4, %p8806_p5 }
 0x4be   : > { %p8671_p11 = por %p8670_p10, %p8669_p9 }
 0x4bf   : > { %p8667_p8 = pneg %p8666_p7 }
 0x4c0   : > { %p8673_p13 = por %p8672_p12, %p8671_p11 }
 0x4c2   : > { %p8674_p0 = pnand %p8673_p13, %p8667_p8 }
 0x4c4   : > { %8677 = shalt.err (!%p8674_p0)
}
 0x4c5   : > { %8594 = dma.vmem_to_hbm [thread:$0]  (%p8806_p5), %s10376_s25, 16, %s10374_s28, %s7840_s29  }
 0x4c6 PF: > { %p8600_p1 = scmp.ge.s32.totalorder %s8712_s12, 2  ;;  %s7864_s14 = sand.u32 1, %s8700_s30  }
 0x4c7   : > { %s7865_s13 = scalar_lea.sflag [#allocation3], %s7864_s14 }
 0x4c8   : > { %p8597_p2 = pnand %p8600_p1, %p8810_p6 }
 0x4ca   : > { %8695 = dma.done.wait (!%p8597_p2), %s7865_s13, 16  }
 0x4cb   : > { %8697 = vsyncadd (!%p8597_p2), %s7865_s13, 4294967280  ;;  %p19_p3 = scmp.ge.s32.totalorder %s8793_s15, 4   ;;  %s10448_s30 = smov %s8704_s10 }
 0x4cc   : > { %s10449_s10 = smov %s8708_s11  ;;  %s10450_s11 = smov %s8804_s18 }
 0x4cd   : > { %s10451_s12 = smov %s8793_s15  ;;  %21 = sbr.rel (!%p19_p3) target bundleno = 3 (0x3), region = 91 }
 0x4d4   :  { %7869 = vsyncpa [#allocation3], 1 }
 0x4d5   :  { %7871 = vsyncpa [#allocation3 + $0x1], 1 }

</bundles_post_ra>
